<compile_context>
chip_gen: v5e
topology: v5e:2x2
jax: 0.10.0
libtpu: 0.0.40
codegen_flags: <defaults>
</compile_context>

<pallas_src>
import jax
import jax.numpy as jnp
from jax import lax
from jax.experimental import pallas as pl
from jax.experimental.pallas import tpu as pltpu

EPS = 1e-5                       # QBN_RM eps
LANES = 128


# ----------------------------------------------------------------------------
# helpers
# ----------------------------------------------------------------------------
def _round_up(x, m):
    return ((x + m - 1) // m) * m


def _round_up_lanes(c):
    return max(LANES, _round_up(c, LANES))


def _vmem_budgets():
    """Generation-aware (scoped-VMEM limit, per-call tile budget).
    v5e/v6e (128 MiB physical VMEM): 100 MiB limit, 56 MiB of double-buffered tiles.
    v7x (64 MiB physical) or unknown: 40 MiB limit, 20 MiB of tiles."""
    cap = None
    try:
        cap = getattr(pltpu.get_tpu_info(), "vmem_capacity_bytes", None)
    except Exception:
        cap = None
    if cap is not None and cap >= (100 << 20):
        return (100 << 20), (56 << 20)
    return (40 << 20), (20 << 20)


def _row_cap(budget, per_row_bytes, fixed_bytes=0):
    """Max rows per tile under `budget`, accounting for double-buffered in/out tiles
    (per_row_bytes) and resident weights / stats (fixed_bytes)."""
    return max((budget - fixed_bytes) // max(per_row_bytes, 1), 8)


def _pick_tile(M, candidates, cap):
    """Largest candidate row-tile <= cap that divides M; prefer >=2 grid steps so the
    parallel grid axis can be split across v7x's two TensorCores (neutral on v5e/v6e)."""
    cands = sorted({t for t in candidates if 0 < t <= M and M % t == 0}) or [M]
    ok = [t for t in cands if t <= cap] or [cands[0]]
    multi = [t for t in ok if M // t >= 2]
    return max(multi) if multi else max(ok)


def _qbn_inv(ssq_part, M):
    """QBN_RM (training mode): per-channel mod = sqrt(mean(x*x) + eps), where the mean runs
    over all 3 quaternion components and all B*S*K rows (3*M elements per channel, exactly
    the torch (x*x).permute(1,0,2,3).view(C,-1).mean(1)).  Returns 1/mod as [1, C] f32."""
    ssq = jnp.sum(ssq_part[:, 0, :], axis=0)                 # [C]
    mean = ssq / jnp.float32(3 * M)
    return (1.0 / jnp.sqrt(mean + EPS))[None, :]             # [1, C]


# ----------------------------------------------------------------------------
# Pallas kernels
# ----------------------------------------------------------------------------
def _make_first_layer_kernel(tm, cin_pad, cout):
    """Lane-dense grouped-feature tile [3, cin_pad, tm] -> in-kernel transpose ->
    1x1 conv (MXU) -> bf16 slab write + f32 partial sum-of-squares for QBN."""

    def kernel(x_ref, w_ref, z_ref, ssq_ref):
        w = w_ref[...]                                        # [cin_pad, cout] f32 (VMEM-resident)
        ssq = jnp.zeros((1, cout), jnp.float32)
        for q in range(3):
            xq = x_ref[q]                                     # [cin_pad, tm] f32, rows on lanes
            zq = jnp.dot(xq.T, w,                             # (tm, cin_pad) @ (cin_pad, cout)
                         preferred_element_type=jnp.float32)  # [tm, cout] f32
            z_ref[q] = zq.astype(z_ref.dtype)                 # bf16 slab
            ssq = ssq + jnp.sum(zq * zq, axis=0, keepdims=True)
        ssq_ref[...] = ssq.reshape(1, 1, cout)                # stats from the f32 accumulator

    return kernel


def _make_mid_layer_kernel(tm, cin, cout):
    """[QBN normalize + Qrelu] of the previous (bf16) layer -> 1x1 conv (bf16 MXU)
    -> bf16 slab write + f32 partial sum-of-squares."""

    def kernel(z_ref, inv_ref, w_ref, zo_ref, ssq_ref):
        zn = z_ref[...].astype(jnp.float32) * inv_ref[...]    # QBN: x * (1/sqrt(mean(x^2)+eps))
        m3sq = jnp.sum(zn * zn, axis=0)                       # [tm, cin] = |v|^2 over quaternion comps
        # Qrelu multiplier: |v| / max(1, |v|) = min(|v|, 1) = sqrt(min(|v|^2, 1))
        coeff = jnp.sqrt(jnp.minimum(m3sq, 1.0))
        y = (zn * coeff[None, :, :]).astype(jnp.bfloat16)     # bf16 operand for the MXU
        z = jnp.dot(y.reshape(3 * tm, cin), w_ref[...],
                    preferred_element_type=jnp.float32).reshape(3, tm, cout)
        zo_ref[...] = z.astype(zo_ref.dtype)                  # bf16 slab
        part = jnp.sum(jnp.sum(z * z, axis=0, keepdims=True), axis=1, keepdims=True)
        ssq_ref[...] = part                                   # [1, 1, cout] f32 (pre-downcast stats)

    return kernel


def _make_final_pool_kernel(tm, K, c):
    """[QBN normalize + Qrelu] of the last layer fused with the quaternion max-pool:
    per (point, channel) pick the neighbor with the largest post-Qrelu 3-vector modulus and
    emit its full 3-vector (first occurrence on ties, matching max_pool2d return_indices).
    |y| is a strictly increasing function of |zn|, so selecting on m3sq gives the identical
    argmax and tie structure without recomputing |y|."""
    tp = tm // K

    def kernel(z_ref, inv_ref, o_ref):
        zn = z_ref[...].astype(jnp.float32) * inv_ref[...]    # [3, tm, c]
        m3sq = jnp.sum(zn * zn, axis=0)                       # [tm, c]
        coeff = jnp.sqrt(jnp.minimum(m3sq, 1.0))              # Qrelu multiplier min(|v|,1)
        y = zn * coeff[None, :, :]
        yg = y.reshape(3, tp, K, c)                           # rows split into (point, neighbor)
        mg = m3sq.reshape(tp, K, c)
        mx = jnp.max(mg, axis=1, keepdims=True)               # [tp, 1, c]
        kio = lax.broadcasted_iota(jnp.int32, (tp, K, c), 1)
        first = jnp.min(jnp.where(mg == mx, kio, K), axis=1, keepdims=True)
        onehot = (kio == first).astype(y.dtype)
        o_ref[...] = jnp.sum(yg * onehot[None, :, :, :], axis=2).astype(o_ref.dtype)

    return kernel


# ----------------------------------------------------------------------------
# pallas_call wrappers (tiled, pipelined, weights VMEM-resident)
# ----------------------------------------------------------------------------
def _first_layer(x0, w0, tm, vmem_limit):
    _, cin_pad, M = x0.shape
    cout = w0.shape[1]
    T = M // tm
    return pl.pallas_call(
        _make_first_layer_kernel(tm, cin_pad, cout),
        out_shape=(jax.ShapeDtypeStruct((3, M, cout), jnp.bfloat16),
                   jax.ShapeDtypeStruct((T, 1, cout), jnp.float32)),
        grid=(T,),
        in_specs=[pl.BlockSpec((3, cin_pad, tm), lambda i: (0, 0, i)),   # lane-dense rows
                  pl.BlockSpec((cin_pad, cout), lambda i: (0, 0))],      # resident weight
        out_specs=(pl.BlockSpec((3, tm, cout), lambda i: (0, i, 0)),
                   pl.BlockSpec((1, 1, cout), lambda i: (i, 0, 0))),
        compiler_params=pltpu.CompilerParams(
            dimension_semantics=("parallel",), vmem_limit_bytes=vmem_limit),
    )(x0, w0)


def _mid_layer(z, inv, w, tm, vmem_limit):
    _, M, cin = z.shape
    cout = w.shape[1]
    T = M // tm
    return pl.pallas_call(
        _make_mid_layer_kernel(tm, cin, cout),
        out_shape=(jax.ShapeDtypeStruct((3, M, cout), jnp.bfloat16),
                   jax.ShapeDtypeStruct((T, 1, cout), jnp.float32)),
        grid=(T,),
        in_specs=[pl.BlockSpec((3, tm, cin), lambda i: (0, i, 0)),
                  pl.BlockSpec((1, cin), lambda i: (0, 0)),
                  pl.BlockSpec((cin, cout), lambda i: (0, 0))],
        out_specs=(pl.BlockSpec((3, tm, cout), lambda i: (0, i, 0)),
                   pl.BlockSpec((1, 1, cout), lambda i: (i, 0, 0))),
        compiler_params=pltpu.CompilerParams(
            dimension_semantics=("parallel",), vmem_limit_bytes=vmem_limit),
    )(z, inv, w)


def _final_pool(z, inv, tm, K, vmem_limit):
    _, M, c = z.shape
    T = M // tm
    tp = tm // K
    BS = M // K
    return pl.pallas_call(
        _make_final_pool_kernel(tm, K, c),
        out_shape=jax.ShapeDtypeStruct((3, BS, c), jnp.float32),
        grid=(T,),
        in_specs=[pl.BlockSpec((3, tm, c), lambda i: (0, i, 0)),
                  pl.BlockSpec((1, c), lambda i: (0, 0))],
        out_specs=pl.BlockSpec((3, tp, c), lambda i: (0, i, 0)),
        compiler_params=pltpu.CompilerParams(
            dimension_semantics=("parallel",), vmem_limit_bytes=vmem_limit),
    )(z, inv)


# ----------------------------------------------------------------------------
# Sampling / grouping glue (plain JAX, data-dependent & sequential)
# ----------------------------------------------------------------------------
def square_distance(src, dst):
    dist = -2.0 * jnp.matmul(src, jnp.swapaxes(dst, 1, 2))
    dist = dist + jnp.sum(src ** 2, axis=-1)[:, :, None]
    dist = dist + jnp.sum(dst ** 2, axis=-1)[:, None, :]
    return dist


def index_points(points, idx):
    B = points.shape[0]
    bidx = jnp.arange(B).reshape((B,) + (1,) * (idx.ndim - 1))
    return points[bidx, idx]


def farthest_point_sample(xyz, npoint):
    # equivalent to the reference loop (its extra final iteration is a no-op on outputs);
    # lax.fori_loop keeps trace size O(1) even for large npoint.
    B, N, _ = xyz.shape
    bidx = jnp.arange(B)

    def body(i, state):
        distance, centroid, centroids = state
        dist = jnp.sum((xyz - centroid) ** 2, axis=-1)
        distance = jnp.minimum(distance, dist)
        farthest = jnp.argmax(distance, axis=-1)
        centroids = centroids.at[:, i].set(farthest.astype(jnp.int32))
        centroid = xyz[bidx, farthest][:, None, :]
        return distance, centroid, centroids

    state0 = (jnp.full((B, N), 1e10, dtype=xyz.dtype),
              jnp.mean(xyz, axis=1, keepdims=True),
              jnp.zeros((B, npoint), dtype=jnp.int32))
    _, _, centroids = lax.fori_loop(0, npoint, body, state0)
    return centroids


def query_ball_point(radius, nsample, xyz, new_xyz):
    """Same result as the reference full sort()[..., :nsample], but via lax.top_k so only the
    nsample smallest candidates are selected (big win when N >> nsample)."""
    B, N, _ = xyz.shape
    sqrdists = square_distance(new_xyz, xyz)                           # [B, S, N]
    arange_n = jnp.arange(N, dtype=jnp.float32).reshape(1, 1, N)
    cand = jnp.where(sqrdists > radius ** 2, jnp.float32(N), arange_n)
    neg_top, _ = lax.top_k(-cand, nsample)                             # nsample smallest, ascending
    group_idx = (-neg_top).astype(jnp.int32)
    group_first = group_idx[:, :, 0:1]
    group_idx = jnp.where(group_idx == N,
                          jnp.broadcast_to(group_first, group_idx.shape),
                          group_idx)
    return group_idx


def sample_and_group_slab(npoint, radius, nsample, xyz, cin_pad):
    """points-is-None branch of the reference sample_and_group, producing the lane-dense
    layer-0 slab [3(q), cin_pad, B*S*K] (channel 0 = grouped_xyz_norm, channel 1 = grouped_xyz,
    channels >= 2 zero)."""
    B, N, C = xyz.shape
    fps_idx = farthest_point_sample(xyz, npoint)
    new_xyz = index_points(xyz, fps_idx)                               # [B, S, 3]
    idx = query_ball_point(radius, nsample, xyz, new_xyz)              # [B, S, K]
    grouped_xyz = index_points(xyz, idx)                               # [B, S, K, 3]
    grouped_norm = grouped_xyz - new_xyz[:, :, None, :]
    feat = jnp.stack([grouped_norm, grouped_xyz], axis=3)              # [B, S, K, 2, 3]
    x0 = jnp.transpose(feat, (4, 3, 0, 1, 2)).reshape(3, 2, B * npoint * nsample)
    if cin_pad > 2:
        x0 = jnp.pad(x0, ((0, 0), (0, cin_pad - 2), (0, 0)))
    return new_xyz, x0.astype(jnp.float32)


# ----------------------------------------------------------------------------
# Module
# ----------------------------------------------------------------------------
class PointNetSetAbstractionQ:
    def __init__(self, npoint, radius, nsample, in_channel, mlp, group_all, key):
        self.npoint = npoint
        self.radius = radius
        self.nsample = nsample
        self.group_all = group_all
        self.in_channel = in_channel
        self.out_channels = list(mlp)
        self.vmem_limit, self.tile_budget = _vmem_budgets()
        self.cin0_pad = max(8, _round_up(in_channel, 8))      # layer-0 channels on sublanes
        self.w0 = None                                        # f32 [cin0_pad, cout0_pad]
        self.weights = []                                     # bf16 [cin_pad, cout_pad] (layers >=1)
        last, last_pad = in_channel, self.cin0_pad
        for li, out_ch in enumerate(mlp):
            key, sub = jax.random.split(key)
            # deterministic stand-in for nn.Conv2d(last, out_ch, 1, bias=False).weight[:, :, 0, 0]
            w = jax.random.normal(sub, (out_ch, last), dtype=jnp.float32) / jnp.sqrt(float(last))
            out_pad = _round_up_lanes(out_ch)
            w_pad = jnp.zeros((last_pad, out_pad), jnp.float32).at[:last, :out_ch].set(
                jnp.transpose(w))
            if li == 0:
                self.w0 = w_pad
            else:
                self.weights.append(w_pad.astype(jnp.bfloat16))
            last, last_pad = out_ch, out_pad

    def __call__(self, xyz, points=None):
        # xyz: [B, 3, N]  (same input layout as the torch forward)
        # TODO(synk): the reference `points is not None` branch indexes a [B,N,D] tensor with a
        #             [B*3,...] index tensor (shape-inconsistent in torch); not implemented.
        assert points is None
        # TODO(synk): group_all path in the reference is only shape-consistent when nsample == N;
        #             not implemented here.
        assert not self.group_all
        assert self.in_channel == 2, "points-is-None path implies 2 input channels (norm, xyz)"

        B, C, N = xyz.shape
        S, K = self.npoint, self.nsample
        M = B * S * K
        BS = B * S
        limit, budget = self.vmem_limit, self.tile_budget

        xyz_t = jnp.transpose(xyz, (0, 2, 1))                          # [B, N, 3]
        new_xyz, x0 = sample_and_group_slab(S, self.radius, K, xyz_t, self.cin0_pad)
        assert x0.shape == (3, self.cin0_pad, M)

        # ---- layer 0: lane-dense read -> in-kernel transpose -> conv1x1 -> bf16 slab + stats
        cout0 = self.w0.shape[1]
        per_row0 = 2 * (3 * self.cin0_pad * 4 + 3 * cout0 * 2)         # double-buffered in+out
        cap0 = _row_cap(budget, per_row0, fixed_bytes=2 * self.w0.size * 4)
        tm0 = _pick_tile(M, [t for t in range(128, M + 1, 128) if M % t == 0] + [M], cap0)
        z, ssq_part = _first_layer(x0, self.w0, tm0, limit)
        inv = _qbn_inv(ssq_part, M)

        # ---- middle layers: fused [QBN norm + Qrelu] -> conv1x1 (bf16 MXU) -> bf16 slab + stats
        for w in self.weights:
            cin_p, cout_p = w.shape
            per_row = 2 * 3 * (cin_p + cout_p) * 2
            cap = _row_cap(budget, per_row, fixed_bytes=2 * w.size * 2)
            tm = _pick_tile(M, [t for t in range(16, M + 1, 16) if M % t == 0] + [M], cap)
            z, ssq_part = _mid_layer(z, inv, w, tm, limit)
            inv = _qbn_inv(ssq_part, M)

        # ---- final: fused [QBN norm + Qrelu] -> quaternion max-pool over the K neighbors
        c_pad = z.shape[-1]
        per_row_p = 2 * (3 * c_pad * 2 + (3 * c_pad * 4) // max(K, 1))
        cap_p = _row_cap(budget, per_row_p)
        pool_cands = ([g * K for g in range(8, BS + 1, 8)
                       if BS % g == 0 and (g * K) % 16 == 0] + [M])
        tm_p = _pick_tile(M, pool_cands, cap_p)
        pooled = _final_pool(z, inv, tm_p, K, limit)                   # [3, B*S, Cpad] f32

        c_last = self.out_channels[-1]
        out = jnp.transpose(pooled.reshape(3, B, S, c_pad), (1, 0, 3, 2))   # [B, 3, Cpad, S]
        new_points_out = out.reshape(B * 3, c_pad, S)[:, :c_last, :]        # [B*3, C_last, S]
        new_xyz_out = jnp.transpose(new_xyz, (0, 2, 1))                     # [B, 3, S]
        return new_xyz_out, new_points_out


# ----------------------------------------------------------------------------
if __name__ == "__main__":
    key = jax.random.PRNGKey(0)
    k_xyz, k_w = jax.random.split(key)

    B, N = 2, 32
    npoint, radius, nsample = 8, 0.4, 16
    mlp = [16, 32]

    xyz = jax.random.uniform(k_xyz, (B, 3, N), dtype=jnp.float32)      # [B, C=3, N]

    sa = PointNetSetAbstractionQ(npoint=npoint, radius=radius, nsample=nsample,
                                 in_channel=2, mlp=mlp, group_all=False, key=k_w)

    new_xyz, new_points = jax.jit(lambda x: sa(x, None))(xyz)
    jax.block_until_ready((new_xyz, new_points))

    assert new_xyz.shape == (B, 3, npoint)
    assert new_points.shape == (B * 3, mlp[-1], npoint)
    assert bool(jnp.all(jnp.isfinite(new_xyz))) and bool(jnp.all(jnp.isfinite(new_points)))
    print("KERNEL_OK")
</pallas_src>

<mosaic_0001>
module attributes {stable_mosaic.version = 11 : i64} {
  func.func @kernel(%arg0: i32, %arg1: memref<3x8x128xf32, #tpu.memory_space<vmem>>, %arg2: memref<8x128xf32, #tpu.memory_space<vmem>>, %arg3: memref<3x128x128xbf16, #tpu.memory_space<vmem>>, %arg4: memref<1x1x128xf32, #tpu.memory_space<vmem>>) attributes {dimension_semantics = [#tpu.dimension_semantics<parallel>], iteration_bounds = array<i64: 2>, scalar_prefetch = 0 : i64, scratch_operands = 0 : i64, tpu.core_type = #tpu.core_type<tc>, window_params = [{transform_indices = @transform_0, window_bounds = array<i64: 3, 8, 128>}, {pipeline_mode = #tpu.pipeline_mode<synchronous>, transform_indices = @transform_1, window_bounds = array<i64: 8, 128>}, {transform_indices = @transform_2, window_bounds = array<i64: 3, 128, 128>}, {transform_indices = @transform_3, window_bounds = array<i64: 1, 1, 128>}]} {
    %c0 = arith.constant 0 : index
    %c0_0 = arith.constant 0 : index
    %0 = vector.load %arg2[%c0, %c0_0] : memref<8x128xf32, #tpu.memory_space<vmem>>, vector<8x128xf32>
    %cst = arith.constant 0.000000e+00 : f32
    %1 = vector.broadcast %cst : f32 to vector<1x128xf32>
    %c0_1 = arith.constant 0 : index
    %c0_2 = arith.constant 0 : index
    %c0_3 = arith.constant 0 : index
    %2 = vector.load %arg1[%c0_1, %c0_2, %c0_3] : memref<3x8x128xf32, #tpu.memory_space<vmem>>, vector<1x8x128xf32>
    %3 = vector.shape_cast %2 : vector<1x8x128xf32> to vector<8x128xf32>
    %4 = tpu.transpose %3, [1, 0] : vector<8x128xf32> -> vector<128x8xf32>
    %cst_4 = arith.constant dense<0.000000e+00> : vector<128x128xf32>
    %5 = tpu.matmul %4, %0, %cst_4 {dimension_numbers = #tpu.dot_dimension_numbers<[1], [0], [0], [1], [0, 0, 1, 1], [], []>} : vector<128x8xf32>, vector<8x128xf32>, vector<128x128xf32> -> vector<128x128xf32>
    %6 = arith.truncf %5 : vector<128x128xf32> to vector<128x128xbf16>
    %c0_5 = arith.constant 0 : index
    %c0_6 = arith.constant 0 : index
    %c0_7 = arith.constant 0 : index
    %7 = vector.load %arg3[%c0_5, %c0_6, %c0_7] : memref<3x128x128xbf16, #tpu.memory_space<vmem>>, vector<1x128x128xbf16>
    %8 = vector.shape_cast %7 : vector<1x128x128xbf16> to vector<128x128xbf16>
    %9 = vector.shape_cast %6 : vector<128x128xbf16> to vector<1x128x128xbf16>
    tpu.vector_store %arg3[%c0_5, %c0_6, %c0_7], %9 {strides = array<i32>} : memref<3x128x128xbf16, #tpu.memory_space<vmem>>, vector<1x128x128xbf16>,
    %10 = arith.mulf %5, %5 : vector<128x128xf32>
    %cst_8 = arith.constant dense<0.000000e+00> : vector<128xf32>
    %11 = vector.multi_reduction <add>, %10, %cst_8 [0] : vector<128x128xf32> to vector<128xf32>
    %12 = vector.shape_cast %11 : vector<128xf32> to vector<1x128xf32>
    %13 = arith.addf %1, %12 : vector<1x128xf32>
    %c1 = arith.constant 1 : index
    %c0_9 = arith.constant 0 : index
    %c0_10 = arith.constant 0 : index
    %14 = vector.load %arg1[%c1, %c0_9, %c0_10] : memref<3x8x128xf32, #tpu.memory_space<vmem>>, vector<1x8x128xf32>
    %15 = vector.shape_cast %14 : vector<1x8x128xf32> to vector<8x128xf32>
    %16 = tpu.transpose %15, [1, 0] : vector<8x128xf32> -> vector<128x8xf32>
    %cst_11 = arith.constant dense<0.000000e+00> : vector<128x128xf32>
    %17 = tpu.matmul %16, %0, %cst_11 {dimension_numbers = #tpu.dot_dimension_numbers<[1], [0], [0], [1], [0, 0, 1, 1], [], []>} : vector<128x8xf32>, vector<8x128xf32>, vector<128x128xf32> -> vector<128x128xf32>
    %18 = arith.truncf %17 : vector<128x128xf32> to vector<128x128xbf16>
    %c1_12 = arith.constant 1 : index
    %c0_13 = arith.constant 0 : index
    %c0_14 = arith.constant 0 : index
    %19 = vector.load %arg3[%c1_12, %c0_13, %c0_14] : memref<3x128x128xbf16, #tpu.memory_space<vmem>>, vector<1x128x128xbf16>
    %20 = vector.shape_cast %19 : vector<1x128x128xbf16> to vector<128x128xbf16>
    %21 = vector.shape_cast %18 : vector<128x128xbf16> to vector<1x128x128xbf16>
    tpu.vector_store %arg3[%c1_12, %c0_13, %c0_14], %21 {strides = array<i32>} : memref<3x128x128xbf16, #tpu.memory_space<vmem>>, vector<1x128x128xbf16>,
    %22 = arith.mulf %17, %17 : vector<128x128xf32>
    %cst_15 = arith.constant dense<0.000000e+00> : vector<128xf32>
    %23 = vector.multi_reduction <add>, %22, %cst_15 [0] : vector<128x128xf32> to vector<128xf32>
    %24 = vector.shape_cast %23 : vector<128xf32> to vector<1x128xf32>
    %25 = arith.addf %13, %24 : vector<1x128xf32>
    %c2 = arith.constant 2 : index
    %c0_16 = arith.constant 0 : index
    %c0_17 = arith.constant 0 : index
    %26 = vector.load %arg1[%c2, %c0_16, %c0_17] : memref<3x8x128xf32, #tpu.memory_space<vmem>>, vector<1x8x128xf32>
    %27 = vector.shape_cast %26 : vector<1x8x128xf32> to vector<8x128xf32>
    %28 = tpu.transpose %27, [1, 0] : vector<8x128xf32> -> vector<128x8xf32>
    %cst_18 = arith.constant dense<0.000000e+00> : vector<128x128xf32>
    %29 = tpu.matmul %28, %0, %cst_18 {dimension_numbers = #tpu.dot_dimension_numbers<[1], [0], [0], [1], [0, 0, 1, 1], [], []>} : vector<128x8xf32>, vector<8x128xf32>, vector<128x128xf32> -> vector<128x128xf32>
    %30 = arith.truncf %29 : vector<128x128xf32> to vector<128x128xbf16>
    %c2_19 = arith.constant 2 : index
    %c0_20 = arith.constant 0 : index
    %c0_21 = arith.constant 0 : index
    %31 = vector.load %arg3[%c2_19, %c0_20, %c0_21] : memref<3x128x128xbf16, #tpu.memory_space<vmem>>, vector<1x128x128xbf16>
    %32 = vector.shape_cast %31 : vector<1x128x128xbf16> to vector<128x128xbf16>
    %33 = vector.shape_cast %30 : vector<128x128xbf16> to vector<1x128x128xbf16>
    tpu.vector_store %arg3[%c2_19, %c0_20, %c0_21], %33 {strides = array<i32>} : memref<3x128x128xbf16, #tpu.memory_space<vmem>>, vector<1x128x128xbf16>,
    %34 = arith.mulf %29, %29 : vector<128x128xf32>
    %cst_22 = arith.constant dense<0.000000e+00> : vector<128xf32>
    %35 = vector.multi_reduction <add>, %34, %cst_22 [0] : vector<128x128xf32> to vector<128xf32>
    %36 = vector.shape_cast %35 : vector<128xf32> to vector<1x128xf32>
    %37 = arith.addf %25, %36 : vector<1x128xf32>
    %38 = vector.shape_cast %37 : vector<1x128xf32> to vector<1x1x128xf32>
    %c0_23 = arith.constant 0 : index
    %c0_24 = arith.constant 0 : index
    %c0_25 = arith.constant 0 : index
    %39 = vector.load %arg4[%c0_23, %c0_24, %c0_25] : memref<1x1x128xf32, #tpu.memory_space<vmem>>, vector<1x1x128xf32>
    tpu.vector_store %arg4[%c0_23, %c0_24, %c0_25], %38 {strides = array<i32>} : memref<1x1x128xf32, #tpu.memory_space<vmem>>, vector<1x1x128xf32>,
    return
  }
  func.func @transform_0(%arg0: i32) -> (i32, i32, i32) {
    %c0_i32 = arith.constant 0 : i32
    %c0_i32_0 = arith.constant 0 : i32
    %c0_i32_1 = arith.constant 0 : i32
    return %c0_i32, %c0_i32_0, %arg0 : i32, i32, i32
  }
  func.func @transform_1(%arg0: i32) -> (i32, i32) {
    %c0_i32 = arith.constant 0 : i32
    %c0_i32_0 = arith.constant 0 : i32
    %c0_i32_1 = arith.constant 0 : i32
    return %c0_i32, %c0_i32_0 : i32, i32
  }
  func.func @transform_2(%arg0: i32) -> (i32, i32, i32) {
    %c0_i32 = arith.constant 0 : i32
    %c0_i32_0 = arith.constant 0 : i32
    %c0_i32_1 = arith.constant 0 : i32
    return %c0_i32, %arg0, %c0_i32_0 : i32, i32, i32
  }
  func.func @transform_3(%arg0: i32) -> (i32, i32, i32) {
    %c0_i32 = arith.constant 0 : i32
    %c0_i32_0 = arith.constant 0 : i32
    %c0_i32_1 = arith.constant 0 : i32
    return %arg0, %c0_i32, %c0_i32_0 : i32, i32, i32
  }
}

module attributes {stable_mosaic.version = 11 : i64} {
  func.func @kernel(%arg0: i32, %arg1: memref<3x128x128xbf16, #tpu.memory_space<vmem>>, %arg2: memref<1x128xf32, #tpu.memory_space<vmem>>, %arg3: memref<128x128xbf16, #tpu.memory_space<vmem>>, %arg4: memref<3x128x128xbf16, #tpu.memory_space<vmem>>, %arg5: memref<1x1x128xf32, #tpu.memory_space<vmem>>) attributes {dimension_semantics = [#tpu.dimension_semantics<parallel>], iteration_bounds = array<i64: 2>, scalar_prefetch = 0 : i64, scratch_operands = 0 : i64, tpu.core_type = #tpu.core_type<tc>, window_params = [{transform_indices = @transform_0, window_bounds = array<i64: 3, 128, 128>}, {pipeline_mode = #tpu.pipeline_mode<synchronous>, transform_indices = @transform_1, window_bounds = array<i64: 1, 128>}, {pipeline_mode = #tpu.pipeline_mode<synchronous>, transform_indices = @transform_2, window_bounds = array<i64: 128, 128>}, {transform_indices = @transform_3, window_bounds = array<i64: 3, 128, 128>}, {transform_indices = @transform_4, window_bounds = array<i64: 1, 1, 128>}]} {
    %c0 = arith.constant 0 : index
    %c0_0 = arith.constant 0 : index
    %c0_1 = arith.constant 0 : index
    %0 = vector.load %arg1[%c0, %c0_0, %c0_1] : memref<3x128x128xbf16, #tpu.memory_space<vmem>>, vector<3x128x128xbf16>
    %1 = arith.extf %0 : vector<3x128x128xbf16> to vector<3x128x128xf32>
    %c0_2 = arith.constant 0 : index
    %c0_3 = arith.constant 0 : index
    %2 = vector.load %arg2[%c0_2, %c0_3] : memref<1x128xf32, #tpu.memory_space<vmem>>, vector<1x128xf32>
    %3 = vector.shape_cast %2 : vector<1x128xf32> to vector<1x1x128xf32>
    %4 = vector.broadcast %3 : vector<1x1x128xf32> to vector<3x128x128xf32>
    %5 = arith.mulf %1, %4 : vector<3x128x128xf32>
    %6 = arith.mulf %5, %5 : vector<3x128x128xf32>
    %cst = arith.constant dense<0.000000e+00> : vector<128x128xf32>
    %7 = vector.multi_reduction <add>, %6, %cst [0] : vector<3x128x128xf32> to vector<128x128xf32>
    %cst_4 = arith.constant 1.000000e+00 : f32
    %8 = vector.broadcast %cst_4 : f32 to vector<128x128xf32>
    %9 = arith.minimumf %7, %8 : vector<128x128xf32>
    %10 = math.sqrt %9 : vector<128x128xf32>
    %11 = vector.shape_cast %10 : vector<128x128xf32> to vector<1x128x128xf32>
    %12 = vector.broadcast %11 : vector<1x128x128xf32> to vector<3x128x128xf32>
    %13 = arith.mulf %5, %12 : vector<3x128x128xf32>
    %14 = arith.truncf %13 : vector<3x128x128xf32> to vector<3x128x128xbf16>
    %15 = vector.shape_cast %14 : vector<3x128x128xbf16> to vector<384x128xbf16>
    %c0_5 = arith.constant 0 : index
    %c0_6 = arith.constant 0 : index
    %16 = vector.load %arg3[%c0_5, %c0_6] : memref<128x128xbf16, #tpu.memory_space<vmem>>, vector<128x128xbf16>
    %cst_7 = arith.constant dense<0.000000e+00> : vector<384x128xf32>
    %17 = tpu.matmul %15, %16, %cst_7 {dimension_numbers = #tpu.dot_dimension_numbers<[1], [0], [0], [1], [0, 0, 1, 1], [], []>} : vector<384x128xbf16>, vector<128x128xbf16>, vector<384x128xf32> -> vector<384x128xf32>
    %18 = vector.shape_cast %17 : vector<384x128xf32> to vector<3x128x128xf32>
    %19 = arith.truncf %18 : vector<3x128x128xf32> to vector<3x128x128xbf16>
    %c0_8 = arith.constant 0 : index
    %c0_9 = arith.constant 0 : index
    %c0_10 = arith.constant 0 : index
    %20 = vector.load %arg4[%c0_8, %c0_9, %c0_10] : memref<3x128x128xbf16, #tpu.memory_space<vmem>>, vector<3x128x128xbf16>
    tpu.vector_store %arg4[%c0_8, %c0_9, %c0_10], %19 {strides = array<i32>} : memref<3x128x128xbf16, #tpu.memory_space<vmem>>, vector<3x128x128xbf16>,
    %21 = arith.mulf %18, %18 : vector<3x128x128xf32>
    %cst_11 = arith.constant dense<0.000000e+00> : vector<128x128xf32>
    %22 = vector.multi_reduction <add>, %21, %cst_11 [0] : vector<3x128x128xf32> to vector<128x128xf32>
    %23 = vector.shape_cast %22 : vector<128x128xf32> to vector<1x128x128xf32>
    %cst_12 = arith.constant dense<0.000000e+00> : vector<1x128xf32>
    %24 = vector.multi_reduction <add>, %23, %cst_12 [1] : vector<1x128x128xf32> to vector<1x128xf32>
    %25 = vector.shape_cast %24 : vector<1x128xf32> to vector<1x1x128xf32>
    %c0_13 = arith.constant 0 : index
    %c0_14 = arith.constant 0 : index
    %c0_15 = arith.constant 0 : index
    %26 = vector.load %arg5[%c0_13, %c0_14, %c0_15] : memref<1x1x128xf32, #tpu.memory_space<vmem>>, vector<1x1x128xf32>
    tpu.vector_store %arg5[%c0_13, %c0_14, %c0_15], %25 {strides = array<i32>} : memref<1x1x128xf32, #tpu.memory_space<vmem>>, vector<1x1x128xf32>,
    return
  }
  func.func @transform_0(%arg0: i32) -> (i32, i32, i32) {
    %c0_i32 = arith.constant 0 : i32
    %c0_i32_0 = arith.constant 0 : i32
    %c0_i32_1 = arith.constant 0 : i32
    return %c0_i32, %arg0, %c0_i32_0 : i32, i32, i32
  }
  func.func @transform_1(%arg0: i32) -> (i32, i32) {
    %c0_i32 = arith.constant 0 : i32
    %c0_i32_0 = arith.constant 0 : i32
    %c0_i32_1 = arith.constant 0 : i32
    return %c0_i32, %c0_i32_0 : i32, i32
  }
  func.func @transform_2(%arg0: i32) -> (i32, i32) {
    %c0_i32 = arith.constant 0 : i32
    %c0_i32_0 = arith.constant 0 : i32
    %c0_i32_1 = arith.constant 0 : i32
    return %c0_i32, %c0_i32_0 : i32, i32
  }
  func.func @transform_3(%arg0: i32) -> (i32, i32, i32) {
    %c0_i32 = arith.constant 0 : i32
    %c0_i32_0 = arith.constant 0 : i32
    %c0_i32_1 = arith.constant 0 : i32
    return %c0_i32, %arg0, %c0_i32_0 : i32, i32, i32
  }
  func.func @transform_4(%arg0: i32) -> (i32, i32, i32) {
    %c0_i32 = arith.constant 0 : i32
    %c0_i32_0 = arith.constant 0 : i32
    %c0_i32_1 = arith.constant 0 : i32
    return %arg0, %c0_i32, %c0_i32_0 : i32, i32, i32
  }
}

module attributes {stable_mosaic.version = 11 : i64} {
  func.func @kernel(%arg0: i32, %arg1: memref<3x128x128xbf16, #tpu.memory_space<vmem>>, %arg2: memref<1x128xf32, #tpu.memory_space<vmem>>, %arg3: memref<3x8x128xf32, #tpu.memory_space<vmem>>) attributes {dimension_semantics = [#tpu.dimension_semantics<parallel>], iteration_bounds = array<i64: 2>, scalar_prefetch = 0 : i64, scratch_operands = 0 : i64, tpu.core_type = #tpu.core_type<tc>, window_params = [{transform_indices = @transform_0, window_bounds = array<i64: 3, 128, 128>}, {pipeline_mode = #tpu.pipeline_mode<synchronous>, transform_indices = @transform_1, window_bounds = array<i64: 1, 128>}, {transform_indices = @transform_2, window_bounds = array<i64: 3, 8, 128>}]} {
    %c0 = arith.constant 0 : index
    %c0_0 = arith.constant 0 : index
    %c0_1 = arith.constant 0 : index
    %0 = vector.load %arg1[%c0, %c0_0, %c0_1] : memref<3x128x128xbf16, #tpu.memory_space<vmem>>, vector<3x128x128xbf16>
    %1 = arith.extf %0 : vector<3x128x128xbf16> to vector<3x128x128xf32>
    %c0_2 = arith.constant 0 : index
    %c0_3 = arith.constant 0 : index
    %2 = vector.load %arg2[%c0_2, %c0_3] : memref<1x128xf32, #tpu.memory_space<vmem>>, vector<1x128xf32>
    %3 = vector.shape_cast %2 : vector<1x128xf32> to vector<1x1x128xf32>
    %4 = vector.broadcast %3 : vector<1x1x128xf32> to vector<3x128x128xf32>
    %5 = arith.mulf %1, %4 : vector<3x128x128xf32>
    %6 = arith.mulf %5, %5 : vector<3x128x128xf32>
    %cst = arith.constant dense<0.000000e+00> : vector<128x128xf32>
    %7 = vector.multi_reduction <add>, %6, %cst [0] : vector<3x128x128xf32> to vector<128x128xf32>
    %cst_4 = arith.constant 1.000000e+00 : f32
    %8 = vector.broadcast %cst_4 : f32 to vector<128x128xf32>
    %9 = arith.minimumf %7, %8 : vector<128x128xf32>
    %10 = math.sqrt %9 : vector<128x128xf32>
    %11 = vector.shape_cast %10 : vector<128x128xf32> to vector<1x128x128xf32>
    %12 = vector.broadcast %11 : vector<1x128x128xf32> to vector<3x128x128xf32>
    %13 = arith.mulf %5, %12 : vector<3x128x128xf32>
    %14 = vector.shape_cast %13 : vector<3x128x128xf32> to vector<3x8x16x128xf32>
    %15 = vector.shape_cast %7 : vector<128x128xf32> to vector<8x16x128xf32>
    %cst_5 = arith.constant dense<0xFF800000> : vector<8x128xf32>
    %16 = vector.multi_reduction <maximumf>, %15, %cst_5 [1] : vector<8x16x128xf32> to vector<8x128xf32>
    %17 = vector.shape_cast %16 : vector<8x128xf32> to vector<8x1x128xf32>
    %18 = tpu.iota {dimensions = array<i32: 1>} : vector<8x16x128xi32>
    %19 = vector.broadcast %17 : vector<8x1x128xf32> to vector<8x16x128xf32>
    %20 = arith.cmpf oeq, %15, %19 : vector<8x16x128xf32>
    %c16_i32 = arith.constant 16 : i32
    %21 = vector.broadcast %c16_i32 : i32 to vector<8x16x128xi32>
    %22 = arith.select %20, %18, %21 : vector<8x16x128xi1>, vector<8x16x128xi32>
    %cst_6 = arith.constant dense<2147483647> : vector<8x128xi32>
    %23 = vector.multi_reduction <minsi>, %22, %cst_6 [1] : vector<8x16x128xi32> to vector<8x128xi32>
    %24 = vector.shape_cast %23 : vector<8x128xi32> to vector<8x1x128xi32>
    %25 = vector.broadcast %24 : vector<8x1x128xi32> to vector<8x16x128xi32>
    %26 = arith.cmpi eq, %18, %25 : vector<8x16x128xi32>
    %27 = arith.extui %26 : vector<8x16x128xi1> to vector<8x16x128xi32>
    %28 = arith.sitofp %27 : vector<8x16x128xi32> to vector<8x16x128xf32>
    %29 = vector.shape_cast %28 : vector<8x16x128xf32> to vector<1x8x16x128xf32>
    %30 = vector.broadcast %29 : vector<1x8x16x128xf32> to vector<3x8x16x128xf32>
    %31 = arith.mulf %14, %30 : vector<3x8x16x128xf32>
    %cst_7 = arith.constant dense<0.000000e+00> : vector<3x8x128xf32>
    %32 = vector.multi_reduction <add>, %31, %cst_7 [2] : vector<3x8x16x128xf32> to vector<3x8x128xf32>
    %c0_8 = arith.constant 0 : index
    %c0_9 = arith.constant 0 : index
    %c0_10 = arith.constant 0 : index
    %33 = vector.load %arg3[%c0_8, %c0_9, %c0_10] : memref<3x8x128xf32, #tpu.memory_space<vmem>>, vector<3x8x128xf32>
    tpu.vector_store %arg3[%c0_8, %c0_9, %c0_10], %32 {strides = array<i32>} : memref<3x8x128xf32, #tpu.memory_space<vmem>>, vector<3x8x128xf32>,
    return
  }
  func.func @transform_0(%arg0: i32) -> (i32, i32, i32) {
    %c0_i32 = arith.constant 0 : i32
    %c0_i32_0 = arith.constant 0 : i32
    %c0_i32_1 = arith.constant 0 : i32
    return %c0_i32, %arg0, %c0_i32_0 : i32, i32, i32
  }
  func.func @transform_1(%arg0: i32) -> (i32, i32) {
    %c0_i32 = arith.constant 0 : i32
    %c0_i32_0 = arith.constant 0 : i32
    %c0_i32_1 = arith.constant 0 : i32
    return %c0_i32, %c0_i32_0 : i32, i32
  }
  func.func @transform_2(%arg0: i32) -> (i32, i32, i32) {
    %c0_i32 = arith.constant 0 : i32
    %c0_i32_0 = arith.constant 0 : i32
    %c0_i32_1 = arith.constant 0 : i32
    return %c0_i32, %arg0, %c0_i32_0 : i32, i32, i32
  }
}

</mosaic_0001>

<bundles_post_ra>
// kernel: custom-call.6
= control target key start
LH: loop header
LB: loop body
LE: loop exit
PB: predicated region body
PF: predicated region fallthrough
CT: control target
= control target key end

     0   :  { %s6_s0 = inlined_call_operand.vmem [shape: f32[2,32], index: 0, kind: output, shape index: {}]  }

// kernel: _lambda_.3
= control target key start
LH: loop header
LB: loop body
LE: loop exit
PB: predicated region body
PF: predicated region fallthrough
CT: control target
= control target key end

     0   :  { %s1504_s12 = smov 0   ;;  %s1506_s13 = smov 0   ;;  %s1700_s0 = inlined_call_operand.vmem [shape: f32[3,8,256], index: 0, kind: input, shape index: {}]   ;;  %s1701_s1 = inlined_call_operand.vmem [shape: f32[8,128], index: 1, kind: input, shape index: {}]   ;;  %s1702_s2 = inlined_call_operand.vmem [shape: bf16[3,256,128], index: 2, kind: output, shape index: {0}]   ;;  %s1703_s3 = inlined_call_operand.vmem [shape: f32[2,1,128], index: 3, kind: output, shape index: {1}]  }
   0x1   :  { %s1508_s14 = smov 0  }
   0x2 LB: > { %s1520_s15 = sadd.s32 4294967295, %s1482_s14   ;;  %s1523_s16 = sadd.s32 1, %s1482_s14   ;;  %s1482_s14 = sphi %s1508_s14, %s1707_s14   ;;  %s1478_s13 = sphi %s1506_s13, %s1706_s13   ;;  %s1474_s12 = sphi %s1504_s12, %s1705_s12  }
   0x3   : > { %s18_s17 = ssub.s32 %s1482_s14, %s1523_s16  ;;  %s21_s18 = sadd.s32 1, %s1478_s13 }
   0x4   : > { %p19_p0 = scmp.eq.s32.totalorder %s18_s17, 0  ;;  %p28_p1 = scmp.ne.s32.totalorder %s1478_s13, %s1474_s12 }
   0x5   : > { %p29_p2 = scmp.eq.s32.totalorder %s1482_s14, 0  ;;  %p79_p3 = scmp.eq.s32.totalorder %s1520_s15, 1 }
   0x6   : > { %s1533_s19 = scalar_select %p19_p0, %s1478_s13, %s21_s18  }
   0x7   : > { %p30_p4 = por %p29_p2, %p28_p1  ;;  %p1535_p5 = por %p79_p3, %p28_p1 }
   0x8   : > { %p1196_p6 = scmp.ge.s32.totalorder %s1482_s14, 2 }
   0xa   : > { %130 = sbr.rel (%p1196_p6) target bundleno = 22 (0x16), region = 20 }
   0xf   : > { %133 = sbr.rel (!%p30_p4) target bundleno = 22 (0x16), region = 24  ;;  %s135_s21 = sand.u32 (%p30_p4), 1, %s1478_s13  }
  0x10   : > { %s1197_s22 = sshll.u32 (%p30_p4), %s1482_s14, 3  ;;  %s1432_s23 = smul.u32 (%p30_p4), 24, %s135_s21 }
  0x11   : > { %s139_s26 = scalar_lea.vmem (%p30_p4), %s1700_s0, %s1197_s22 }
  0x12   : > { %v172_v0 = vld [vmem:[%s139_s26] sm:$0xff] (%p30_p4)  ;;  %v174_v1 = vld [vmem:[%s139_s26 + $0x10] sm:$0xff] (%p30_p4)  ;;  %s137_s27 = scalar_lea.vmem (%p30_p4), [#allocation2], %s1432_s23 }
  0x13   : > { %v176_v2 = vld [vmem:[%s139_s26 + $0x20] sm:$0xff] (%p30_p4)  ;;  %173 = vst [vmem:[%s137_s27] sm:$0xff] (%p30_p4), %v172_v0 }
  0x14   : > { %175 = vst [vmem:[%s137_s27 + $0x8] sm:$0xff] %v174_v1 }
  0x15   : > { %177 = vst [vmem:[%s137_s27 + $0x10] sm:$0xff] %v176_v2 }
  0x16 PF: > { %p1198_p7 = scmp.ge.s32.totalorder %s1482_s14, 1  ;;  %p182_p8 = scmp.lt.s32.totalorder %s1482_s14, 3 }
  0x18   : > { %p183_p9 = pnand %p1198_p7, %p182_p8 }
  0x19   : > { %s189_s28 = sand.u32 (!%p183_p9), 1, %s1474_s12   ;;  %p215_p10 = scmp.lt.s32.totalorder (!%p183_p9), %s1520_s15, 1 }
  0x1a   : > { %186 = sbr.rel (%p183_p9) target bundleno = 596 (0x254), region = 62 }
  0x1b   : > { %s1433_s29 = smul.u32 (!%p183_p9), 24, %s189_s28 }
  0x1c   : > { %s1434_s6 = smul.u32 (!%p183_p9), 192, %s189_s28 }
  0x1d   : > { %s191_s30 = scalar_lea.vmem (!%p183_p9), [#allocation2], %s1433_s29 }
  0x1e   : > { %s1585_s7 = scalar_lea.vmem (!%p183_p9), [#allocation3], %s1434_s6 }
  0x1f   : > { %v219_v3 = vld [vmem:[%s191_s30] sm:$0xff]  ;;  %v1215_v4 = vld [vmem:[%s191_s30 + $0x8] sm:$0xff]  ;;  %v1248_v6 = vld [vmem:[%s191_s30 + $0x10] sm:$0xff]  ;;  %vm252_vm0 = vcmask 64512   ;;  %s216_s8 = scalar_select %p215_p10, %s1520_s15, 1 }
  0x20   : > { %220 = vxpose.xlu0.b32.start.end [1/1] (short) %v219_v3, 128  ;;  %438 = vxpose.xlu1.b32.start.end [1/1] (short) %v1215_v4, 128  ;;  %v218_v5 = vld [vmem:[%s1701_s1] sm:$0xff]  ;;  %s1285_s12 = sshll.u32 (%p1535_p5), %s1520_s15, 6 }
  0x21   : > { %316 = vmatpush.msra.mxu0 %v218_v5  ;;  %533 = vmatpush.msra.mxu1 %v218_v5  ;;  %s217_s11 = scalar_lea.vmem %s1703_s3, %s216_s8  ;;  %s1642_s18 = scalar_lea.vmem (%p1535_p5), %s1702_s2, %s1285_s12 }
  0x22   : > { %1429 = vmatpush.msra.mxu3 %v218_v5  ;;  %751 = vmatpush.msra.mxu2 %v218_v5 }
  0x24   : > { %1430 = vmatpush.msrb.mxu3 %v218_v5 }
  0xa0   : > { %656 = vxpose.xlu0.b32.start.end [1/1] (short) %v1248_v6, 128 }
  0xc4   : > { %v236_v7 = vpop.trf.xlu0  ;;  %v454_v8 = vpop.trf.xlu1 }
  0xc5   : > { %1199 = vmatmul.msk.f32.vlgmr.msra.gmra.mxu0 %vm252_vm0, %v236_v7  ;;  %1216 = vmatmul.msk.f32.vlgmr.msra.gmra.mxu1 %vm252_vm0, %v454_v8 }
  0xcc   : > { %v237_v9 = vpop.trf.xlu0  ;;  %v455_v10 = vpop.trf.xlu1 }
  0xcd   : > { %1200 = vmatmul.msk.f32.gmra.mxu0 %vm252_vm0, %v237_v9  ;;  %1217 = vmatmul.msk.f32.gmra.mxu1 %vm252_vm0, %v455_v10 }
  0xd4   : > { %v238_v11 = vpop.trf.xlu0  ;;  %v456_v12 = vpop.trf.xlu1 }
  0xd5   : > { %1201 = vmatmul.msk.f32.gmra.mxu0 %vm252_vm0, %v238_v11  ;;  %1218 = vmatmul.msk.f32.gmra.mxu1 %vm252_vm0, %v456_v12 }
  0xdc   : > { %v239_v13 = vpop.trf.xlu0  ;;  %v457_v14 = vpop.trf.xlu1 }
  0xdd   : > { %1202 = vmatmul.msk.f32.gmra.mxu0 %vm252_vm0, %v239_v13  ;;  %1219 = vmatmul.msk.f32.gmra.mxu1 %vm252_vm0, %v457_v14 }
  0xe4   : > { %v240_v15 = vpop.trf.xlu0  ;;  %v458_v16 = vpop.trf.xlu1 }
  0xe5   : > { %1203 = vmatmul.msk.f32.gmra.mxu0 %vm252_vm0, %v240_v15  ;;  %1220 = vmatmul.msk.f32.gmra.mxu1 %vm252_vm0, %v458_v16 }
  0xec   : > { %v241_v17 = vpop.trf.xlu0  ;;  %v459_v18 = vpop.trf.xlu1 }
  0xed   : > { %1204 = vmatmul.msk.f32.gmra.mxu0 %vm252_vm0, %v241_v17  ;;  %1221 = vmatmul.msk.f32.gmra.mxu1 %vm252_vm0, %v459_v18 }
  0xf4   : > { %v242_v19 = vpop.trf.xlu0  ;;  %v460_v20 = vpop.trf.xlu1 }
  0xf5   : > { %1205 = vmatmul.msk.f32.gmra.mxu0 %vm252_vm0, %v242_v19  ;;  %1222 = vmatmul.msk.f32.gmra.mxu1 %vm252_vm0, %v460_v20 }
  0xfc   : > { %v243_v21 = vpop.trf.xlu0  ;;  %v461_v22 = vpop.trf.xlu1 }
  0xfd   : > { %1206 = vmatmul.msk.f32.gmra.mxu0 %vm252_vm0, %v243_v21  ;;  %1223 = vmatmul.msk.f32.gmra.mxu1 %vm252_vm0, %v461_v22 }
 0x104   : > { %v244_v23 = vpop.trf.xlu0  ;;  %v462_v24 = vpop.trf.xlu1 }
 0x105   : > { %1207 = vmatmul.msk.f32.gmra.mxu0 %vm252_vm0, %v244_v23  ;;  %1224 = vmatmul.msk.f32.gmra.mxu1 %vm252_vm0, %v462_v24 }
 0x10c   : > { %v245_v25 = vpop.trf.xlu0  ;;  %v463_v26 = vpop.trf.xlu1 }
 0x10d   : > { %1208 = vmatmul.msk.f32.gmra.mxu0 %vm252_vm0, %v245_v25  ;;  %1225 = vmatmul.msk.f32.gmra.mxu1 %vm252_vm0, %v463_v26 }
 0x114   : > { %v246_v27 = vpop.trf.xlu0  ;;  %v464_v28 = vpop.trf.xlu1 }
 0x115   : > { %1209 = vmatmul.msk.f32.gmra.mxu0 %vm252_vm0, %v246_v27  ;;  %1226 = vmatmul.msk.f32.gmra.mxu1 %vm252_vm0, %v464_v28 }
 0x11c   : > { %v247_v29 = vpop.trf.xlu0  ;;  %v465_v30 = vpop.trf.xlu1 }
 0x11d   : > { %1210 = vmatmul.msk.f32.gmra.mxu0 %vm252_vm0, %v247_v29  ;;  %1227 = vmatmul.msk.f32.gmra.mxu1 %vm252_vm0, %v465_v30 }
 0x124   : > { %v248_v31 = vpop.trf.xlu0  ;;  %v466_v34 = vpop.trf.xlu1 }
 0x125   : > { %1211 = vmatmul.msk.f32.vlgmr.msra.gmra.mxu3 %vm252_vm0, %v248_v31 }
 0x126   : > { %1431 = vmatpush.msra.mxu3 %v218_v5 }
 0x12c   : > { %v249_v32 = vpop.trf.xlu0  ;;  %v467_v39 = vpop.trf.xlu1 }
 0x12d   : > { %1212 = vmatmul.msk.f32.gmra.mxu3 %vm252_vm0, %v249_v32 }
 0x134   : > { %v250_v33 = vpop.trf.xlu0  ;;  %v468_v51 = vpop.trf.xlu1 }
 0x135   : > { %1213 = vmatmul.msk.f32.gmra.mxu3 %vm252_vm0, %v250_v33 }
 0x13c   : > { %v251_v35 = vpop.trf.xlu0  ;;  %v469_v59 = vpop.trf.xlu1 }
 0x13d   : > { %1214 = vmatmul.msk.f32.gmra.mxu3 %vm252_vm0, %v251_v35 }
 0x142   : > { %v318_v36 = vpop.f32.mrf.mxu0  ;;  %v535_v37 = vpop.f32.mrf.mxu1 }
 0x143   : > { %v616_v40 = vmul.f32 %v535_v37, %v535_v37  ;;  %v398_v41 = vmul.f32 %v318_v36, %v318_v36 }
 0x144   : > { %v672_v38 = vpop.trf.xlu0 }
 0x145   : > { %1228 = vmatmul.msk.f32.vlgmr.msrb.gmra.mxu3 %vm252_vm0, %v466_v34  ;;  %1249 = vmatmul.msk.f32.vlgmr.msra.gmra.mxu2 %vm252_vm0, %v672_v38 }
 0x14a   : > { %v321_v42 = vpop.f32.mrf.mxu0  ;;  %v538_v43 = vpop.f32.mrf.mxu1 }
 0x14b   : > { %v1289_v44 = vpack.c.bf16 %v321_v42, %v318_v36  ;;  %v399_v45 = vmul.f32 %v321_v42, %v321_v42  ;;  %v1329_v46 = vpack.c.bf16 %v538_v43, %v535_v37  ;;  %v617_v47 = vmul.f32 %v538_v43, %v538_v43 }
 0x14c   : > { %v673_v48 = vpop.trf.xlu0 }
 0x14d   : > { %1290 = vst [vmem:[%s1585_s7] sm:$0xff] %v1289_v44   ;;  %v414_v49 = vadd.f32 %v399_v45, %v398_v41  ;;  %1229 = vmatmul.msk.f32.gmra.mxu3 %vm252_vm0, %v467_v39  ;;  %1250 = vmatmul.msk.f32.gmra.mxu2 %vm252_vm0, %v673_v48  ;;  %v632_v50 = vadd.f32 %v617_v47, %v616_v40 }
 0x14e   : > { %1413 = vst [vmem:[%s1585_s7 + $0x40] sm:$0xff] %v1329_v46  }
 0x152   : > { %v324_v52 = vpop.f32.mrf.mxu0  ;;  %v541_v53 = vpop.f32.mrf.mxu1 }
 0x153   : > { %v400_v54 = vmul.f32 %v324_v52, %v324_v52  ;;  %v618_v55 = vmul.f32 %v541_v53, %v541_v53 }
 0x154   : > { %v674_v56 = vpop.trf.xlu0 }
 0x155   : > { %v415_v57 = vadd.f32 %v414_v49, %v400_v54  ;;  %1230 = vmatmul.msk.f32.gmra.mxu3 %vm252_vm0, %v468_v51  ;;  %1251 = vmatmul.msk.f32.gmra.mxu2 %vm252_vm0, %v674_v56  ;;  %v633_v58 = vadd.f32 %v632_v50, %v618_v55 }
 0x15a   : > { %v327_v60 = vpop.f32.mrf.mxu0  ;;  %v544_v61 = vpop.f32.mrf.mxu1 }
 0x15b   : > { %v1294_v62 = vpack.c.bf16 %v327_v60, %v324_v52  ;;  %v401_v63 = vmul.f32 %v327_v60, %v327_v60  ;;  %v1334_v0 = vpack.c.bf16 %v544_v61, %v541_v53  ;;  %v619_v1 = vmul.f32 %v544_v61, %v544_v61 }
 0x15c   : > { %v675_v2 = vpop.trf.xlu0 }
 0x15d   : > { %1406 = vst [vmem:[%s1585_s7 + $0x8] sm:$0xff] %v1294_v62   ;;  %v416_v3 = vadd.f32 %v415_v57, %v401_v63  ;;  %1231 = vmatmul.msk.f32.gmra.mxu3 %vm252_vm0, %v469_v59  ;;  %1252 = vmatmul.msk.f32.gmra.mxu2 %vm252_vm0, %v675_v2  ;;  %v634_v4 = vadd.f32 %v633_v58, %v619_v1 }
 0x15e   : > { %1414 = vst [vmem:[%s1585_s7 + $0x48] sm:$0xff] %v1334_v0  }
 0x162   : > { %v330_v5 = vpop.f32.mrf.mxu0  ;;  %v547_v6 = vpop.f32.mrf.mxu1 }
 0x163   : > { %v402_v7 = vmul.f32 %v330_v5, %v330_v5  ;;  %v620_v8 = vmul.f32 %v547_v6, %v547_v6 }
 0x164   : > { %v676_v9 = vpop.trf.xlu0 }
 0x165   : > { %v417_v10 = vadd.f32 %v416_v3, %v402_v7  ;;  %1253 = vmatmul.msk.f32.gmra.mxu2 %vm252_vm0, %v676_v9  ;;  %v635_v11 = vadd.f32 %v634_v4, %v620_v8 }
 0x16a   : > { %v333_v12 = vpop.f32.mrf.mxu0  ;;  %v550_v13 = vpop.f32.mrf.mxu1 }
 0x16b   : > { %v1299_v14 = vpack.c.bf16 %v333_v12, %v330_v5  ;;  %v403_v15 = vmul.f32 %v333_v12, %v333_v12  ;;  %v1339_v16 = vpack.c.bf16 %v550_v13, %v547_v6  ;;  %v621_v17 = vmul.f32 %v550_v13, %v550_v13 }
 0x16c   : > { %v677_v18 = vpop.trf.xlu0 }
 0x16d   : > { %1407 = vst [vmem:[%s1585_s7 + $0x10] sm:$0xff] %v1299_v14   ;;  %v418_v19 = vadd.f32 %v417_v10, %v403_v15  ;;  %1254 = vmatmul.msk.f32.gmra.mxu2 %vm252_vm0, %v677_v18  ;;  %v636_v20 = vadd.f32 %v635_v11, %v621_v17 }
 0x16e   : > { %1415 = vst [vmem:[%s1585_s7 + $0x50] sm:$0xff] %v1339_v16  }
 0x172   : > { %v336_v21 = vpop.f32.mrf.mxu0  ;;  %v553_v22 = vpop.f32.mrf.mxu1 }
 0x173   : > { %v404_v23 = vmul.f32 %v336_v21, %v336_v21  ;;  %v622_v24 = vmul.f32 %v553_v22, %v553_v22 }
 0x174   : > { %v678_v25 = vpop.trf.xlu0 }
 0x175   : > { %v419_v26 = vadd.f32 %v418_v19, %v404_v23  ;;  %1255 = vmatmul.msk.f32.gmra.mxu2 %vm252_vm0, %v678_v25  ;;  %v637_v27 = vadd.f32 %v636_v20, %v622_v24 }
 0x17a   : > { %v339_v28 = vpop.f32.mrf.mxu0  ;;  %v556_v29 = vpop.f32.mrf.mxu1 }
 0x17b   : > { %v1304_v30 = vpack.c.bf16 %v339_v28, %v336_v21  ;;  %v405_v31 = vmul.f32 %v339_v28, %v339_v28  ;;  %v1344_v32 = vpack.c.bf16 %v556_v29, %v553_v22  ;;  %v623_v33 = vmul.f32 %v556_v29, %v556_v29 }
 0x17c   : > { %v679_v34 = vpop.trf.xlu0 }
 0x17d   : > { %1408 = vst [vmem:[%s1585_s7 + $0x18] sm:$0xff] %v1304_v30   ;;  %v420_v35 = vadd.f32 %v419_v26, %v405_v31  ;;  %1256 = vmatmul.msk.f32.gmra.mxu2 %vm252_vm0, %v679_v34  ;;  %v638_v36 = vadd.f32 %v637_v27, %v623_v33 }
 0x17e   : > { %1416 = vst [vmem:[%s1585_s7 + $0x58] sm:$0xff] %v1344_v32  }
 0x182   : > { %v342_v37 = vpop.f32.mrf.mxu0  ;;  %v559_v38 = vpop.f32.mrf.mxu1 }
 0x183   : > { %v406_v39 = vmul.f32 %v342_v37, %v342_v37  ;;  %v624_v40 = vmul.f32 %v559_v38, %v559_v38 }
 0x184   : > { %v680_v41 = vpop.trf.xlu0 }
 0x185   : > { %v421_v42 = vadd.f32 %v420_v35, %v406_v39  ;;  %1257 = vmatmul.msk.f32.gmra.mxu2 %vm252_vm0, %v680_v41  ;;  %v639_v43 = vadd.f32 %v638_v36, %v624_v40 }
 0x18a   : > { %v345_v44 = vpop.f32.mrf.mxu0  ;;  %v562_v45 = vpop.f32.mrf.mxu1 }
 0x18b   : > { %v1309_v46 = vpack.c.bf16 %v345_v44, %v342_v37  ;;  %v407_v47 = vmul.f32 %v345_v44, %v345_v44  ;;  %v1349_v48 = vpack.c.bf16 %v562_v45, %v559_v38  ;;  %v625_v49 = vmul.f32 %v562_v45, %v562_v45 }
 0x18c   : > { %v681_v50 = vpop.trf.xlu0 }
 0x18d   : > { %1409 = vst [vmem:[%s1585_s7 + $0x20] sm:$0xff] %v1309_v46   ;;  %v422_v51 = vadd.f32 %v421_v42, %v407_v47  ;;  %1258 = vmatmul.msk.f32.gmra.mxu2 %vm252_vm0, %v681_v50  ;;  %v640_v52 = vadd.f32 %v639_v43, %v625_v49 }
 0x18e   : > { %1417 = vst [vmem:[%s1585_s7 + $0x60] sm:$0xff] %v1349_v48  }
 0x192   : > { %v348_v53 = vpop.f32.mrf.mxu0  ;;  %v565_v54 = vpop.f32.mrf.mxu1 }
 0x193   : > { %v408_v55 = vmul.f32 %v348_v53, %v348_v53  ;;  %v626_v56 = vmul.f32 %v565_v54, %v565_v54 }
 0x194   : > { %v682_v57 = vpop.trf.xlu0 }
 0x195   : > { %v423_v58 = vadd.f32 %v422_v51, %v408_v55  ;;  %1259 = vmatmul.msk.f32.gmra.mxu2 %vm252_vm0, %v682_v57  ;;  %v641_v59 = vadd.f32 %v640_v52, %v626_v56 }
 0x19a   : > { %v351_v60 = vpop.f32.mrf.mxu0  ;;  %v568_v61 = vpop.f32.mrf.mxu1 }
 0x19b   : > { %v1314_v62 = vpack.c.bf16 %v351_v60, %v348_v53  ;;  %v409_v63 = vmul.f32 %v351_v60, %v351_v60  ;;  %v1354_v0 = vpack.c.bf16 %v568_v61, %v565_v54  ;;  %v627_v1 = vmul.f32 %v568_v61, %v568_v61 }
 0x19c   : > { %v683_v2 = vpop.trf.xlu0 }
 0x19d   : > { %1410 = vst [vmem:[%s1585_s7 + $0x28] sm:$0xff] %v1314_v62   ;;  %v424_v3 = vadd.f32 %v423_v58, %v409_v63  ;;  %1260 = vmatmul.msk.f32.gmra.mxu2 %vm252_vm0, %v683_v2  ;;  %v642_v4 = vadd.f32 %v641_v59, %v627_v1 }
 0x19e   : > { %1418 = vst [vmem:[%s1585_s7 + $0x68] sm:$0xff] %v1354_v0  }
 0x1a4   : > { %v684_v5 = vpop.trf.xlu0 }
 0x1a5   : > { %1261 = vmatmul.msk.f32.vlgmr.msra.gmra.mxu3 %vm252_vm0, %v684_v5 }
 0x1a8   : > { %v354_v6 = vpop.f32.mrf.mxu3 }
 0x1a9   : > { %v410_v7 = vmul.f32 %v354_v6, %v354_v6 }
 0x1ab   : > { %v425_v8 = vadd.f32 %v424_v3, %v410_v7 }
 0x1ac   : > { %v685_v9 = vpop.trf.xlu0 }
 0x1ad   : > { %1262 = vmatmul.msk.f32.gmra.mxu3 %vm252_vm0, %v685_v9 }
 0x1b0   : > { %v357_v10 = vpop.f32.mrf.mxu3 }
 0x1b1   : > { %v1319_v11 = vpack.c.bf16 %v357_v10, %v354_v6  ;;  %v411_v12 = vmul.f32 %v357_v10, %v357_v10 }
 0x1b3   : > { %1411 = vst [vmem:[%s1585_s7 + $0x30] sm:$0xff] %v1319_v11   ;;  %v426_v13 = vadd.f32 %v425_v8, %v411_v12 }
 0x1b4   : > { %v686_v14 = vpop.trf.xlu0 }
 0x1b5   : > { %1263 = vmatmul.msk.f32.gmra.mxu3 %vm252_vm0, %v686_v14 }
 0x1b8   : > { %v360_v15 = vpop.f32.mrf.mxu3 }
 0x1b9   : > { %v412_v16 = vmul.f32 %v360_v15, %v360_v15 }
 0x1bb   : > { %v427_v17 = vadd.f32 %v426_v13, %v412_v16 }
 0x1bc   : > { %v687_v18 = vpop.trf.xlu0 }
 0x1bd   : > { %1264 = vmatmul.msk.f32.gmra.mxu3 %vm252_vm0, %v687_v18 }
 0x1c0   : > { %v363_v19 = vpop.f32.mrf.mxu3 }
 0x1c1   : > { %v1324_v20 = vpack.c.bf16 %v363_v19, %v360_v15  ;;  %v413_v21 = vmul.f32 %v363_v19, %v363_v19 }
 0x1c3   : > { %1412 = vst [vmem:[%s1585_s7 + $0x38] sm:$0xff] %v1324_v20   ;;  %v428_v22 = vadd.f32 %v427_v17, %v413_v21 }
 0x1c5   : > { %v429_v40 = vrot.slane %v428_v22, 4 }
 0x1c7   : > { %v430_v43 = vadd.f32 %v429_v40, %v428_v22 }
 0x1c8   : > { %v571_v23 = vpop.f32.mrf.mxu3  ;;  %v753_v24 = vpop.f32.mrf.mxu2 }
 0x1c9   : > { %v628_v25 = vmul.f32 %v571_v23, %v571_v23  ;;  %v834_v27 = vmul.f32 %v753_v24, %v753_v24  ;;  %v431_v50 = vrot.slane %v430_v43, 2 }
 0x1cb   : > { %v643_v26 = vadd.f32 %v642_v4, %v628_v25  ;;  %v432_v54 = vadd.f32 %v431_v50, %v430_v43  ;;  %v910_v50 = vld [vmem:[%s1585_s7 + $0x10] sm:$0xff] (%p1535_p5)  }
 0x1cc   : > { %911 = vst [vmem:[%s1642_s18 + $0x10] sm:$0xff] (%p1535_p5), %v910_v50  }
 0x1cd   : > { %v433_v59 = vrot.slane %v432_v54, 1 }
 0x1cf   : > { %v434_v63 = vadd.f32 %v433_v59, %v432_v54  ;;  %v926_v54 = vld [vmem:[%s1585_s7 + $0x30] sm:$0xff] (%p1535_p5)   ;;  %v946_v59 = vld [vmem:[%s1585_s7 + $0x58] sm:$0xff] (%p1535_p5)  }
 0x1d0   : > { %v574_v28 = vpop.f32.mrf.mxu3  ;;  %v756_v29 = vpop.f32.mrf.mxu2  ;;  %927 = vst [vmem:[%s1642_s18 + $0x30] sm:$0xff] (%p1535_p5), %v926_v54  }
 0x1d1   : > { %v1359_v30 = vpack.c.bf16 %v574_v28, %v571_v23  ;;  %v629_v31 = vmul.f32 %v574_v28, %v574_v28  ;;  %v1369_v32 = vpack.c.bf16 %v756_v29, %v753_v24  ;;  %v835_v33 = vmul.f32 %v756_v29, %v756_v29  ;;  %947 = vst [vmem:[%s1642_s18 + $0x98] sm:$0xff] (%p1535_p5), %v946_v59  }
 0x1d3   : > { %1419 = vst [vmem:[%s1585_s7 + $0x70] sm:$0xff] %v1359_v30   ;;  %v644_v34 = vadd.f32 %v643_v26, %v629_v31  ;;  %v850_v35 = vadd.f32 %v835_v33, %v834_v27 }
 0x1d4   : > { %1421 = vst [vmem:[%s1585_s7 + $0x80] sm:$0xff] %v1369_v32  }
 0x1d8   : > { %v577_v36 = vpop.f32.mrf.mxu3  ;;  %v759_v37 = vpop.f32.mrf.mxu2 }
 0x1d9   : > { %v630_v38 = vmul.f32 %v577_v36, %v577_v36  ;;  %v836_v39 = vmul.f32 %v759_v37, %v759_v37 }
 0x1db   : > { %v645_v41 = vadd.f32 %v644_v34, %v630_v38  ;;  %v851_v42 = vadd.f32 %v850_v35, %v836_v39 }
 0x1e0   : > { %v580_v44 = vpop.f32.mrf.mxu3  ;;  %v762_v45 = vpop.f32.mrf.mxu2 }
 0x1e1   : > { %v1364_v46 = vpack.c.bf16 %v580_v44, %v577_v36  ;;  %v631_v47 = vmul.f32 %v580_v44, %v580_v44  ;;  %v1374_v48 = vpack.c.bf16 %v762_v45, %v759_v37  ;;  %v837_v49 = vmul.f32 %v762_v45, %v762_v45 }
 0x1e3   : > { %1420 = vst [vmem:[%s1585_s7 + $0x78] sm:$0xff] %v1364_v46   ;;  %v646_v51 = vadd.f32 %v645_v41, %v631_v47  ;;  %v852_v52 = vadd.f32 %v851_v42, %v837_v49  ;;  %v906_v49 = vld [vmem:[%s1585_s7 + $0x8] sm:$0xff] (%p1535_p5)  }
 0x1e4   : > { %1422 = vst [vmem:[%s1585_s7 + $0x88] sm:$0xff] %v1374_v48   ;;  %v902_v48 = vld [vmem:[%s1585_s7] sm:$0xff] (%p1535_p5)  }
 0x1e5   : > { %v647_v53 = vrot.slane %v646_v51, 4  ;;  %903 = vst [vmem:[%s1642_s18] sm:$0xff] (%p1535_p5), %v902_v48  }
 0x1e6   : > { %907 = vst [vmem:[%s1642_s18 + $0x8] sm:$0xff] (%p1535_p5), %v906_v49  }
 0x1e7   : > { %v648_v55 = vadd.f32 %v647_v53, %v646_v51  ;;  %v914_v51 = vld [vmem:[%s1585_s7 + $0x18] sm:$0xff] (%p1535_p5)   ;;  %v922_v53 = vld [vmem:[%s1585_s7 + $0x28] sm:$0xff] (%p1535_p5)  }
 0x1e8   : > { %v765_v56 = vpop.f32.mrf.mxu2  ;;  %915 = vst [vmem:[%s1642_s18 + $0x18] sm:$0xff] (%p1535_p5), %v914_v51  }
 0x1e9   : > { %v649_v57 = vrot.slane %v648_v55, 2  ;;  %v838_v58 = vmul.f32 %v765_v56, %v765_v56  ;;  %923 = vst [vmem:[%s1642_s18 + $0x28] sm:$0xff] (%p1535_p5), %v922_v53  }
 0x1eb   : > { %v650_v60 = vadd.f32 %v649_v57, %v648_v55  ;;  %v853_v61 = vadd.f32 %v852_v52, %v838_v58  ;;  %v918_v52 = vld [vmem:[%s1585_s7 + $0x20] sm:$0xff] (%p1535_p5)   ;;  %v930_v55 = vld [vmem:[%s1585_s7 + $0x38] sm:$0xff] (%p1535_p5)   ;;  %v938_v57 = vld [vmem:[%s1585_s7 + $0x48] sm:$0xff] (%p1535_p5)  }
 0x1ec   : > { %919 = vst [vmem:[%s1642_s18 + $0x20] sm:$0xff] (%p1535_p5), %v918_v52   ;;  %v942_v58 = vld [vmem:[%s1585_s7 + $0x50] sm:$0xff] (%p1535_p5)  }
 0x1ed   : > { %v651_v62 = vrot.slane %v650_v60, 1  ;;  %931 = vst [vmem:[%s1642_s18 + $0x38] sm:$0xff] (%p1535_p5), %v930_v55  }
 0x1ee   : > { %939 = vst [vmem:[%s1642_s18 + $0x88] sm:$0xff] (%p1535_p5), %v938_v57  }
 0x1ef   : > { %v652_v0 = vadd.f32 %v651_v62, %v650_v60  ;;  %v950_v60 = vld [vmem:[%s1585_s7 + $0x60] sm:$0xff] (%p1535_p5)   ;;  %943 = vst [vmem:[%s1642_s18 + $0x90] sm:$0xff] (%p1535_p5), %v942_v58   ;;  %v958_v62 = vld [vmem:[%s1585_s7 + $0x70] sm:$0xff] (%p1535_p5)  }
 0x1f0   : > { %v768_v1 = vpop.f32.mrf.mxu2  ;;  %951 = vst [vmem:[%s1642_s18 + $0xa0] sm:$0xff] (%p1535_p5), %v950_v60  }
 0x1f1   : > { %v653_v2 = vadd.f32 %v652_v0, %v434_v63  ;;  %v1379_v3 = vpack.c.bf16 %v768_v1, %v765_v56  ;;  %v839_v14 = vmul.f32 %v768_v1, %v768_v1  ;;  %v934_v56 = vld [vmem:[%s1585_s7 + $0x40] sm:$0xff] (%p1535_p5)   ;;  %v962_v63 = vld [vmem:[%s1585_s7 + $0x78] sm:$0xff] (%p1535_p5)   ;;  %959 = vst [vmem:[%s1642_s18 + $0xb0] sm:$0xff] (%p1535_p5), %v958_v62   ;;  %v970_v1 = vld [vmem:[%s1585_s7 + $0x88] sm:$0xff] (%p1535_p5)  }
 0x1f2   : > { %935 = vst [vmem:[%s1642_s18 + $0x80] sm:$0xff] (%p1535_p5), %v934_v56   ;;  %v966_v0 = vld [vmem:[%s1585_s7 + $0x80] sm:$0xff] (%p1535_p5)  }
 0x1f3   : > { %1423 = vst [vmem:[%s1585_s7 + $0x90] sm:$0xff] %v1379_v3   ;;  %v854_v16 = vadd.f32 %v853_v61, %v839_v14  ;;  %v954_v61 = vld [vmem:[%s1585_s7 + $0x68] sm:$0xff] (%p1535_p5)  }
 0x1f4   : > { %955 = vst [vmem:[%s1642_s18 + $0xa8] sm:$0xff] (%p1535_p5), %v954_v61  }
 0x1f5   : > { %963 = vst [vmem:[%s1642_s18 + $0xb8] sm:$0xff] (%p1535_p5), %v962_v63  }
 0x1f6   : > { %967 = vst [vmem:[%s1642_s18 + $0x100] sm:$0xff] (%p1535_p5), %v966_v0  }
 0x1f7   : > { %971 = vst [vmem:[%s1642_s18 + $0x108] sm:$0xff] (%p1535_p5), %v970_v1  }
 0x1f8   : > { %v771_v4 = vpop.f32.mrf.mxu2 }
 0x1f9   : > { %v840_v15 = vmul.f32 %v771_v4, %v771_v4 }
 0x1fb   : > { %v855_v19 = vadd.f32 %v854_v16, %v840_v15 }
 0x200   : > { %v774_v5 = vpop.f32.mrf.mxu2 }
 0x201   : > { %v1384_v6 = vpack.c.bf16 %v774_v5, %v771_v4  ;;  %v841_v17 = vmul.f32 %v774_v5, %v774_v5 }
 0x203   : > { %1424 = vst [vmem:[%s1585_s7 + $0x98] sm:$0xff] %v1384_v6   ;;  %v856_v22 = vadd.f32 %v855_v19, %v841_v17 }
 0x208   : > { %v777_v7 = vpop.f32.mrf.mxu2 }
 0x209   : > { %v842_v20 = vmul.f32 %v777_v7, %v777_v7 }
 0x20a   : > { %v978_v3 = vld [vmem:[%s1585_s7 + $0x98] sm:$0xff] (%p1535_p5)  }
 0x20b   : > { %v857_v24 = vadd.f32 %v856_v22, %v842_v20  ;;  %979 = vst [vmem:[%s1642_s18 + $0x118] sm:$0xff] (%p1535_p5), %v978_v3  }
 0x210   : > { %v780_v8 = vpop.f32.mrf.mxu2 }
 0x211   : > { %v1389_v9 = vpack.c.bf16 %v780_v8, %v777_v7  ;;  %v843_v23 = vmul.f32 %v780_v8, %v780_v8 }
 0x213   : > { %1425 = vst [vmem:[%s1585_s7 + $0xa0] sm:$0xff] %v1389_v9   ;;  %v858_v26 = vadd.f32 %v857_v24, %v843_v23 }
 0x218   : > { %v783_v10 = vpop.f32.mrf.mxu2 }
 0x219   : > { %v844_v25 = vmul.f32 %v783_v10, %v783_v10 }
 0x21a   : > { %v982_v4 = vld [vmem:[%s1585_s7 + $0xa0] sm:$0xff] (%p1535_p5)  }
 0x21b   : > { %v859_v29 = vadd.f32 %v858_v26, %v844_v25  ;;  %983 = vst [vmem:[%s1642_s18 + $0x120] sm:$0xff] (%p1535_p5), %v982_v4  }
 0x220   : > { %v786_v11 = vpop.f32.mrf.mxu2 }
 0x221   : > { %v1394_v12 = vpack.c.bf16 %v786_v11, %v783_v10  ;;  %v845_v27 = vmul.f32 %v786_v11, %v786_v11 }
 0x223   : > { %1426 = vst [vmem:[%s1585_s7 + $0xa8] sm:$0xff] %v1394_v12   ;;  %v860_v31 = vadd.f32 %v859_v29, %v845_v27 }
 0x228   : > { %v789_v13 = vpop.f32.mrf.mxu3 }
 0x229   : > { %v846_v30 = vmul.f32 %v789_v13, %v789_v13 }
 0x22a   : > { %v986_v5 = vld [vmem:[%s1585_s7 + $0xa8] sm:$0xff] (%p1535_p5)  }
 0x22b   : > { %v861_v33 = vadd.f32 %v860_v31, %v846_v30  ;;  %987 = vst [vmem:[%s1642_s18 + $0x128] sm:$0xff] (%p1535_p5), %v986_v5  }
 0x230   : > { %v792_v18 = vpop.f32.mrf.mxu3 }
 0x231   : > { %v1399_v21 = vpack.c.bf16 %v792_v18, %v789_v13  ;;  %v847_v32 = vmul.f32 %v792_v18, %v792_v18 }
 0x233   : > { %1427 = vst [vmem:[%s1585_s7 + $0xb0] sm:$0xff] %v1399_v21   ;;  %v862_v35 = vadd.f32 %v861_v33, %v847_v32 }
 0x238   : > { %v795_v28 = vpop.f32.mrf.mxu3 }
 0x239   : > { %v848_v34 = vmul.f32 %v795_v28, %v795_v28 }
 0x23a   : > { %v990_v6 = vld [vmem:[%s1585_s7 + $0xb0] sm:$0xff] (%p1535_p5)  }
 0x23b   : > { %v863_v37 = vadd.f32 %v862_v35, %v848_v34  ;;  %991 = vst [vmem:[%s1642_s18 + $0x130] sm:$0xff] (%p1535_p5), %v990_v6  }
 0x240   : > { %v798_v36 = vpop.f32.mrf.mxu3 }
 0x241   : > { %v1404_v38 = vpack.c.bf16 %v798_v36, %v795_v28  ;;  %v849_v39 = vmul.f32 %v798_v36, %v798_v36 }
 0x243   : > { %1428 = vst [vmem:[%s1585_s7 + $0xb8] sm:$0xff] %v1404_v38   ;;  %v864_v40 = vadd.f32 %v863_v37, %v849_v39 }
 0x245   : > { %v865_v41 = vrot.slane %v864_v40, 4 }
 0x247   : > { %v866_v42 = vadd.f32 %v865_v41, %v864_v40 }
 0x249   : > { %v867_v43 = vrot.slane %v866_v42, 2 }
 0x24a   : > { %v994_v7 = vld [vmem:[%s1585_s7 + $0xb8] sm:$0xff] (%p1535_p5)  }
 0x24b   : > { %v868_v44 = vadd.f32 %v867_v43, %v866_v42  ;;  %995 = vst [vmem:[%s1642_s18 + $0x138] sm:$0xff] (%p1535_p5), %v994_v7  }
 0x24d   : > { %v869_v45 = vrot.slane %v868_v44, 1 }
 0x24f   : > { %v870_v46 = vadd.f32 %v869_v45, %v868_v44  ;;  %882 = sbr.rel (!%p1535_p5) target bundleno = 596 (0x254), region = 70 }
 0x251   : > { %v871_v47 = vadd.f32 %v870_v46, %v653_v2  ;;  %v974_v2 = vld [vmem:[%s1585_s7 + $0x90] sm:$0xff] (%p1535_p5)  }
 0x252   : > { %975 = vst [vmem:[%s1642_s18 + $0x110] sm:$0xff] (%p1535_p5), %v974_v2  }
 0x253   : > { %872 = vst [vmem:[%s217_s11] sm:$0x1] %v871_v47 }
 0x254 PF: > { %p11_p11 = scmp.ge.s32.totalorder %s1523_s16, 4   ;;  %s1705_s12 = smov %s1478_s13 }
 0x255   : > { %s1706_s13 = smov %s1533_s19  ;;  %s1707_s14 = smov %s1523_s16 }
 0x256   :  { %13 = sbr.rel (!%p11_p11) target bundleno = 2 (0x2), region = 158 }

// kernel: _lambda_.4
= control target key start
LH: loop header
LB: loop body
LE: loop exit
PB: predicated region body
PF: predicated region fallthrough
CT: control target
= control target key end

     0   :  { %s2269_s15 = smov 0   ;;  %s2271_s16 = smov 0   ;;  %s3220_s0 = inlined_call_operand.vmem [shape: bf16[3,256,128], index: 0, kind: input, shape index: {}]   ;;  %s3221_s1 = inlined_call_operand.vmem [shape: f32[1,128], index: 1, kind: input, shape index: {}]   ;;  %s3222_s2 = inlined_call_operand.vmem [shape: bf16[128,128], index: 2, kind: input, shape index: {}]   ;;  %s3223_s3 = inlined_call_operand.vmem [shape: bf16[3,256,128], index: 3, kind: output, shape index: {0}]   ;;  %s3224_s4 = inlined_call_operand.vmem [shape: f32[2,1,128], index: 4, kind: output, shape index: {1}]  }
   0x1   :  { %s2273_s17 = smov 0  }
   0x2 LB: > { %s2285_s18 = sadd.s32 4294967295, %s2242_s17   ;;  %s2288_s19 = sadd.s32 1, %s2242_s17   ;;  %s2242_s17 = sphi %s2273_s17, %s3264_s17   ;;  %s2238_s16 = sphi %s2271_s16, %s3263_s16   ;;  %s2234_s15 = sphi %s2269_s15, %s3262_s15  }
   0x3   : > { %s19_s20 = ssub.s32 %s2242_s17, %s2288_s19  ;;  %s22_s21 = sadd.s32 1, %s2238_s16 }
   0x4   : > { %p20_p0 = scmp.eq.s32.totalorder %s19_s20, 0  ;;  %p29_p1 = scmp.ne.s32.totalorder %s2238_s16, %s2234_s15 }
   0x5   : > { %p30_p2 = scmp.eq.s32.totalorder %s2242_s17, 0  ;;  %p101_p3 = scmp.eq.s32.totalorder %s2285_s18, 1 }
   0x6   : > { %s2298_s22 = scalar_select %p20_p0, %s2238_s16, %s22_s21  }
   0x7   : > { %p31_p4 = por %p30_p2, %p29_p1  ;;  %p2300_p5 = por %p101_p3, %p29_p1 }
   0x8   : > { %p1825_p6 = scmp.ge.s32.totalorder %s2242_s17, 2 }
   0xa   : > { %155 = sbr.rel (%p1825_p6) target bundleno = 43 (0x2b), region = 24 }
   0xf   : > { %158 = sbr.rel (!%p31_p4) target bundleno = 43 (0x2b), region = 28  ;;  %s160_s24 = sand.u32 (%p31_p4), 1, %s2238_s16  }
  0x10   : > { %s1865_s25 = sshll.u32 (%p31_p4), %s2242_s17, 6  ;;  %s2161_s26 = smul.u32 (%p31_p4), 192, %s160_s24 }
  0x11   : > { %s2310_s29 = scalar_lea.vmem (%p31_p4), %s3220_s0, %s1865_s25 }
  0x12   : > { %v182_v0 = vld [vmem:[%s2310_s29] sm:$0xff] (%p31_p4)   ;;  %v186_v1 = vld [vmem:[%s2310_s29 + $0x8] sm:$0xff] (%p31_p4)   ;;  %v190_v2 = vld [vmem:[%s2310_s29 + $0x10] sm:$0xff] (%p31_p4)   ;;  %s2315_s30 = scalar_lea.vmem (%p31_p4), [#allocation2], %s2161_s26 }
  0x13   : > { %183 = vst [vmem:[%s2315_s30] sm:$0xff] (%p31_p4), %v182_v0   ;;  %v194_v3 = vld [vmem:[%s2310_s29 + $0x18] sm:$0xff] (%p31_p4)   ;;  %v198_v4 = vld [vmem:[%s2310_s29 + $0x20] sm:$0xff] (%p31_p4)   ;;  %v202_v5 = vld [vmem:[%s2310_s29 + $0x28] sm:$0xff] (%p31_p4)  }
  0x14   : > { %187 = vst [vmem:[%s2315_s30 + $0x8] sm:$0xff] %v186_v1   ;;  %v206_v6 = vld [vmem:[%s2310_s29 + $0x30] sm:$0xff]   ;;  %v210_v7 = vld [vmem:[%s2310_s29 + $0x38] sm:$0xff]   ;;  %v214_v8 = vld [vmem:[%s2310_s29 + $0x80] sm:$0xff]  }
  0x15   : > { %191 = vst [vmem:[%s2315_s30 + $0x10] sm:$0xff] %v190_v2   ;;  %v218_v9 = vld [vmem:[%s2310_s29 + $0x88] sm:$0xff]   ;;  %v222_v10 = vld [vmem:[%s2310_s29 + $0x90] sm:$0xff]   ;;  %v226_v11 = vld [vmem:[%s2310_s29 + $0x98] sm:$0xff]  }
  0x16   : > { %195 = vst [vmem:[%s2315_s30 + $0x18] sm:$0xff] %v194_v3   ;;  %v230_v12 = vld [vmem:[%s2310_s29 + $0xa0] sm:$0xff]   ;;  %v234_v13 = vld [vmem:[%s2310_s29 + $0xa8] sm:$0xff]   ;;  %v238_v14 = vld [vmem:[%s2310_s29 + $0xb0] sm:$0xff]  }
  0x17   : > { %199 = vst [vmem:[%s2315_s30 + $0x20] sm:$0xff] %v198_v4   ;;  %v242_v15 = vld [vmem:[%s2310_s29 + $0xb8] sm:$0xff]   ;;  %v246_v16 = vld [vmem:[%s2310_s29 + $0x100] sm:$0xff]   ;;  %v250_v17 = vld [vmem:[%s2310_s29 + $0x108] sm:$0xff]  }
  0x18   : > { %203 = vst [vmem:[%s2315_s30 + $0x28] sm:$0xff] %v202_v5   ;;  %v254_v18 = vld [vmem:[%s2310_s29 + $0x110] sm:$0xff]   ;;  %v258_v19 = vld [vmem:[%s2310_s29 + $0x118] sm:$0xff]   ;;  %v262_v20 = vld [vmem:[%s2310_s29 + $0x120] sm:$0xff]  }
  0x19   : > { %207 = vst [vmem:[%s2315_s30 + $0x30] sm:$0xff] %v206_v6   ;;  %v266_v21 = vld [vmem:[%s2310_s29 + $0x128] sm:$0xff]   ;;  %v270_v22 = vld [vmem:[%s2310_s29 + $0x130] sm:$0xff]   ;;  %v274_v23 = vld [vmem:[%s2310_s29 + $0x138] sm:$0xff]  }
  0x1a   : > { %211 = vst [vmem:[%s2315_s30 + $0x38] sm:$0xff] %v210_v7  }
  0x1b   : > { %215 = vst [vmem:[%s2315_s30 + $0x40] sm:$0xff] %v214_v8  }
  0x1c   : > { %219 = vst [vmem:[%s2315_s30 + $0x48] sm:$0xff] %v218_v9  }
  0x1d   : > { %223 = vst [vmem:[%s2315_s30 + $0x50] sm:$0xff] %v222_v10  }
  0x1e   : > { %227 = vst [vmem:[%s2315_s30 + $0x58] sm:$0xff] %v226_v11  }
  0x1f   : > { %231 = vst [vmem:[%s2315_s30 + $0x60] sm:$0xff] %v230_v12  }
  0x20   : > { %235 = vst [vmem:[%s2315_s30 + $0x68] sm:$0xff] %v234_v13  }
  0x21   : > { %239 = vst [vmem:[%s2315_s30 + $0x70] sm:$0xff] %v238_v14  }
  0x22   : > { %243 = vst [vmem:[%s2315_s30 + $0x78] sm:$0xff] %v242_v15  }
  0x23   : > { %247 = vst [vmem:[%s2315_s30 + $0x80] sm:$0xff] %v246_v16  }
  0x24   : > { %251 = vst [vmem:[%s2315_s30 + $0x88] sm:$0xff] %v250_v17  }
  0x25   : > { %255 = vst [vmem:[%s2315_s30 + $0x90] sm:$0xff] %v254_v18  }
  0x26   : > { %259 = vst [vmem:[%s2315_s30 + $0x98] sm:$0xff] %v258_v19  }
  0x27   : > { %263 = vst [vmem:[%s2315_s30 + $0xa0] sm:$0xff] %v262_v20  }
  0x28   : > { %267 = vst [vmem:[%s2315_s30 + $0xa8] sm:$0xff] %v266_v21  }
  0x29   : > { %271 = vst [vmem:[%s2315_s30 + $0xb0] sm:$0xff] %v270_v22  }
  0x2a   : > { %275 = vst [vmem:[%s2315_s30 + $0xb8] sm:$0xff] %v274_v23  }
  0x2b PF: > { %p1828_p7 = scmp.ge.s32.totalorder %s2242_s17, 1  ;;  %p396_p8 = scmp.lt.s32.totalorder %s2242_s17, 3 }
  0x2d   : > { %p397_p9 = pnand %p1828_p7, %p396_p8 }
  0x2f   : > { %400 = sbr.rel (%p397_p9) target bundleno = 419 (0x1a3), region = 69 }
  0x34   : > { %v1873_v24 = vld [vmem:[%s3222_s2 + $0x38] sm:$0xff]  ;;  %s403_s7 = sand.u32 1, %s2234_s15   ;;  %v1872_v25 = vld [vmem:[%s3222_s2 + $0x30] sm:$0xff]  ;;  %v2376_v26 = vld [vmem:[%s3221_s1] ss:$0 sm:$0xff]  ;;  %p432_p10 = scmp.lt.s32.totalorder %s2285_s18, 1 }
  0x35   : > { %s2368_s8 = smul.u32 192, %s403_s7  ;;  %1175 = vmatpush.bf16.msra.mxu0 %v1873_v24  ;;  %2137 = vmatpush.bf16.msra.mxu1 %v1873_v24  ;;  %v1871_v36 = vld [vmem:[%s3222_s2 + $0x28] sm:$0xff]  ;;  %v1870_v54 = vld [vmem:[%s3222_s2 + $0x20] sm:$0xff]  ;;  %v1869_v8 = vld [vmem:[%s3222_s2 + $0x18] sm:$0xff]  ;;  %s1874_s10 = sshll.u32 (%p2300_p5), %s2285_s18, 6 }
  0x36   : > { %2138 = vmatpush.bf16.msra.mxu2 %v1873_v24  ;;  %2139 = vmatpush.bf16.msra.mxu3 %v1873_v24  ;;  %v1868_v23 = vld [vmem:[%s3222_s2 + $0x10] sm:$0xff]  ;;  %s433_s6 = scalar_select %p432_p10, %s2285_s18, 1 }
  0x37   : > { %s2379_s13 = scalar_lea.vmem [#allocation2], %s2368_s8  ;;  %s2994_s5 = scalar_lea.vmem [#allocation3], %s2368_s8 }
  0x38   : > { %v1876_v27 = vld [vmem:[%s2379_s13] sm:$0xff]   ;;  %v2096_v34 = vld [vmem:[%s2379_s13 + $0x30] sm:$0xff]   ;;  %s434_s9 = scalar_lea.vmem %s3224_s4, %s433_s6 }
  0x39   : > { %v2098_v28 = vld [vmem:[%s2379_s13 + $0x40] sm:$0xff]   ;;  %v1877_v30 = vunpack.c.l.bf16 %v1876_v27  ;;  %v1878_v31 = vunpack.c.h.bf16 %v1876_v27  ;;  %v2104_v35 = vld [vmem:[%s2379_s13 + $0x70] sm:$0xff]   ;;  %1176 = vmatpush.bf16.msra.mxu0 %v1872_v25  ;;  %2140 = vmatpush.bf16.msra.mxu1 %v1872_v25  ;;  %v1901_v39 = vunpack.c.l.bf16 %v2096_v34  ;;  %v1902_v40 = vunpack.c.h.bf16 %v2096_v34 }
  0x3a   : > { %v2106_v29 = vld [vmem:[%s2379_s13 + $0x80] sm:$0xff]   ;;  %v1909_v32 = vunpack.c.l.bf16 %v2098_v28  ;;  %v1910_v33 = vunpack.c.h.bf16 %v2098_v28  ;;  %v2112_v41 = vld [vmem:[%s2379_s13 + $0xb0] sm:$0xff]   ;;  %2141 = vmatpush.bf16.msra.mxu2 %v1872_v25  ;;  %2142 = vmatpush.bf16.msra.mxu3 %v1872_v25  ;;  %v1933_v45 = vunpack.c.l.bf16 %v2104_v35  ;;  %v1934_v49 = vunpack.c.h.bf16 %v2104_v35 }
  0x3b   : > { %v1941_v37 = vunpack.c.l.bf16 %v2106_v29  ;;  %v1942_v38 = vunpack.c.h.bf16 %v2106_v29  ;;  %v2391_v42 = vmul.f32 %v2376_v26, %v1877_v30  ;;  %v2394_v43 = vmul.f32 %v2376_v26, %v1878_v31  ;;  %v2094_v62 = vld [vmem:[%s2379_s13 + $0x20] sm:$0xff]  }
  0x3c   : > { %v2397_v44 = vmul.f32 %v2376_v26, %v1909_v32  ;;  %v2400_v46 = vmul.f32 %v2376_v26, %v1910_v33  ;;  %v1965_v53 = vunpack.c.l.bf16 %v2112_v41  ;;  %v1966_v58 = vunpack.c.h.bf16 %v2112_v41  ;;  %v2102_v7 = vld [vmem:[%s2379_s13 + $0x60] sm:$0xff]  }
  0x3d   : > { %v2403_v47 = vmul.f32 %v2376_v26, %v1941_v37  ;;  %v2406_v48 = vmul.f32 %v2376_v26, %v1942_v38  ;;  %v583_v50 = vmul.f32 %v2391_v42, %v2391_v42  ;;  %v584_v51 = vmul.f32 %v2394_v43, %v2394_v43  ;;  %1177 = vmatpush.bf16.msra.mxu0 %v1871_v36  ;;  %v2110_v21 = vld [vmem:[%s2379_s13 + $0xa0] sm:$0xff]  }
  0x3e   : > { %v599_v52 = vmul.f32 %v2397_v44, %v2397_v44  ;;  %2143 = vmatpush.bf16.msra.mxu1 %v1871_v36  ;;  %v600_v55 = vmul.f32 %v2400_v46, %v2400_v46  ;;  %2144 = vmatpush.bf16.msra.mxu2 %v1871_v36  ;;  %v2424_v60 = vmul.f32 %v2376_v26, %v1901_v39  ;;  %v1893_v12 = vunpack.c.l.bf16 %v2094_v62 }
  0x3f   : > { %3238 = vst [vmem:[#allocation4_spill] sm:$0xff] %v2403_v47  ;;  %v615_v56 = vmul.f32 %v2403_v47, %v2403_v47  ;;  %v616_v57 = vmul.f32 %v2406_v48, %v2406_v48  ;;  %2145 = vmatpush.bf16.msra.mxu3 %v1871_v36  ;;  %v2427_v61 = vmul.f32 %v2376_v26, %v1902_v40  ;;  %v1894_v16 = vunpack.c.h.bf16 %v2094_v62  ;;  %v1867_v36 = vld [vmem:[%s3222_s2 + $0x8] sm:$0xff] }
  0x40   : > { %3239 = vst [vmem:[#allocation5_spill] sm:$0xff] %v2406_v48  ;;  %v631_v59 = vadd.f32 %v599_v52, %v583_v50  ;;  %v633_v63 = vadd.f32 %v600_v55, %v584_v51  ;;  %v2431_v0 = vmul.f32 %v2376_v26, %v1933_v45  ;;  %v2434_v1 = vmul.f32 %v2376_v26, %v1934_v49  ;;  %v1866_v55 = vld [vmem:[%s3222_s2] sm:$0xff] }
  0x41   : > { %v2437_v2 = vmul.f32 %v2376_v26, %v1965_v53  ;;  %v2440_v4 = vmul.f32 %v2376_v26, %v1966_v58  ;;  %v595_v5 = vmul.f32 %v2424_v60, %v2424_v60  ;;  %v596_v6 = vmul.f32 %v2427_v61, %v2427_v61  ;;  %1178 = vmatpush.bf16.msra.mxu0 %v1870_v54 }
  0x42   : > { %v632_v3 = vadd.f32 %v631_v59, %v615_v56  ;;  %2146 = vmatpush.bf16.msra.mxu1 %v1870_v54  ;;  %v634_v9 = vadd.f32 %v633_v63, %v616_v57  ;;  %v611_v10 = vmul.f32 %v2431_v0, %v2431_v0  ;;  %v612_v11 = vmul.f32 %v2434_v1, %v2434_v1  ;;  %v2100_v59 = vld [vmem:[%s2379_s13 + $0x50] sm:$0xff]  }
  0x43   : > { %3240 = vst [vmem:[#allocation6_spill] sm:$0xff] %v2437_v2  ;;  %2147 = vmatpush.bf16.msra.mxu2 %v1870_v54  ;;  %2148 = vmatpush.bf16.msra.mxu3 %v1870_v54  ;;  %v627_v14 = vmul.f32 %v2437_v2, %v2437_v2  ;;  %v628_v15 = vmul.f32 %v2440_v4, %v2440_v4  ;;  %v1925_v20 = vunpack.c.l.bf16 %v2102_v7  ;;  %v1926_v22 = vunpack.c.h.bf16 %v2102_v7  ;;  %v2092_v54 = vld [vmem:[%s2379_s13 + $0x10] sm:$0xff]  }
  0x44   : > { %3241 = vst [vmem:[#allocation7_spill] sm:$0xff] %v2440_v4  ;;  %v2454_v13 = vmin.f32 %v632_v3, 1.0  ;;  %v2460_v17 = vmin.f32 %v634_v9, 1.0  ;;  %v655_v18 = vadd.f32 %v611_v10, %v595_v5  ;;  %v657_v19 = vadd.f32 %v612_v11, %v596_v6  ;;  %v2108_v9 = vld [vmem:[%s2379_s13 + $0x90] sm:$0xff]  }
  0x45   : > { %1179 = vmatpush.bf16.msra.mxu0 %v1869_v8  ;;  %v1957_v27 = vunpack.c.l.bf16 %v2110_v21  ;;  %v1958_v28 = vunpack.c.h.bf16 %v2110_v21  ;;  %v2469_v29 = vmul.f32 %v2376_v26, %v1893_v12  ;;  %v2472_v30 = vmul.f32 %v2376_v26, %v1894_v16 }
  0x46   : > { %2188 = vrsqrt.f32 %v2454_v13  ;;  %2149 = vmatpush.bf16.msra.mxu1 %v1869_v8  ;;  %v656_v24 = vadd.f32 %v655_v18, %v627_v14  ;;  %v658_v25 = vadd.f32 %v657_v19, %v628_v15  ;;  %v2475_v31 = vmul.f32 %v2376_v26, %v1925_v20 }
  0x47   : > { %2190 = vrsqrt.f32 %v2460_v17  ;;  %2150 = vmatpush.bf16.msra.mxu2 %v1869_v8  ;;  %2151 = vmatpush.bf16.msra.mxu3 %v1869_v8  ;;  %v2482_v34 = vmul.f32 %v2376_v26, %v1926_v22  ;;  %v2485_v35 = vmul.f32 %v2376_v26, %v1957_v27  ;;  %v2491_v37 = vmul.f32 %v2376_v26, %v1958_v28 }
  0x48   : > { %v2477_v32 = vmin.f32 %v656_v24, 1.0  ;;  %v2479_v33 = vmin.f32 %v658_v25, 1.0  ;;  %v591_v38 = vmul.f32 %v2469_v29, %v2469_v29  ;;  %v607_v39 = vmul.f32 %v2475_v31, %v2475_v31 }
  0x49   : > { %1180 = vmatpush.bf16.msra.mxu0 %v1868_v23  ;;  %v592_v41 = vmul.f32 %v2472_v30, %v2472_v30  ;;  %vm686_vm0 = vcmp.eq.f32.partialorder %v2454_v13, inf  ;;  %v689_v50 = vand.u32 2147483648, %v2454_v13  ;;  %v608_v52 = vmul.f32 %v2482_v34, %v2482_v34 }
  0x4a   : > { %2152 = vmatpush.bf16.msra.mxu1 %v1868_v23  ;;  %2192 = vrsqrt.f32 %v2477_v32  ;;  %v623_v53 = vmul.f32 %v2485_v35, %v2485_v35  ;;  %vm688_vm1 = vcmp.eq.f32.partialorder %v2454_v13, 0.0  ;;  %vm698_vm2 = vcmp.eq.f32.partialorder %v2460_v17, inf }
  0x4b   : > { %2153 = vmatpush.bf16.msra.mxu2 %v1868_v23  ;;  %2154 = vmatpush.bf16.msra.mxu3 %v1868_v23  ;;  %2194 = vrsqrt.f32 %v2479_v33  ;;  %v624_v57 = vmul.f32 %v2491_v37, %v2491_v37  ;;  %v647_v58 = vadd.f32 %v607_v39, %v591_v38  ;;  %vm700_vm3 = vcmp.eq.f32.partialorder %v2460_v17, 0.0 }
  0x4c   : > { %v2189_v40 = vpop.eup %2188  ;;  %v701_v63 = vand.u32 2147483648, %v2460_v17  ;;  %v649_v3 = vadd.f32 %v608_v52, %v592_v41  ;;  %v833_v6 = vand.u32 2147483648, %v2477_v32  ;;  %v1885_v8 = vunpack.c.l.bf16 %v2092_v54 }
  0x4d   : > { %v2191_v45 = vpop.eup %2190  ;;  %v680_v49 = vmul.f32 %v2189_v40, %v2454_v13  ;;  %1181 = vmatpush.bf16.msra.mxu0 %v1867_v36  ;;  %v648_v7 = vadd.f32 %v647_v58, %v623_v53  ;;  %v1886_v14 = vunpack.c.h.bf16 %v2092_v54  ;;  %v1917_v15 = vunpack.c.l.bf16 %v2100_v59 }
  0x4e   : > { %v692_v51 = vmul.f32 %v2191_v45, %v2460_v17  ;;  %2155 = vmatpush.bf16.msra.mxu1 %v1867_v36  ;;  %v650_v12 = vadd.f32 %v649_v3, %v624_v57  ;;  %v1918_v21 = vunpack.c.h.bf16 %v2100_v59  ;;  %vm830_vm4 = vcmp.eq.f32.partialorder %v2477_v32, inf }
  0x4f   : > { %v681_v56 = vmul.f32 %v2189_v40, %v680_v49  ;;  %2156 = vmatpush.bf16.msra.mxu2 %v1867_v36  ;;  %2157 = vmatpush.bf16.msra.mxu3 %v1867_v36  ;;  %v2523_v20 = vmin.f32 %v648_v7, 1.0  ;;  %v1949_v25 = vunpack.c.l.bf16 %v2108_v9  ;;  %vm832_vm5 = vcmp.eq.f32.partialorder %v2477_v32, 0.0 }
  0x50   : > { %v693_v62 = vmul.f32 %v2191_v45, %v692_v51  ;;  %v2193_v10 = vpop.eup %2192  ;;  %v2527_v24 = vmin.f32 %v650_v12, 1.0  ;;  %vm842_vm6 = vcmp.eq.f32.partialorder %v2479_v33, inf  ;;  %v1950_v36 = vunpack.c.h.bf16 %v2108_v9 }
  0x51   : > { %v682_v5 = vmul.f32 0.5, %v681_v56  ;;  %v2195_v16 = vpop.eup %2194  ;;  %1182 = vmatpush.bf16.msra.mxu0 %v1866_v55  ;;  %v824_v19 = vmul.f32 %v2193_v10, %v2477_v32  ;;  %2196 = vrsqrt.f32 %v2523_v20  ;;  %vm844_vm7 = vcmp.eq.f32.partialorder %v2479_v33, 0.0 }
  0x52   : > { %v694_v11 = vmul.f32 0.5, %v693_v62  ;;  %2158 = vmatpush.bf16.msra.mxu1 %v1866_v55  ;;  %v836_v23 = vmul.f32 %v2195_v16, %v2479_v33  ;;  %v845_v41 = vand.u32 2147483648, %v2479_v33  ;;  %v2535_v49 = vmul.f32 %v2376_v26, %v1885_v8 }
  0x53   : > { %v683_v18 = vsub.f32 1.5, %v682_v5  ;;  %2159 = vmatpush.bf16.msra.mxu2 %v1866_v55  ;;  %2160 = vmatpush.bf16.msra.mxu3 %v1866_v55  ;;  %v825_v28 = vmul.f32 %v2193_v10, %v824_v19  ;;  %2198 = vrsqrt.f32 %v2527_v24  ;;  %v2540_v52 = vmul.f32 %v2376_v26, %v1886_v14 }
  0x54   : > { %v695_v22 = vsub.f32 1.5, %v694_v11  ;;  %v837_v39 = vmul.f32 %v2195_v16, %v836_v23  ;;  %v2547_v55 = vmul.f32 %v2376_v26, %v1918_v21  ;;  %v2553_v58 = vmul.f32 %v2376_v26, %v1949_v25 }
  0x55   : > { %v684_v27 = vmul.f32 %v2189_v40, %v683_v18  ;;  %v826_v40 = vmul.f32 0.5, %v825_v28  ;;  %v2556_v59 = vmul.f32 %v2376_v26, %v1950_v36  ;;  %v587_v7 = vmul.f32 %v2535_v49, %v2535_v49 }
  0x56   : > { %v696_v38 = vmul.f32 %v2191_v45, %v695_v22  ;;  %v838_v54 = vmul.f32 0.5, %v837_v39  ;;  %v2544_v45 = vmul.f32 %v2376_v26, %v1917_v15  ;;  %vm782_vm8 = vcmp.eq.f32.partialorder %v2523_v20, inf }
  0x57   : > { %v685_v51 = vmul.f32 %v684_v27, %v2454_v13  ;;  %v827_v57 = vsub.f32 1.5, %v826_v40  ;;  %v2197_v8 = vpop.eup %2196  ;;  %v620_v27 = vmul.f32 %v2556_v59, %v2556_v59  ;;  %vm784_vm9 = vcmp.eq.f32.partialorder %v2523_v20, 0.0 }
  0x58   : > { %v697_v53 = vmul.f32 %v696_v38, %v2460_v17  ;;  %v839_v5 = vsub.f32 1.5, %v838_v54  ;;  %v776_v15 = vmul.f32 %v2197_v8, %v2523_v20  ;;  %v603_v18 = vmul.f32 %v2544_v45, %v2544_v45 }
  0x59   : > { %v687_v56 = vsel %vm686_vm0, %v2454_v13, %v685_v51  ;;  %v828_v12 = vmul.f32 %v2193_v10, %v827_v57  ;;  %v588_v13 = vmul.f32 %v2540_v52, %v2540_v52  ;;  %v2199_v19 = vpop.eup %2198  ;;  %v619_v10 = vmul.f32 %v2553_v58, %v2553_v58 }
  0x5a   : > { %v2562_v62 = vsel %vm688_vm1, %v689_v50, %v687_v56  ;;  %v699_v3 = vsel %vm698_vm2, %v2460_v17, %v697_v53  ;;  %v840_v14 = vmul.f32 %v2195_v16, %v839_v5  ;;  %v777_v16 = vmul.f32 %v2197_v8, %v776_v15 }
  0x5b   : > { %v2571_v9 = vsel %vm700_vm3, %v701_v63, %v699_v3  ;;  %v871_v11 = vmul.f32 %v2562_v62, %v2391_v42  ;;  %v829_v63 = vmul.f32 %v828_v12, %v2477_v32  ;;  %v604_v42 = vmul.f32 %v2547_v55, %v2547_v55 }
  0x5c   : > { %v872_v50 = vmul.f32 %v2571_v9, %v2394_v43  ;;  %v841_v43 = vmul.f32 %v840_v14, %v2479_v33  ;;  %v788_v22 = vmul.f32 %v2199_v19, %v2527_v24  ;;  %v639_v28 = vadd.f32 %v603_v18, %v587_v7  ;;  %v2099_v14 = vld [vmem:[%s2379_s13 + $0x48] sm:$0xff]  }
  0x5d   : > { %v919_v17 = vpack.c.bf16 %v871_v11, %v871_v11  ;;  %v831_v25 = vsel %vm830_vm4, %v2477_v32, %v829_v63  ;;  %v778_v51 = vmul.f32 0.5, %v777_v16  ;;  %v641_v3 = vadd.f32 %v604_v42, %v588_v13 }
  0x5e   : > { %v920_v21 = vpack.c.bf16 %v872_v50, %v872_v50  ;;  %v2599_v38 = vsel %vm832_vm5, %v833_v6, %v831_v25  ;;  %v843_v39 = vsel %vm842_vm6, %v2479_v33, %v841_v43  ;;  %v789_v54 = vmul.f32 %v2199_v19, %v788_v22  ;;  %v2091_v33 = vld [vmem:[%s2379_s13 + $0x8] sm:$0xff]  }
  0x5f   : > { %v1031_v23 = vunpack.c.l.b16 %v919_v17  ;;  %v2606_v40 = vsel %vm844_vm7, %v845_v41, %v843_v39  ;;  %v883_v53 = vmul.f32 %v2599_v38, %v2424_v60  ;;  %v640_v56 = vadd.f32 %v639_v28, %v619_v10  ;;  %v2107_v43 = vld [vmem:[%s2379_s13 + $0x88] sm:$0xff]  }
  0x60   : > { %v1032_v36 = vunpack.c.l.b16 %v920_v21  ;;  %v884_v32 = vmul.f32 %v2606_v40, %v2427_v61  ;;  %v779_v6 = vsub.f32 1.5, %v778_v51  ;;  %v790_v7 = vmul.f32 0.5, %v789_v54 }
  0x61   : > { %v931_v5 = vpack.c.bf16 %v883_v53, %v883_v53  ;;  %v2613_v11 = vmin.f32 %v640_v56, 1.0  ;;  %v785_v60 = vand.u32 2147483648, %v2523_v20  ;;  %v642_v50 = vadd.f32 %v641_v3, %v620_v27 }
  0x62   : > { %v1079_v57 = vpack.c.b16 %v1032_v36, %v1031_v23  ;;  %v932_v41 = vpack.c.bf16 %v884_v32, %v884_v32  ;;  %v780_v12 = vmul.f32 %v2197_v8, %v779_v6  ;;  %v791_v18 = vsub.f32 1.5, %v790_v7 }
  0x63   : > { %v1043_v15 = vunpack.c.l.b16 %v931_v5  ;;  %vm794_vm10 = vcmp.eq.f32.partialorder %v2527_v24, inf  ;;  %2200 = vrsqrt.f32 %v2613_v11  ;;  %v2621_v17 = vmin.f32 %v642_v50, 1.0 }
  0x64   : > { %1183 = vmatmul.bf16.vlgmr.msra.gmra.mxu0 %v1079_v57  ;;  %v1044_v61 = vunpack.c.l.b16 %v932_v41  ;;  %v781_v13 = vmul.f32 %v780_v12, %v2523_v20  ;;  %v1881_v63 = vunpack.c.l.bf16 %v2091_v33  ;;  %v792_v42 = vmul.f32 %v2199_v19, %v791_v18 }
  0x65   : > { %v1882_v10 = vunpack.c.h.bf16 %v2091_v33  ;;  %v1913_v8 = vunpack.c.l.bf16 %v2099_v14  ;;  %v1914_v21 = vunpack.c.h.bf16 %v2099_v14  ;;  %v797_v23 = vand.u32 2147483648, %v2527_v24  ;;  %v2097_v33 = vld [vmem:[%s2379_s13 + $0x38] sm:$0xff]  }
  0x66   : > { %v1085_v16 = vpack.c.b16 %v1044_v61, %v1043_v15  ;;  %v783_v22 = vsel %vm782_vm8, %v2523_v20, %v781_v13  ;;  %2202 = vrsqrt.f32 %v2621_v17  ;;  %v793_v27 = vmul.f32 %v792_v42, %v2527_v24  ;;  %v2105_v14 = vld [vmem:[%s2379_s13 + $0x78] sm:$0xff]  }
  0x67   : > { %v2631_v25 = vsel %vm784_vm9, %v785_v60, %v783_v22  ;;  %vm796_vm11 = vcmp.eq.f32.partialorder %v2527_v24, 0.0  ;;  %v1945_v28 = vunpack.c.l.bf16 %v2107_v43  ;;  %v1946_v36 = vunpack.c.h.bf16 %v2107_v43 }
  0x68   : > { %1213 = vmatmul.bf16.vlgmr.msra.gmra.mxu1 %v1085_v16  ;;  %v895_v19 = vmul.f32 %v2631_v25, %v2475_v31  ;;  %v2638_v39 = vmul.f32 %v2376_v26, %v1881_v63  ;;  %v795_v20 = vsel %vm794_vm10, %v2527_v24, %v793_v27  ;;  %v2644_v53 = vmul.f32 %v2376_v26, %v1882_v10 }
  0x69   : > { %v2201_v51 = vpop.eup %2200  ;;  %v2647_v54 = vmul.f32 %v2376_v26, %v1913_v8  ;;  %v2650_v56 = vmul.f32 %v2376_v26, %v1914_v21  ;;  %v2652_v31 = vsel %vm796_vm11, %v797_v23, %v795_v20  ;;  %v2656_v6 = vmul.f32 %v2376_v26, %v1945_v28  ;;  %v2113_v23 = vld [vmem:[%s2379_s13 + $0xb8] sm:$0xff]  }
  0x6a   : > { %v943_v57 = vpack.c.bf16 %v895_v19, %v895_v19  ;;  %v728_v32 = vmul.f32 %v2201_v51, %v2613_v11  ;;  %v896_v24 = vmul.f32 %v2652_v31, %v2482_v34  ;;  %vm734_vm12 = vcmp.eq.f32.partialorder %v2613_v11, inf }
  0x6b   : > { %3242 = vst [vmem:[#allocation8_spill] sm:$0xff] %v2656_v6  ;;  %v2662_v3 = vmul.f32 %v2376_v26, %v1946_v36  ;;  %v585_v5 = vmul.f32 %v2638_v39, %v2638_v39  ;;  %v586_v7 = vmul.f32 %v2644_v53, %v2644_v53  ;;  %v601_v50 = vmul.f32 %v2647_v54, %v2647_v54 }
  0x6c   : > { %v2203_v41 = vpop.eup %2202  ;;  %v1055_v12 = vunpack.c.l.b16 %v943_v57  ;;  %v729_v60 = vmul.f32 %v2201_v51, %v728_v32  ;;  %v602_v34 = vmul.f32 %v2650_v56, %v2650_v56  ;;  %v944_v15 = vpack.c.bf16 %v896_v24, %v896_v24 }
  0x6d   : > { %3243 = vst [vmem:[#allocation9_spill] sm:$0xff] %v2662_v3  ;;  %v740_v18 = vmul.f32 %v2203_v41, %v2621_v17  ;;  %v617_v61 = vmul.f32 %v2656_v6, %v2656_v6  ;;  %v618_v13 = vmul.f32 %v2662_v3, %v2662_v3  ;;  %v635_v42 = vadd.f32 %v601_v50, %v585_v5 }
  0x6e   : > { %v730_v63 = vmul.f32 0.5, %v729_v60  ;;  %v637_v10 = vadd.f32 %v602_v34, %v586_v7  ;;  %v1905_v8 = vunpack.c.l.bf16 %v2097_v33  ;;  %v1056_v21 = vunpack.c.l.b16 %v944_v15 }
  0x6f   : > { %v741_v43 = vmul.f32 %v2203_v41, %v740_v18  ;;  %v1906_v16 = vunpack.c.h.bf16 %v2097_v33  ;;  %v1937_v22 = vunpack.c.l.bf16 %v2105_v14  ;;  %v636_v19 = vadd.f32 %v635_v42, %v617_v61 }
  0x70   : > { %v731_v27 = vsub.f32 1.5, %v730_v63  ;;  %v638_v28 = vadd.f32 %v637_v10, %v618_v13  ;;  %v1938_v36 = vunpack.c.h.bf16 %v2105_v14  ;;  %v1091_v20 = vpack.c.b16 %v1056_v21, %v1055_v12 }
  0x71   : > { %vm736_vm13 = vcmp.eq.f32.partialorder %v2613_v11, 0.0  ;;  %v737_v57 = vand.u32 2147483648, %v2613_v11  ;;  %v742_v32 = vmul.f32 0.5, %v741_v43  ;;  %v2682_v60 = vmin.f32 %v636_v19, 1.0 }
  0x72   : > { %v732_v24 = vmul.f32 %v2201_v51, %v731_v27  ;;  %v2684_v5 = vmin.f32 %v638_v28, 1.0  ;;  %v1969_v7 = vunpack.c.l.bf16 %v2113_v23  ;;  %1243 = vmatmul.bf16.vlgmr.msra.gmra.mxu2 %v1091_v20  ;;  %v1970_v50 = vunpack.c.h.bf16 %v2113_v23 }
  0x73   : > { %v743_v33 = vsub.f32 1.5, %v742_v32  ;;  %v2687_v34 = vmul.f32 %v2376_v26, %v1905_v8  ;;  %v2690_v14 = vmul.f32 %v2376_v26, %v1906_v16  ;;  %2204 = vrsqrt.f32 %v2682_v60  ;;  %v2103_v32 = vld [vmem:[%s2379_s13 + $0x68] sm:$0xff]  }
  0x74   : > { %v733_v12 = vmul.f32 %v732_v24, %v2613_v11  ;;  %v2695_v51 = vmul.f32 %v2376_v26, %v1937_v22  ;;  %v2698_v15 = vmul.f32 %v2376_v26, %v1938_v36  ;;  %vm746_vm14 = vcmp.eq.f32.partialorder %v2621_v17, inf  ;;  %v2095_v22 = vld [vmem:[%s2379_s13 + $0x28] sm:$0xff]  }
  0x75   : > { %v744_v18 = vmul.f32 %v2203_v41, %v743_v33  ;;  %2206 = vrsqrt.f32 %v2684_v5  ;;  %vm748_vm15 = vcmp.eq.f32.partialorder %v2621_v17, 0.0  ;;  %v749_v13 = vand.u32 2147483648, %v2621_v17 }
  0x76   : > { %v735_v61 = vsel %vm734_vm12, %v2613_v11, %v733_v12  ;;  %v2708_v63 = vmul.f32 %v2376_v26, %v1969_v7  ;;  %v2716_v10 = vmul.f32 %v2376_v26, %v1970_v50  ;;  %v597_v8 = vmul.f32 %v2687_v34, %v2687_v34 }
  0x77   : > { %v2712_v42 = vsel %vm736_vm13, %v737_v57, %v735_v61  ;;  %v745_v41 = vmul.f32 %v744_v18, %v2621_v17  ;;  %v598_v43 = vmul.f32 %v2690_v14, %v2690_v14  ;;  %v613_v11 = vmul.f32 %v2695_v51, %v2695_v51 }
  0x78   : > { %3244 = vst [vmem:[#allocation10_spill] sm:$0xff] %v2708_v63  ;;  %v907_v21 = vmul.f32 %v2712_v42, %v2553_v58  ;;  %v614_v16 = vmul.f32 %v2698_v15, %v2698_v15  ;;  %v629_v27 = vmul.f32 %v2708_v63, %v2708_v63  ;;  %v630_v19 = vmul.f32 %v2716_v10, %v2716_v10 }
  0x79   : > { %3245 = vst [vmem:[#allocation11_spill] sm:$0xff] %v2716_v10  ;;  %v747_v23 = vsel %vm746_vm14, %v2621_v17, %v745_v41  ;;  %v2205_v58 = vpop.eup %2204  ;;  %v659_v20 = vadd.f32 %v613_v11, %v597_v8  ;;  %v1897_v50 = vunpack.c.l.bf16 %v2095_v22  ;;  %vm710_vm0 = vcmp.eq.f32.partialorder %v2682_v60, inf }
  0x7a   : > { %v2736_v28 = vsel %vm748_vm15, %v749_v13, %v747_v23  ;;  %v955_v36 = vpack.c.bf16 %v907_v21, %v907_v21  ;;  %v661_v57 = vadd.f32 %v614_v16, %v598_v43  ;;  %v704_v33 = vmul.f32 %v2205_v58, %v2682_v60  ;;  %v2111_v13 = vld [vmem:[%s2379_s13 + $0xa8] sm:$0xff]  }
  0x7b   : > { %v2207_v24 = vpop.eup %2206  ;;  %v908_v7 = vmul.f32 %v2736_v28, %v2556_v59  ;;  %v660_v18 = vadd.f32 %v659_v20, %v629_v27  ;;  %v1898_v17 = vunpack.c.h.bf16 %v2095_v22  ;;  %v1929_v43 = vunpack.c.l.bf16 %v2103_v32 }
  0x7c   : > { %v716_v12 = vmul.f32 %v2207_v24, %v2684_v5  ;;  %v662_v61 = vadd.f32 %v661_v57, %v630_v19  ;;  %v1067_v21 = vunpack.c.l.b16 %v955_v36  ;;  %v705_v8 = vmul.f32 %v2205_v58, %v704_v33 }
  0x7d   : > { %v956_v41 = vpack.c.bf16 %v908_v7, %v908_v7  ;;  %v2745_v16 = vmin.f32 %v660_v18, 1.0  ;;  %v1930_v59 = vunpack.c.h.bf16 %v2103_v32  ;;  %v1961_v4 = vunpack.c.l.bf16 %v2111_v13 }
  0x7e   : > { %v717_v11 = vmul.f32 %v2207_v24, %v716_v12  ;;  %v2747_v23 = vmin.f32 %v662_v61, 1.0  ;;  %v706_v6 = vmul.f32 0.5, %v705_v8  ;;  %v1962_v2 = vunpack.c.h.bf16 %v2111_v13 }
  0x7f   : > { %v1068_v3 = vunpack.c.l.b16 %v956_v41  ;;  %2208 = vrsqrt.f32 %v2745_v16  ;;  %v2751_v22 = vmul.f32 %v2376_v26, %v1897_v50  ;;  %v2754_v27 = vmul.f32 %v2376_v26, %v1898_v17 }
  0x80   : > { %v718_v10 = vmul.f32 0.5, %v717_v11  ;;  %v707_v36 = vsub.f32 1.5, %v706_v6  ;;  %vm712_vm1 = vcmp.eq.f32.partialorder %v2682_v60, 0.0  ;;  %2210 = vrsqrt.f32 %v2747_v23 }
  0x81   : > { %3246 = vst [vmem:[#allocation12_spill] sm:$0xff] %v2751_v22  ;;  %v1097_v19 = vpack.c.b16 %v1068_v3, %v1067_v21  ;;  %v713_v20 = vand.u32 2147483648, %v2682_v60  ;;  %vm722_vm2 = vcmp.eq.f32.partialorder %v2684_v5, inf  ;;  %v725_v32 = vand.u32 2147483648, %v2684_v5 }
  0x82   : > { %3247 = vst [vmem:[#allocation13_spill] sm:$0xff] %v2754_v27  ;;  %v719_v57 = vsub.f32 1.5, %v718_v10  ;;  %v708_v7 = vmul.f32 %v2205_v58, %v707_v36  ;;  %v2762_v33 = vmul.f32 %v2376_v26, %v1929_v43  ;;  %v2765_v50 = vmul.f32 %v2376_v26, %v1930_v59  ;;  %v2093_v59 = vld [vmem:[%s2379_s13 + $0x18] sm:$0xff]  }
  0x83   : > { %1273 = vmatmul.bf16.vlgmr.msra.gmra.mxu3 %v1097_v19  ;;  %v2768_v6 = vmul.f32 %v2376_v26, %v1961_v4  ;;  %v2771_v12 = vmul.f32 %v2376_v26, %v1962_v2  ;;  %v593_v10 = vmul.f32 %v2751_v22, %v2751_v22  ;;  %v594_v58 = vmul.f32 %v2754_v27, %v2754_v27 }
  0x84   : > { %v720_v3 = vmul.f32 %v2207_v24, %v719_v57  ;;  %v709_v18 = vmul.f32 %v708_v7, %v2682_v60  ;;  %v609_v61 = vmul.f32 %v2762_v33, %v2762_v33  ;;  %v610_v4 = vmul.f32 %v2765_v50, %v2765_v50 }
  0x85   : > { %v625_v24 = vmul.f32 %v2768_v6, %v2768_v6  ;;  %v2209_v2 = vpop.eup %2208  ;;  %vm724_vm3 = vcmp.eq.f32.partialorder %v2684_v5, 0.0  ;;  %v626_v13 = vmul.f32 %v2771_v12, %v2771_v12  ;;  %vm854_vm4 = vcmp.eq.f32.partialorder %v2745_v16, inf }
  0x86   : > { %v721_v17 = vmul.f32 %v720_v3, %v2684_v5  ;;  %v2211_v41 = vpop.eup %2210  ;;  %v711_v21 = vsel %vm710_vm0, %v2682_v60, %v709_v18  ;;  %v848_v8 = vmul.f32 %v2209_v2, %v2745_v16  ;;  %v651_v43 = vadd.f32 %v609_v61, %v593_v10 }
  0x87   : > { %v653_v11 = vadd.f32 %v610_v4, %v594_v58  ;;  %v2795_v19 = vsel %vm712_vm1, %v713_v20, %v711_v21  ;;  %v857_v57 = vand.u32 2147483648, %v2745_v16  ;;  %v860_v7 = vmul.f32 %v2211_v41, %v2747_v23  ;;  %v2101_v20 = vld [vmem:[%s2379_s13 + $0x58] sm:$0xff]  }
  0x88   : > { %v723_v36 = vsel %vm722_vm2, %v2684_v5, %v721_v17  ;;  %v873_v10 = vmul.f32 %v2795_v19, %v2638_v39  ;;  %v849_v58 = vmul.f32 %v2209_v2, %v848_v8  ;;  %vm856_vm5 = vcmp.eq.f32.partialorder %v2745_v16, 0.0 }
  0x89   : > { %v2803_v3 = vsel %vm724_vm3, %v725_v32, %v723_v36  ;;  %v652_v60 = vadd.f32 %v651_v43, %v625_v24  ;;  %v861_v18 = vmul.f32 %v2211_v41, %v860_v7  ;;  %v654_v61 = vadd.f32 %v653_v11, %v626_v13  ;;  %v2109_v36 = vld [vmem:[%s2379_s13 + $0x98] sm:$0xff]   ;;  %s3162_s13 = scalar_lea.vmem (%p2300_p5), %s3223_s3, %s1874_s10 }
  0x8a   : > { %v874_v5 = vmul.f32 %v2803_v3, %v2644_v53  ;;  %v1889_v4 = vunpack.c.l.bf16 %v2093_v59  ;;  %v921_v17 = vpack.c.bf16 %v873_v10, %v873_v10  ;;  %v850_v21 = vmul.f32 0.5, %v849_v58 }
  0x8b   : > { %v2811_v63 = vmin.f32 %v652_v60, 1.0  ;;  %v1890_v32 = vunpack.c.h.bf16 %v2093_v59  ;;  %v862_v47 = vmul.f32 0.5, %v861_v18  ;;  %v2814_v39 = vmin.f32 %v654_v61, 1.0 }
  0x8c   : > { %v922_v48 = vpack.c.bf16 %v874_v5, %v874_v5  ;;  %v1921_v8 = vunpack.c.l.bf16 %v2101_v20  ;;  %v1033_v27 = vunpack.c.l.b16 %v921_v17  ;;  %v851_v24 = vsub.f32 1.5, %v850_v21 }
  0x8d   : > { %2212 = vrsqrt.f32 %v2811_v63  ;;  %v1922_v43 = vunpack.c.h.bf16 %v2101_v20  ;;  %v863_v7 = vsub.f32 1.5, %v862_v47  ;;  %v1953_v13 = vunpack.c.l.bf16 %v2109_v36 }
  0x8e   : > { %v1034_v53 = vunpack.c.l.b16 %v922_v48  ;;  %v1954_v11 = vunpack.c.h.bf16 %v2109_v36  ;;  %v852_v10 = vmul.f32 %v2209_v2, %v851_v24  ;;  %vm866_vm6 = vcmp.eq.f32.partialorder %v2747_v23, inf }
  0x8f   : > { %vm868_vm7 = vcmp.eq.f32.partialorder %v2747_v23, 0.0  ;;  %2214 = vrsqrt.f32 %v2814_v39  ;;  %v864_v58 = vmul.f32 %v2211_v41, %v863_v7  ;;  %v869_v60 = vand.u32 2147483648, %v2747_v23 }
  0x90   : > { %v1080_v59 = vpack.c.b16 %v1034_v53, %v1033_v27  ;;  %v2822_v5 = vmul.f32 %v2376_v26, %v1889_v4  ;;  %v853_v20 = vmul.f32 %v852_v10, %v2745_v16  ;;  %v2826_v47 = vmul.f32 %v2376_v26, %v1890_v32 }
  0x91   : > { %v2829_v48 = vmul.f32 %v2376_v26, %v1921_v8  ;;  %v2832_v2 = vmul.f32 %v2376_v26, %v1922_v43  ;;  %v865_v27 = vmul.f32 %v864_v58, %v2747_v23  ;;  %v2836_v41 = vmul.f32 %v2376_v26, %v1953_v13 }
  0x92   : > { %1188 = vmatmul.bf16.gmra.mxu0 %v1080_v59  ;;  %v2839_v18 = vmul.f32 %v2376_v26, %v1954_v11  ;;  %v589_v61 = vmul.f32 %v2822_v5, %v2822_v5  ;;  %v855_v17 = vsel %vm854_vm4, %v2745_v16, %v853_v20  ;;  %v590_v21 = vmul.f32 %v2826_v47, %v2826_v47 }
  0x93   : > { %3248 = vst [vmem:[#allocation14_spill] sm:$0xff] %v2829_v48  ;;  %v2213_v4 = vpop.eup %2212  ;;  %v605_v32 = vmul.f32 %v2829_v48, %v2829_v48  ;;  %v606_v36 = vmul.f32 %v2832_v2, %v2832_v2  ;;  %v2854_v26 = vsel %vm856_vm5, %v857_v57, %v855_v17  ;;  %v867_v8 = vsel %vm866_vm6, %v2747_v23, %v865_v27 }
  0x94   : > { %3249 = vst [vmem:[#allocation15_spill] sm:$0xff] %v2832_v2  ;;  %v800_v24 = vmul.f32 %v2213_v4, %v2811_v63  ;;  %v621_v43 = vmul.f32 %v2836_v41, %v2836_v41  ;;  %v2864_v7 = vsel %vm868_vm7, %v869_v60, %v867_v8  ;;  %v885_v13 = vmul.f32 %v2854_v26, %v2687_v34 }
  0x95   : > { %v2215_v53 = vpop.eup %2214  ;;  %v622_v16 = vmul.f32 %v2839_v18, %v2839_v18  ;;  %v643_v57 = vadd.f32 %v605_v32, %v589_v61  ;;  %v886_v11 = vmul.f32 %v2864_v7, %v2690_v14  ;;  %v645_v58 = vadd.f32 %v606_v36, %v590_v21 }
  0x96   : > { %v801_v10 = vmul.f32 %v2213_v4, %v800_v24  ;;  %v812_v59 = vmul.f32 %v2215_v53, %v2814_v39  ;;  %v933_v20 = vpack.c.bf16 %v885_v13, %v885_v13  ;;  %v875_v34 = vmul.f32 %v2712_v42, %v2535_v49 }
  0x97   : > { %v644_v27 = vadd.f32 %v643_v57, %v621_v43  ;;  %v934_v17 = vpack.c.bf16 %v886_v11, %v886_v11  ;;  %v646_v8 = vadd.f32 %v645_v58, %v622_v16  ;;  %v876_v61 = vmul.f32 %v2736_v28, %v2540_v52 }
  0x98   : > { %v802_v23 = vmul.f32 0.5, %v801_v10  ;;  %v813_v60 = vmul.f32 %v2215_v53, %v812_v59  ;;  %v1045_v2 = vunpack.c.l.b16 %v933_v20  ;;  %vm806_vm8 = vcmp.eq.f32.partialorder %v2811_v63, inf }
  0x99   : > { %v2873_v48 = vmin.f32 %v644_v27, 1.0  ;;  %v1046_v14 = vunpack.c.l.b16 %v934_v17  ;;  %v2879_v22 = vmin.f32 %v646_v8, 1.0  ;;  %vm808_vm9 = vcmp.eq.f32.partialorder %v2811_v63, 0.0 }
  0x9a   : > { %v803_v32 = vsub.f32 1.5, %v802_v23  ;;  %v814_v24 = vmul.f32 0.5, %v813_v60  ;;  %v809_v49 = vand.u32 2147483648, %v2811_v63  ;;  %v923_v13 = vpack.c.bf16 %v875_v34, %v875_v34 }
  0x9b   : > { %2216 = vrsqrt.f32 %v2873_v48  ;;  %v1086_v21 = vpack.c.b16 %v1046_v14, %v1045_v2  ;;  %v924_v57 = vpack.c.bf16 %v876_v61, %v876_v61  ;;  %v887_v11 = vmul.f32 %v2562_v62, %v2397_v44 }
  0x9c   : > { %v804_v36 = vmul.f32 %v2213_v4, %v803_v32  ;;  %v815_v43 = vsub.f32 1.5, %v814_v24  ;;  %2218 = vrsqrt.f32 %v2879_v22  ;;  %vm818_vm10 = vcmp.eq.f32.partialorder %v2814_v39, inf }
  0x9d   : > { %1218 = vmatmul.bf16.gmra.mxu1 %v1086_v21  ;;  %v821_v2 = vand.u32 2147483648, %v2814_v39  ;;  %v1035_v4 = vunpack.c.l.b16 %v923_v13  ;;  %v888_v10 = vmul.f32 %v2571_v9, %v2400_v46  ;;  %vm820_vm11 = vcmp.eq.f32.partialorder %v2814_v39, 0.0 }
  0x9e   : > { %v805_v52 = vmul.f32 %v804_v36, %v2811_v63  ;;  %v816_v16 = vmul.f32 %v2215_v53, %v815_v43  ;;  %v1036_v20 = vunpack.c.l.b16 %v924_v57  ;;  %v935_v44 = vpack.c.bf16 %v887_v11, %v887_v11 }
  0x9f   : > { %v936_v17 = vpack.c.bf16 %v888_v10, %v888_v10  ;;  %vm758_vm12 = vcmp.eq.f32.partialorder %v2873_v48, inf  ;;  %vm760_vm13 = vcmp.eq.f32.partialorder %v2873_v48, 0.0  ;;  %vm770_vm14 = vcmp.eq.f32.partialorder %v2879_v22, inf }
  0xa0   : > { %v807_v59 = vsel %vm806_vm8, %v2811_v63, %v805_v52  ;;  %v817_v58 = vmul.f32 %v816_v16, %v2814_v39  ;;  %v1081_v34 = vpack.c.b16 %v1036_v20, %v1035_v4  ;;  %v1047_v21 = vunpack.c.l.b16 %v935_v44 }
  0xa1   : > { %v2217_v53 = vpop.eup %2216  ;;  %v2898_v27 = vsel %vm808_vm9, %v809_v49, %v807_v59  ;;  %v1048_v13 = vunpack.c.l.b16 %v936_v17  ;;  %v761_v52 = vand.u32 2147483648, %v2873_v48  ;;  %vm772_vm15 = vcmp.eq.f32.partialorder %v2879_v22, 0.0 }
  0xa2   : > { %v2219_v23 = vpop.eup %2218  ;;  %v819_v60 = vsel %vm818_vm10, %v2814_v39, %v817_v58  ;;  %v897_v46 = vmul.f32 %v2898_v27, %v2762_v33  ;;  %v752_v8 = vmul.f32 %v2217_v53, %v2873_v48  ;;  %1193 = vmatmul.bf16.gmra.mxu0 %v1081_v34  ;;  %v899_v33 = vmul.f32 %v2599_v38, %v2431_v0 }
  0xa3   : > { %v2904_v61 = vsel %vm820_vm11, %v821_v2, %v819_v60  ;;  %v764_v14 = vmul.f32 %v2219_v23, %v2879_v22  ;;  %v773_v11 = vand.u32 2147483648, %v2879_v22  ;;  %v900_v2 = vmul.f32 %v2606_v40, %v2434_v1 }
  0xa4   : > { %v898_v63 = vmul.f32 %v2904_v61, %v2765_v50  ;;  %v945_v32 = vpack.c.bf16 %v897_v46, %v897_v46  ;;  %v753_v24 = vmul.f32 %v2217_v53, %v752_v8  ;;  %v947_v0 = vpack.c.bf16 %v899_v33, %v899_v33 }
  0xa5   : > { %v765_v39 = vmul.f32 %v2219_v23, %v764_v14  ;;  %v889_v10 = vmul.f32 %v2795_v19, %v2647_v54  ;;  %v890_v59 = vmul.f32 %v2803_v3, %v2650_v56  ;;  %v1087_v44 = vpack.c.b16 %v1048_v13, %v1047_v21 }
  0xa6   : > { %v946_v36 = vpack.c.bf16 %v898_v63, %v898_v63  ;;  %v1057_v43 = vunpack.c.l.b16 %v945_v32  ;;  %v754_v49 = vmul.f32 0.5, %v753_v24  ;;  %v901_v17 = vmul.f32 %v2854_v26, %v2695_v51 }
  0xa7   : > { %v766_v16 = vmul.f32 0.5, %v765_v39  ;;  %v937_v46 = vpack.c.bf16 %v889_v10, %v889_v10  ;;  %v938_v8 = vpack.c.bf16 %v890_v59, %v890_v59  ;;  %v902_v1 = vmul.f32 %v2864_v7, %v2698_v15 }
  0xa8   : > { %v1058_v50 = vunpack.c.l.b16 %v946_v36  ;;  %v755_v57 = vsub.f32 1.5, %v754_v49  ;;  %v948_v14 = vpack.c.bf16 %v900_v2, %v900_v2  ;;  %v949_v54 = vpack.c.bf16 %v901_v17, %v901_v17 }
  0xa9   : > { %v767_v4 = vsub.f32 1.5, %v766_v16  ;;  %v913_v56 = vmul.f32 %v2898_v27, %v2768_v6  ;;  %v1049_v63 = vunpack.c.l.b16 %v937_v46  ;;  %v1050_v32 = vunpack.c.l.b16 %v938_v8 }
  0xaa   : > { %v1092_v58 = vpack.c.b16 %v1058_v50, %v1057_v43  ;;  %v756_v20 = vmul.f32 %v2217_v53, %v755_v57  ;;  %v950_v24 = vpack.c.bf16 %v902_v1, %v902_v1  ;;  %v914_v15 = vmul.f32 %v2904_v61, %v2771_v12 }
  0xab   : > { %v768_v60 = vmul.f32 %v2219_v23, %v767_v4  ;;  %v1061_v23 = vunpack.c.l.b16 %v949_v54  ;;  %v961_v39 = vpack.c.bf16 %v913_v56, %v913_v56  ;;  %v1088_v33 = vpack.c.b16 %v1050_v32, %v1049_v63 }
  0xac   : > { %1248 = vmatmul.bf16.gmra.mxu2 %v1092_v58  ;;  %v757_v34 = vmul.f32 %v756_v20, %v2873_v48  ;;  %v1062_v36 = vunpack.c.l.b16 %v950_v24  ;;  %v962_v16 = vpack.c.bf16 %v914_v15, %v914_v15  ;;  %v1059_v59 = vunpack.c.l.b16 %v947_v0 }
  0xad   : > { %v769_v53 = vmul.f32 %v768_v60, %v2879_v22  ;;  %1223 = vmatmul.bf16.gmra.mxu1 %v1087_v44  ;;  %v1060_v58 = vunpack.c.l.b16 %v948_v14  ;;  %v911_v60 = vmul.f32 %v2631_v25, %v2485_v35  ;;  %v912_v46 = vmul.f32 %v2652_v31, %v2491_v37 }
  0xae   : > { %v759_v51 = vsel %vm758_vm12, %v2873_v48, %v757_v34  ;;  %v1094_v48 = vpack.c.b16 %v1062_v36, %v1061_v23  ;;  %v2949_v4 = vunpack.c.l.b16 %v962_v16  ;;  %v879_v0 = vmul.f32 %v2631_v25, %v2469_v29  ;;  %v3250_v23 = vld [vmem:[#allocation12_spill] sm:$0xff]  ;;  %v3255_v16 = vld [vmem:[#allocation5_spill] sm:$0xff] }
  0xaf   : > { %v762_v21 = vsel %vm760_vm13, %v761_v52, %v759_v51  ;;  %v771_v6 = vsel %vm770_vm14, %v2879_v22, %v769_v53  ;;  %v2947_v52 = vunpack.c.l.b16 %v961_v39  ;;  %v1093_v17 = vpack.c.b16 %v1060_v58, %v1059_v59  ;;  %v3251_v39 = vld [vmem:[#allocation13_spill] sm:$0xff]  ;;  %v3257_v59 = vld [vmem:[#allocation11_spill] sm:$0xff] }
  0xb0   : > { %v774_v43 = vsel %vm772_vm15, %v773_v11, %v771_v6  ;;  %v909_v49 = vmul.f32 %v762_v21, %v2836_v41  ;;  %v877_v13 = vmul.f32 %v762_v21, %v2822_v5  ;;  %v880_v8 = vmul.f32 %v2652_v31, %v2472_v30  ;;  %v3253_v6 = vld [vmem:[#allocation15_spill] sm:$0xff] }
  0xb1   : > { %v910_v12 = vmul.f32 %v774_v43, %v2839_v18  ;;  %v878_v50 = vmul.f32 %v774_v43, %v2826_v47  ;;  %v1100_v5 = vpack.c.b16 %v2949_v4, %v2947_v52  ;;  %v959_v1 = vpack.c.bf16 %v911_v60, %v911_v60 }
  0xb2   : > { %v957_v57 = vpack.c.bf16 %v909_v49, %v909_v49  ;;  %v925_v2 = vpack.c.bf16 %v877_v13, %v877_v13  ;;  %v960_v34 = vpack.c.bf16 %v912_v46, %v912_v46  ;;  %v927_v14 = vpack.c.bf16 %v879_v0, %v879_v0  ;;  %v3254_v49 = vld [vmem:[#allocation4_spill] sm:$0xff]  ;;  %v3259_v0 = vld [vmem:[#allocation7_spill] sm:$0xff] }
  0xb3   : > { %v958_v10 = vpack.c.bf16 %v910_v12, %v910_v12  ;;  %v926_v22 = vpack.c.bf16 %v878_v50, %v878_v50  ;;  %v928_v54 = vpack.c.bf16 %v880_v8, %v880_v8  ;;  %v891_v35 = vmul.f32 %v2712_v42, %v2544_v45  ;;  %v3252_v42 = vld [vmem:[#allocation14_spill] sm:$0xff] }
  0xb4   : > { %v1069_v11 = vunpack.c.l.b16 %v957_v57  ;;  %v1037_v41 = vunpack.c.l.b16 %v925_v2  ;;  %v892_v56 = vmul.f32 %v2736_v28, %v2547_v55  ;;  %v1071_v37 = vunpack.c.l.b16 %v959_v1  ;;  %v3256_v57 = vld [vmem:[#allocation10_spill] sm:$0xff]  ;;  %v3260_v1 = vld [vmem:[#allocation8_spill] sm:$0xff] }
  0xb5   : > { %v1070_v20 = vunpack.c.l.b16 %v958_v10  ;;  %v1038_v18 = vunpack.c.l.b16 %v926_v22  ;;  %v1072_v53 = vunpack.c.l.b16 %v960_v34  ;;  %v1039_v63 = vunpack.c.l.b16 %v927_v14  ;;  %v3261_v14 = vld [vmem:[#allocation9_spill] sm:$0xff] }
  0xb6   : > { %v1040_v32 = vunpack.c.l.b16 %v928_v54  ;;  %v939_v29 = vpack.c.bf16 %v891_v35, %v891_v35  ;;  %v940_v25 = vpack.c.bf16 %v892_v56, %v892_v56  ;;  %v881_v15 = vmul.f32 %v2898_v27, %v3250_v23 }
  0xb7   : > { %v1098_v44 = vpack.c.b16 %v1070_v20, %v1069_v11  ;;  %v1082_v47 = vpack.c.b16 %v1038_v18, %v1037_v41  ;;  %v1099_v24 = vpack.c.b16 %v1072_v53, %v1071_v37  ;;  %v882_v45 = vmul.f32 %v2904_v61, %v3251_v39 }
  0xb8   : > { %v1083_v30 = vpack.c.b16 %v1040_v32, %v1039_v63  ;;  %v1051_v31 = vunpack.c.l.b16 %v939_v29  ;;  %v1052_v51 = vunpack.c.l.b16 %v940_v25  ;;  %v893_v55 = vmul.f32 %v762_v21, %v3252_v42 }
  0xb9   : > { %1278 = vmatmul.bf16.gmra.mxu3 %v1098_v44  ;;  %1198 = vmatmul.bf16.gmra.mxu0 %v1082_v47  ;;  %v903_v13 = vmul.f32 %v2562_v62, %v3254_v49  ;;  %v904_v12 = vmul.f32 %v2571_v9, %v3255_v16  ;;  %v917_v27 = vmul.f32 %v2854_v26, %v3256_v57 }
  0xba   : > { %v1089_v28 = vpack.c.b16 %v1052_v51, %v1051_v31  ;;  %v941_v36 = vpack.c.bf16 %v893_v55, %v893_v55  ;;  %v929_v2 = vpack.c.bf16 %v881_v15, %v881_v15  ;;  %v930_v10 = vpack.c.bf16 %v882_v45, %v882_v45 }
  0xbb   : > { %v918_v21 = vmul.f32 %v2864_v7, %v3257_v59  ;;  %v965_v22 = vpack.c.bf16 %v917_v27, %v917_v27  ;;  %v951_v11 = vpack.c.bf16 %v903_v13, %v903_v13  ;;  %v952_v58 = vpack.c.bf16 %v904_v12, %v904_v12  ;;  %v3258_v7 = vld [vmem:[#allocation6_spill] sm:$0xff] }
  0xbc   : > { %1253 = vmatmul.bf16.gmra.mxu2 %v1093_v17  ;;  %v1053_v61 = vunpack.c.l.b16 %v941_v36  ;;  %v1041_v20 = vunpack.c.l.b16 %v929_v2  ;;  %v1042_v9 = vunpack.c.l.b16 %v930_v10  ;;  %v915_v46 = vmul.f32 %v2599_v38, %v3258_v7 }
  0xbd   : > { %1228 = vmatmul.bf16.gmra.mxu1 %v1088_v33  ;;  %v894_v33 = vmul.f32 %v774_v43, %v3253_v6  ;;  %v1077_v41 = vunpack.c.l.b16 %v965_v22  ;;  %v1063_v47 = vunpack.c.l.b16 %v951_v11  ;;  %v1064_v26 = vunpack.c.l.b16 %v952_v58 }
  0xbe   : > { %v1084_v17 = vpack.c.b16 %v1042_v9, %v1041_v20  ;;  %v916_v8 = vmul.f32 %v2606_v40, %v3259_v0  ;;  %v905_v34 = vmul.f32 %v2795_v19, %v3260_v1  ;;  %v906_v54 = vmul.f32 %v2803_v3, %v3261_v14 }
  0xbf   : > { %v942_v50 = vpack.c.bf16 %v894_v33, %v894_v33  ;;  %v1095_v60 = vpack.c.b16 %v1064_v26, %v1063_v47  ;;  %v963_v35 = vpack.c.bf16 %v915_v46, %v915_v46 }
  0xc0   : > { %v964_v56 = vpack.c.bf16 %v916_v8, %v916_v8  ;;  %v953_v4 = vpack.c.bf16 %v905_v34, %v905_v34 }
  0xc1   : > { %v1054_v43 = vunpack.c.l.b16 %v942_v50  ;;  %v1075_v37 = vunpack.c.l.b16 %v963_v35 }
  0xc2   : > { %v1076_v38 = vunpack.c.l.b16 %v964_v56  ;;  %v1065_v53 = vunpack.c.l.b16 %v953_v4 }
  0xc3   : > { %v1090_v62 = vpack.c.b16 %v1054_v43, %v1053_v61 }
  0xc4   : > { %v1101_v40 = vpack.c.b16 %v1076_v38, %v1075_v37 }
  0xc9   : > { %1283 = vmatmul.bf16.gmra.mxu3 %v1099_v24  ;;  %1203 = vmatmul.bf16.gmra.mxu0 %v1083_v30 }
  0xcc   : > { %1258 = vmatmul.bf16.gmra.mxu2 %v1094_v48  ;;  %v966_v48 = vpack.c.bf16 %v918_v21, %v918_v21 }
  0xcd   : > { %1233 = vmatmul.bf16.gmra.mxu1 %v1089_v28 }
  0xce   : > { %v1078_v18 = vunpack.c.l.b16 %v966_v48 }
  0xd0   : > { %v1102_v44 = vpack.c.b16 %v1078_v18, %v1077_v41 }
  0xd9   : > { %1288 = vmatmul.bf16.gmra.mxu3 %v1100_v5  ;;  %1208 = vmatmul.bf16.gmra.mxu0 %v1084_v17  ;;  %v954_v5 = vpack.c.bf16 %v906_v54, %v906_v54 }
  0xdb   : > { %v1066_v63 = vunpack.c.l.b16 %v954_v5 }
  0xdc   : > { %1263 = vmatmul.bf16.gmra.mxu2 %v1095_v60 }
  0xdd   : > { %1238 = vmatmul.bf16.gmra.mxu1 %v1090_v62  ;;  %v1096_v25 = vpack.c.b16 %v1066_v63, %v1065_v53 }
  0xe1   : > { %v1184_v52 = vpop.f32.mrf.mxu0 }
  0xe2   : > { %v1400_v13 = vmul.f32 %v1184_v52, %v1184_v52 }
  0xe5   : > { %v1214_v32 = vpop.f32.mrf.mxu1 }
  0xe6   : > { %v1412_v62 = vmul.f32 %v1214_v32, %v1214_v32 }
  0xe9   : > { %v2990_v29 = vpop.f32.mrf.mxu0  ;;  %1293 = vmatmul.bf16.gmra.mxu3 %v1101_v40 }
  0xea   : > { %v1974_v19 = vpack.c.bf16 %v2990_v29, %v1184_v52 }
  0xec   : > { %1975 = vst [vmem:[%s2994_s5] sm:$0xff] %v1974_v19   ;;  %1268 = vmatmul.bf16.gmra.mxu2 %v1096_v25 }
  0xed   : > { %v1216_v3 = vpop.f32.mrf.mxu1 }
  0xee   : > { %v2004_v24 = vpack.c.bf16 %v1216_v3, %v1214_v32  ;;  %v1413_v60 = vmul.f32 %v1216_v3, %v1216_v3 }
  0xf0   : > { %2119 = vst [vmem:[%s2994_s5 + $0x30] sm:$0xff] %v2004_v24  }
  0xf5   : > { %v2998_v30 = vpop.f32.mrf.mxu2 }
  0xf9   : > { %1298 = vmatmul.bf16.gmra.mxu3 %v1102_v44 }
  0xfd   : > { %v3000_v31 = vpop.f32.mrf.mxu2 }
  0xfe   : > { %v2034_v51 = vpack.c.bf16 %v3000_v31, %v2998_v30 }
 0x100   : > { %2125 = vst [vmem:[%s2994_s5 + $0x60] sm:$0xff] %v2034_v51  }
 0x106   : > { %v1274_v23 = vpop.f32.mrf.mxu3 }
 0x107   : > { %v1436_v54 = vmul.f32 %v1274_v23, %v1274_v23 }
 0x10e   : > { %v3005_v15 = vpop.f32.mrf.mxu3 }
 0x10f   : > { %v2064_v39 = vpack.c.bf16 %v3005_v15, %v1274_v23  ;;  %v3009_v45 = vpop.f32.mrf.mxu0  ;;  %v1437_v25 = vmul.f32 %v3005_v15, %v3005_v15 }
 0x111   : > { %2131 = vst [vmem:[%s2994_s5 + $0x90] sm:$0xff] %v2064_v39  }
 0x117   : > { %v3013_v55 = vpop.f32.mrf.mxu0 }
 0x118   : > { %v1979_v28 = vpack.c.bf16 %v3013_v55, %v3009_v45 }
 0x11a   : > { %v3011_v42 = vpop.f32.mrf.mxu1  ;;  %2114 = vst [vmem:[%s2994_s5 + $0x8] sm:$0xff] %v1979_v28  }
 0x11f   : > { %v1194_v36 = vpop.f32.mrf.mxu0 }
 0x120   : > { %v1404_v1 = vmul.f32 %v1194_v36, %v1194_v36 }
 0x122   : > { %v3018_v6 = vpop.f32.mrf.mxu1 }
 0x123   : > { %v2009_v33 = vpack.c.bf16 %v3018_v6, %v3011_v42 }
 0x125   : > { %2120 = vst [vmem:[%s2994_s5 + $0x38] sm:$0xff] %v2009_v33  }
 0x127   : > { %v1196_v50 = vpop.f32.mrf.mxu0 }
 0x128   : > { %v1984_v27 = vpack.c.bf16 %v1196_v50, %v1194_v36  ;;  %v1405_v38 = vmul.f32 %v1196_v50, %v1196_v50 }
 0x12a   : > { %v1224_v49 = vpop.f32.mrf.mxu1  ;;  %2115 = vst [vmem:[%s2994_s5 + $0x10] sm:$0xff] %v1984_v27  }
 0x12b   : > { %v1416_v16 = vmul.f32 %v1224_v49, %v1224_v49 }
 0x12d   : > { %v3023_v12 = vadd.f32 %v1416_v16, %v1400_v13 }
 0x12f   : > { %v3025_v57 = vpop.f32.mrf.mxu2 }
 0x132   : > { %v3028_v2 = vpop.f32.mrf.mxu1 }
 0x133   : > { %v2014_v10 = vpack.c.bf16 %v3028_v2, %v1224_v49 }
 0x135   : > { %2121 = vst [vmem:[%s2994_s5 + $0x40] sm:$0xff] %v2014_v10  }
 0x136   : > { %v1199_v61 = vpop.f32.mrf.mxu0 }
 0x137   : > { %v3032_v59 = vpop.f32.mrf.mxu2  ;;  %v1406_v28 = vmul.f32 %v1199_v61, %v1199_v61 }
 0x138   : > { %v2039_v21 = vpack.c.bf16 %v3032_v59, %v3025_v57 }
 0x13a   : > { %2126 = vst [vmem:[%s2994_s5 + $0x68] sm:$0xff] %v2039_v21   ;;  %v3037_v43 = vpop.f32.mrf.mxu1  ;;  %v1417_v21 = vmul.f32 %v3028_v2, %v3028_v2 }
 0x13c   : > { %v1279_v22 = vpop.f32.mrf.mxu3 }
 0x13d   : > { %v1438_v15 = vmul.f32 %v1279_v22, %v1279_v22 }
 0x13e   : > { %v3039_v48 = vpop.f32.mrf.mxu0 }
 0x13f   : > { %v1254_v11 = vpop.f32.mrf.mxu2  ;;  %v1989_v58 = vpack.c.bf16 %v3039_v48, %v1199_v61 }
 0x140   : > { %v1428_v41 = vmul.f32 %v1254_v11, %v1254_v11 }
 0x141   : > { %2116 = vst [vmem:[%s2994_s5 + $0x18] sm:$0xff] %v1989_v58  }
 0x142   : > { %v3043_v20 = vadd.f32 %v1428_v41, %v1412_v62  ;;  %v3045_v9 = vpop.f32.mrf.mxu1 }
 0x143   : > { %v2019_v44 = vpack.c.bf16 %v3045_v9, %v3037_v43 }
 0x144   : > { %v3047_v18 = vpop.f32.mrf.mxu3 }
 0x145   : > { %v2069_v47 = vpack.c.bf16 %v3047_v18, %v1279_v22  ;;  %2122 = vst [vmem:[%s2994_s5 + $0x48] sm:$0xff] %v2019_v44   ;;  %v1401_v22 = vmul.f32 %v2990_v29, %v2990_v29  ;;  %v1402_v29 = vmul.f32 %v3009_v45, %v3009_v45 }
 0x146   : > { %v3053_v26 = vpop.f32.mrf.mxu0 }
 0x147   : > { %2132 = vst [vmem:[%s2994_s5 + $0x98] sm:$0xff] %v2069_v47   ;;  %v1256_v17 = vpop.f32.mrf.mxu2  ;;  %v1450_v44 = vadd.f32 %v1417_v21, %v1401_v22 }
 0x148   : > { %v2044_v7 = vpack.c.bf16 %v1256_v17, %v1254_v11  ;;  %v1429_v46 = vmul.f32 %v1256_v17, %v1256_v17 }
 0x14a   : > { %2127 = vst [vmem:[%s2994_s5 + $0x70] sm:$0xff] %v2044_v7   ;;  %v3057_v0 = vadd.f32 %v1429_v46, %v1413_v60  ;;  %v1234_v8 = vpop.f32.mrf.mxu1  ;;  %v1418_v7 = vmul.f32 %v3037_v43, %v3037_v43 }
 0x14b   : > { %v1420_v14 = vmul.f32 %v1234_v8, %v1234_v8 }
 0x14c   : > { %v3059_v34 = vpop.f32.mrf.mxu3 }
 0x14d   : > { %v1456_v35 = vadd.f32 %v1420_v14, %v1404_v1  ;;  %v1452_v14 = vadd.f32 %v1418_v7, %v1402_v29 }
 0x14e   : > { %v3061_v56 = vpop.f32.mrf.mxu0 }
 0x14f   : > { %v3063_v52 = vpop.f32.mrf.mxu2  ;;  %v1994_v4 = vpack.c.bf16 %v3061_v56, %v3053_v26  ;;  %v3067_v5 = vadd.f32 %v1456_v35, %v1436_v54 }
 0x151   : > { %2117 = vst [vmem:[%s2994_s5 + $0x20] sm:$0xff] %v1994_v4   ;;  %v1419_v4 = vmul.f32 %v3045_v9, %v3045_v9  ;;  %v1408_v9 = vmul.f32 %v3053_v26, %v3053_v26 }
 0x152   : > { %v1236_v37 = vpop.f32.mrf.mxu1 }
 0x153   : > { %v2024_v63 = vpack.c.bf16 %v1236_v37, %v1234_v8  ;;  %v1421_v40 = vmul.f32 %v1236_v37, %v1236_v37 }
 0x154   : > { %v3070_v53 = vpop.f32.mrf.mxu3 }
 0x155   : > { %v2074_v32 = vpack.c.bf16 %v3070_v53, %v3059_v34  ;;  %2123 = vst [vmem:[%s2994_s5 + $0x50] sm:$0xff] %v2024_v63   ;;  %v1458_v19 = vadd.f32 %v1421_v40, %v1405_v38  ;;  %v1403_v63 = vmul.f32 %v3013_v55, %v3013_v55  ;;  %v1409_v55 = vmul.f32 %v3061_v56, %v3061_v56 }
 0x156   : > { %v3077_v3 = vpop.f32.mrf.mxu0  ;;  %v1440_v56 = vmul.f32 %v3059_v34, %v3059_v34 }
 0x157   : > { %2133 = vst [vmem:[%s2994_s5 + $0xa0] sm:$0xff] %v2074_v32   ;;  %v3080_v24 = vpop.f32.mrf.mxu2  ;;  %v1459_v23 = vadd.f32 %v1458_v19, %v1437_v25  ;;  %v1454_v40 = vadd.f32 %v1419_v4, %v1403_v63  ;;  %v1410_v26 = vmul.f32 %v3077_v3, %v3077_v3 }
 0x158   : > { %v2049_v51 = vpack.c.bf16 %v3080_v24, %v3063_v52 }
 0x15a   : > { %2128 = vst [vmem:[%s2994_s5 + $0x78] sm:$0xff] %v2049_v51   ;;  %v1239_v39 = vpop.f32.mrf.mxu1  ;;  %v1407_v51 = vmul.f32 %v3039_v48, %v3039_v48  ;;  %v1439_v48 = vmul.f32 %v3047_v18, %v3047_v18  ;;  %v1441_v18 = vmul.f32 %v3070_v53, %v3070_v53  ;;  %v1430_v53 = vmul.f32 %v3063_v52, %v3063_v52 }
 0x15b   : > { %v1422_v36 = vmul.f32 %v1239_v39, %v1239_v39 }
 0x15c   : > { %v3085_v33 = vpop.f32.mrf.mxu3 }
 0x15d   : > { %v1460_v49 = vadd.f32 %v1422_v36, %v1406_v28  ;;  %v1424_v36 = vmul.f32 %v2998_v30, %v2998_v30  ;;  %v1426_v30 = vmul.f32 %v3025_v57, %v3025_v57  ;;  %v1442_v57 = vmul.f32 %v3085_v33, %v3085_v33 }
 0x15e   : > { %v1211_v13 = vpop.f32.mrf.mxu0 }
 0x15f   : > { %v1264_v16 = vpop.f32.mrf.mxu2  ;;  %v1999_v50 = vpack.c.bf16 %v1211_v13, %v3077_v3  ;;  %v1461_v27 = vadd.f32 %v1460_v49, %v1438_v15  ;;  %v1468_v3 = vadd.f32 %v1426_v30, %v1410_v26 }
 0x160   : > { %v1432_v62 = vmul.f32 %v1264_v16, %v1264_v16 }
 0x161   : > { %2118 = vst [vmem:[%s2994_s5 + $0x28] sm:$0xff] %v1999_v50   ;;  %v1464_v50 = vadd.f32 %v1424_v36, %v1408_v9  ;;  %v1563_v36 = vld [vmem:[%s2994_s5 + $0x40] sm:$0xff] (%p2300_p5)   ;;  %v1591_v26 = vld [vmem:[%s2994_s5 + $0x78] sm:$0xff] (%p2300_p5)  }
 0x162   : > { %v1241_v10 = vpop.f32.mrf.mxu1  ;;  %v1449_v60 = vadd.f32 %v3023_v12, %v1432_v62  ;;  %1564 = vst [vmem:[%s3162_s13 + $0x80] sm:$0xff] (%p2300_p5), %v1563_v36  }
 0x163   : > { %v2029_v61 = vpack.c.bf16 %v1241_v10, %v1239_v39  ;;  %v1423_v45 = vmul.f32 %v1241_v10, %v1241_v10  ;;  %v1465_v22 = vadd.f32 %v1464_v50, %v1440_v56  ;;  %v1587_v50 = vld [vmem:[%s2994_s5 + $0x70] sm:$0xff] (%p2300_p5)   ;;  %1592 = vst [vmem:[%s3162_s13 + $0xb8] sm:$0xff] (%p2300_p5), %v1591_v26  }
 0x164   : > { %v3091_v11 = vpop.f32.mrf.mxu3  ;;  %1588 = vst [vmem:[%s3162_s13 + $0xb0] sm:$0xff] (%p2300_p5), %v1587_v50   ;;  %v1603_v56 = vld [vmem:[%s2994_s5 + $0x90] sm:$0xff] (%p2300_p5)  }
 0x165   : > { %v2079_v58 = vpack.c.bf16 %v3091_v11, %v3085_v33  ;;  %2124 = vst [vmem:[%s2994_s5 + $0x58] sm:$0xff] %v2029_v61   ;;  %v1462_v15 = vadd.f32 %v1423_v45, %v1407_v51  ;;  %v1431_v33 = vmul.f32 %v3080_v24, %v3080_v24  ;;  %v1539_v45 = vld [vmem:[%s2994_s5 + $0x10] sm:$0xff] (%p2300_p5)   ;;  %v1547_v51 = vld [vmem:[%s2994_s5 + $0x20] sm:$0xff] (%p2300_p5)  }
 0x166   : > { %1540 = vst [vmem:[%s3162_s13 + $0x10] sm:$0xff] (%p2300_p5), %v1539_v45  }
 0x167   : > { %2134 = vst [vmem:[%s2994_s5 + $0xa8] sm:$0xff] %v2079_v58   ;;  %v1266_v41 = vpop.f32.mrf.mxu2  ;;  %v1463_v61 = vadd.f32 %v1462_v15, %v1439_v48  ;;  %v1571_v15 = vld [vmem:[%s2994_s5 + $0x50] sm:$0xff] (%p2300_p5)   ;;  %v1583_v48 = vld [vmem:[%s2994_s5 + $0x68] sm:$0xff] (%p2300_p5)  }
 0x168   : > { %v2054_v47 = vpack.c.bf16 %v1266_v41, %v1264_v16  ;;  %v1433_v17 = vmul.f32 %v1266_v41, %v1266_v41  ;;  %v1425_v16 = vmul.f32 %v3000_v31, %v3000_v31  ;;  %v1427_v31 = vmul.f32 %v3032_v59, %v3032_v59  ;;  %v1551_v9 = vld [vmem:[%s2994_s5 + $0x28] sm:$0xff] (%p2300_p5)   ;;  %1548 = vst [vmem:[%s3162_s13 + $0x20] sm:$0xff] (%p2300_p5), %v1547_v51  }
 0x169   : > { %v1469_v59 = vadd.f32 %v1468_v3, %v1442_v57  ;;  %1552 = vst [vmem:[%s3162_s13 + $0x28] sm:$0xff] (%p2300_p5), %v1551_v9  }
 0x16a   : > { %2129 = vst [vmem:[%s2994_s5 + $0x80] sm:$0xff] %v2054_v47   ;;  %v1451_v2 = vadd.f32 %v1450_v44, %v1433_v17  ;;  %v1466_v21 = vadd.f32 %v1425_v16, %v1409_v55  ;;  %v1567_v55 = vld [vmem:[%s2994_s5 + $0x48] sm:$0xff] (%p2300_p5)   ;;  %v1579_v16 = vld [vmem:[%s2994_s5 + $0x60] sm:$0xff] (%p2300_p5)  }
 0x16b   : > { %1568 = vst [vmem:[%s3162_s13 + $0x88] sm:$0xff] (%p2300_p5), %v1567_v55  }
 0x16c   : > { %v1294_v46 = vpop.f32.mrf.mxu3  ;;  %v1480_v8 = vadd.f32 %v1451_v2, %v1449_v60  ;;  %v1467_v34 = vadd.f32 %v1466_v21, %v1441_v18  ;;  %1572 = vst [vmem:[%s3162_s13 + $0x90] sm:$0xff] (%p2300_p5), %v1571_v15   ;;  %v1607_v21 = vld [vmem:[%s2994_s5 + $0x98] sm:$0xff] (%p2300_p5)  }
 0x16d   : > { %1580 = vst [vmem:[%s3162_s13 + $0xa0] sm:$0xff] (%p2300_p5), %v1579_v16  }
 0x16e   : > { %1584 = vst [vmem:[%s3162_s13 + $0xa8] sm:$0xff] (%p2300_p5), %v1583_v48  }
 0x16f   : > { %v1269_v1 = vpop.f32.mrf.mxu2  ;;  %1604 = vst [vmem:[%s3162_s13 + $0x110] sm:$0xff] (%p2300_p5), %v1603_v56  }
 0x170   : > { %v1434_v54 = vmul.f32 %v1269_v1, %v1269_v1  ;;  %1608 = vst [vmem:[%s3162_s13 + $0x118] sm:$0xff] (%p2300_p5), %v1607_v21  }
 0x172   : > { %v1453_v35 = vadd.f32 %v1452_v14, %v1434_v54 }
 0x174   : > { %v1296_v12 = vpop.f32.mrf.mxu3  ;;  %v1481_v37 = vadd.f32 %v1480_v8, %v1453_v35  ;;  %v1414_v8 = vmul.f32 %v3011_v42, %v3011_v42 }
 0x175   : > { %v2084_v38 = vpack.c.bf16 %v1296_v12, %v1294_v46  ;;  %v1445_v60 = vmul.f32 %v1296_v12, %v1296_v12 }
 0x176   : > { %v1476_v14 = vadd.f32 %v1430_v53, %v1414_v8 }
 0x177   : > { %2135 = vst [vmem:[%s2994_s5 + $0xb0] sm:$0xff] %v2084_v38   ;;  %v1271_v43 = vpop.f32.mrf.mxu2  ;;  %v1475_v52 = vadd.f32 %v3057_v0, %v1445_v60  ;;  %v1531_v0 = vld [vmem:[%s2994_s5] sm:$0xff] (%p2300_p5)  }
 0x178   : > { %v2059_v32 = vpack.c.bf16 %v1271_v43, %v1269_v1  ;;  %v1435_v25 = vmul.f32 %v1271_v43, %v1271_v43  ;;  %1532 = vst [vmem:[%s3162_s13] sm:$0xff] (%p2300_p5), %v1531_v0  }
 0x17a   : > { %2130 = vst [vmem:[%s2994_s5 + $0x88] sm:$0xff] %v2059_v32   ;;  %v1455_v19 = vadd.f32 %v1454_v40, %v1435_v25  ;;  %v1535_v25 = vld [vmem:[%s2994_s5 + $0x8] sm:$0xff] (%p2300_p5)  }
 0x17b   : > { %1536 = vst [vmem:[%s3162_s13 + $0x8] sm:$0xff] (%p2300_p5), %v1535_v25  }
 0x17c   : > { %v1299_v39 = vpop.f32.mrf.mxu3  ;;  %v1482_v28 = vadd.f32 %v1481_v37, %v1455_v19  ;;  %v1543_v19 = vld [vmem:[%s2994_s5 + $0x18] sm:$0xff] (%p2300_p5)  }
 0x17d   : > { %v1446_v1 = vmul.f32 %v1299_v39, %v1299_v39  ;;  %1544 = vst [vmem:[%s3162_s13 + $0x18] sm:$0xff] (%p2300_p5), %v1543_v19  }
 0x17e   : > { %v1483_v49 = vadd.f32 %v1482_v28, %v3067_v5  ;;  %v1411_v5 = vmul.f32 %v1211_v13, %v1211_v13  ;;  %v1443_v13 = vmul.f32 %v3091_v11, %v3091_v11  ;;  %v1559_v28 = vld [vmem:[%s2994_s5 + $0x38] sm:$0xff] (%p2300_p5)  }
 0x17f   : > { %v1477_v12 = vadd.f32 %v1476_v14, %v1446_v1  ;;  %1560 = vst [vmem:[%s3162_s13 + $0x38] sm:$0xff] (%p2300_p5), %v1559_v28  }
 0x180   : > { %v1484_v10 = vadd.f32 %v1483_v49, %v1459_v23  ;;  %v1470_v44 = vadd.f32 %v1427_v31, %v1411_v5  ;;  %v1575_v49 = vld [vmem:[%s2994_s5 + $0x58] sm:$0xff] (%p2300_p5)   ;;  %v1611_v5 = vld [vmem:[%s2994_s5 + $0xa0] sm:$0xff] (%p2300_p5)  }
 0x181   : > { %1576 = vst [vmem:[%s3162_s13 + $0x98] sm:$0xff] (%p2300_p5), %v1575_v49   ;;  %v1599_v30 = vld [vmem:[%s2994_s5 + $0x88] sm:$0xff] (%p2300_p5)  }
 0x182   : > { %v1485_v58 = vadd.f32 %v1484_v10, %v1461_v27  ;;  %v1444_v27 = vmul.f32 %v1294_v46, %v1294_v46  ;;  %v1471_v2 = vadd.f32 %v1470_v44, %v1443_v13  ;;  %v1415_v46 = vmul.f32 %v3018_v6, %v3018_v6  ;;  %v1595_v10 = vld [vmem:[%s2994_s5 + $0x80] sm:$0xff] (%p2300_p5)   ;;  %1600 = vst [vmem:[%s3162_s13 + $0x108] sm:$0xff] (%p2300_p5), %v1599_v30  }
 0x183   : > { %1596 = vst [vmem:[%s3162_s13 + $0x100] sm:$0xff] (%p2300_p5), %v1595_v10  }
 0x184   : > { %v1486_v23 = vadd.f32 %v1485_v58, %v1463_v61  ;;  %v1301_v62 = vpop.f32.mrf.mxu3  ;;  %v1473_v29 = vadd.f32 %v3043_v20, %v1444_v27  ;;  %v1478_v4 = vadd.f32 %v1431_v33, %v1415_v46  ;;  %v1615_v61 = vld [vmem:[%s2994_s5 + $0xa8] sm:$0xff] (%p2300_p5)   ;;  %v1619_v58 = vld [vmem:[%s2994_s5 + $0xb0] sm:$0xff] (%p2300_p5)   ;;  %1612 = vst [vmem:[%s3162_s13 + $0x120] sm:$0xff] (%p2300_p5), %v1611_v5  }
 0x185   : > { %v2089_v41 = vpack.c.bf16 %v1301_v62, %v1299_v39  ;;  %v1447_v54 = vmul.f32 %v1301_v62, %v1301_v62  ;;  %v1555_v39 = vld [vmem:[%s2994_s5 + $0x30] sm:$0xff] (%p2300_p5)   ;;  %1616 = vst [vmem:[%s3162_s13 + $0x128] sm:$0xff] (%p2300_p5), %v1615_v61  }
 0x186   : > { %v1487_v47 = vadd.f32 %v1486_v23, %v1465_v22  ;;  %1556 = vst [vmem:[%s3162_s13 + $0x30] sm:$0xff] (%p2300_p5), %v1555_v39  }
 0x187   : > { %2136 = vst [vmem:[%s2994_s5 + $0xb8] sm:$0xff] %v2089_v41   ;;  %v1479_v37 = vadd.f32 %v1478_v4, %v1447_v54 }
 0x188   : > { %v1488_v17 = vadd.f32 %v1487_v47, %v1467_v34  ;;  %1620 = vst [vmem:[%s3162_s13 + $0x130] sm:$0xff] (%p2300_p5), %v1619_v58  }
 0x18a   : > { %v1489_v7 = vadd.f32 %v1488_v17, %v1469_v59 }
 0x18c   : > { %v1490_v11 = vadd.f32 %v1489_v7, %v1471_v2 }
 0x18e   : > { %v1491_v35 = vadd.f32 %v1490_v11, %v1473_v29  ;;  %v1623_v31 = vld [vmem:[%s2994_s5 + $0xb8] sm:$0xff] (%p2300_p5)  }
 0x18f   : > { %1624 = vst [vmem:[%s3162_s13 + $0x138] sm:$0xff] (%p2300_p5), %v1623_v31  }
 0x190   : > { %v1492_v42 = vadd.f32 %v1491_v35, %v1475_v52 }
 0x192   : > { %v1493_v38 = vadd.f32 %v1492_v42, %v1477_v12 }
 0x194   : > { %v1494_v24 = vadd.f32 %v1493_v38, %v1479_v37 }
 0x196   : > { %v1495_v63 = vrot.slane %v1494_v24, 4 }
 0x198   : > { %v1496_v20 = vadd.f32 %v1495_v63, %v1494_v24 }
 0x19a   : > { %v1497_v43 = vrot.slane %v1496_v20, 2 }
 0x19c   : > { %v1498_v40 = vadd.f32 %v1497_v43, %v1496_v20 }
 0x19e   : > { %v1499_v32 = vrot.slane %v1498_v40, 1  ;;  %1511 = sbr.rel (!%p2300_p5) target bundleno = 419 (0x1a3), region = 77 }
 0x1a0   : > { %v1500_v6 = vadd.f32 %v1499_v32, %v1498_v40 }
 0x1a2   : > { %1501 = vst [vmem:[%s434_s9] sm:$0x1] %v1500_v6 }
 0x1a3 PF: > { %p12_p11 = scmp.ge.s32.totalorder %s2288_s19, 4   ;;  %s3262_s15 = smov %s2238_s16 }
 0x1a4   : > { %s3263_s16 = smov %s2298_s22  ;;  %s3264_s17 = smov %s2288_s19 }
 0x1a5   :  { %14 = sbr.rel (!%p12_p11) target bundleno = 2 (0x2), region = 161 }

// kernel: _lambda_.5
= control target key start
LH: loop header
LB: loop body
LE: loop exit
PB: predicated region body
PF: predicated region fallthrough
CT: control target
= control target key end

     0   :  { %s1709_s9 = smov 0   ;;  %s1711_s10 = smov 0   ;;  %s3061_s0 = inlined_call_operand.vmem [shape: bf16[3,256,128], index: 0, kind: input, shape index: {}]   ;;  %s3062_s1 = inlined_call_operand.vmem [shape: f32[1,128], index: 1, kind: input, shape index: {}]   ;;  %s3063_s2 = inlined_call_operand.vmem [shape: f32[3,16,128], index: 2, kind: output, shape index: {}]  }
   0x1   :  { %s1713_s11 = smov 0  }
   0x2 LB: > { %s1462_s12 = sadd.s32 4294967295, %s1691_s11   ;;  %s1726_s13 = sadd.s32 1, %s1691_s11   ;;  %s1691_s11 = sphi %s1713_s11, %s3300_s11   ;;  %s1687_s10 = sphi %s1711_s10, %s3299_s10   ;;  %s1683_s9 = sphi %s1709_s9, %s3298_s9  }
   0x3   : > { %s16_s14 = ssub.s32 %s1691_s11, %s1726_s13  ;;  %s19_s15 = sadd.s32 1, %s1687_s10 }
   0x4   : > { %p17_p0 = scmp.eq.s32.totalorder %s16_s14, 0  ;;  %p26_p1 = scmp.ne.s32.totalorder %s1687_s10, %s1683_s9 }
   0x5   : > { %p27_p2 = scmp.eq.s32.totalorder %s1691_s11, 0  ;;  %p77_p3 = scmp.eq.s32.totalorder %s1462_s12, 1 }
   0x6   : > { %s1737_s16 = scalar_select %p17_p0, %s1687_s10, %s19_s15  }
   0x7   : > { %p28_p4 = por %p27_p2, %p26_p1  ;;  %p1739_p5 = por %p77_p3, %p26_p1 }
   0x8   : > { %p1465_p6 = scmp.ge.s32.totalorder %s1691_s11, 2 }
   0xa   : > { %102 = sbr.rel (%p1465_p6) target bundleno = 43 (0x2b), region = 20 }
   0xf   : > { %105 = sbr.rel (!%p28_p4) target bundleno = 43 (0x2b), region = 24  ;;  %s107_s18 = sand.u32 (%p28_p4), 1, %s1687_s10  }
  0x10   : > { %s1488_s19 = sshll.u32 (%p28_p4), %s1691_s11, 6  ;;  %s1608_s20 = smul.u32 (%p28_p4), 192, %s107_s18 }
  0x11   : > { %s1749_s23 = scalar_lea.vmem (%p28_p4), %s3061_s0, %s1488_s19 }
  0x12   : > { %v129_v0 = vld [vmem:[%s1749_s23] sm:$0xff] (%p28_p4)   ;;  %v133_v1 = vld [vmem:[%s1749_s23 + $0x8] sm:$0xff] (%p28_p4)   ;;  %v137_v2 = vld [vmem:[%s1749_s23 + $0x10] sm:$0xff] (%p28_p4)   ;;  %s1754_s24 = scalar_lea.vmem (%p28_p4), [#allocation2], %s1608_s20 }
  0x13   : > { %130 = vst [vmem:[%s1754_s24] sm:$0xff] (%p28_p4), %v129_v0   ;;  %v141_v3 = vld [vmem:[%s1749_s23 + $0x18] sm:$0xff] (%p28_p4)   ;;  %v145_v4 = vld [vmem:[%s1749_s23 + $0x20] sm:$0xff] (%p28_p4)   ;;  %v149_v5 = vld [vmem:[%s1749_s23 + $0x28] sm:$0xff] (%p28_p4)  }
  0x14   : > { %134 = vst [vmem:[%s1754_s24 + $0x8] sm:$0xff] %v133_v1   ;;  %v153_v6 = vld [vmem:[%s1749_s23 + $0x30] sm:$0xff]   ;;  %v157_v7 = vld [vmem:[%s1749_s23 + $0x38] sm:$0xff]   ;;  %v161_v8 = vld [vmem:[%s1749_s23 + $0x80] sm:$0xff]  }
  0x15   : > { %138 = vst [vmem:[%s1754_s24 + $0x10] sm:$0xff] %v137_v2   ;;  %v165_v9 = vld [vmem:[%s1749_s23 + $0x88] sm:$0xff]   ;;  %v169_v10 = vld [vmem:[%s1749_s23 + $0x90] sm:$0xff]   ;;  %v173_v11 = vld [vmem:[%s1749_s23 + $0x98] sm:$0xff]  }
  0x16   : > { %142 = vst [vmem:[%s1754_s24 + $0x18] sm:$0xff] %v141_v3   ;;  %v177_v12 = vld [vmem:[%s1749_s23 + $0xa0] sm:$0xff]   ;;  %v181_v13 = vld [vmem:[%s1749_s23 + $0xa8] sm:$0xff]   ;;  %v185_v14 = vld [vmem:[%s1749_s23 + $0xb0] sm:$0xff]  }
  0x17   : > { %146 = vst [vmem:[%s1754_s24 + $0x20] sm:$0xff] %v145_v4   ;;  %v189_v15 = vld [vmem:[%s1749_s23 + $0xb8] sm:$0xff]   ;;  %v193_v16 = vld [vmem:[%s1749_s23 + $0x100] sm:$0xff]   ;;  %v197_v17 = vld [vmem:[%s1749_s23 + $0x108] sm:$0xff]  }
  0x18   : > { %150 = vst [vmem:[%s1754_s24 + $0x28] sm:$0xff] %v149_v5   ;;  %v201_v18 = vld [vmem:[%s1749_s23 + $0x110] sm:$0xff]   ;;  %v205_v19 = vld [vmem:[%s1749_s23 + $0x118] sm:$0xff]   ;;  %v209_v20 = vld [vmem:[%s1749_s23 + $0x120] sm:$0xff]  }
  0x19   : > { %154 = vst [vmem:[%s1754_s24 + $0x30] sm:$0xff] %v153_v6   ;;  %v213_v21 = vld [vmem:[%s1749_s23 + $0x128] sm:$0xff]   ;;  %v217_v22 = vld [vmem:[%s1749_s23 + $0x130] sm:$0xff]   ;;  %v221_v23 = vld [vmem:[%s1749_s23 + $0x138] sm:$0xff]  }
  0x1a   : > { %158 = vst [vmem:[%s1754_s24 + $0x38] sm:$0xff] %v157_v7  }
  0x1b   : > { %162 = vst [vmem:[%s1754_s24 + $0x40] sm:$0xff] %v161_v8  }
  0x1c   : > { %166 = vst [vmem:[%s1754_s24 + $0x48] sm:$0xff] %v165_v9  }
  0x1d   : > { %170 = vst [vmem:[%s1754_s24 + $0x50] sm:$0xff] %v169_v10  }
  0x1e   : > { %174 = vst [vmem:[%s1754_s24 + $0x58] sm:$0xff] %v173_v11  }
  0x1f   : > { %178 = vst [vmem:[%s1754_s24 + $0x60] sm:$0xff] %v177_v12  }
  0x20   : > { %182 = vst [vmem:[%s1754_s24 + $0x68] sm:$0xff] %v181_v13  }
  0x21   : > { %186 = vst [vmem:[%s1754_s24 + $0x70] sm:$0xff] %v185_v14  }
  0x22   : > { %190 = vst [vmem:[%s1754_s24 + $0x78] sm:$0xff] %v189_v15  }
  0x23   : > { %194 = vst [vmem:[%s1754_s24 + $0x80] sm:$0xff] %v193_v16  }
  0x24   : > { %198 = vst [vmem:[%s1754_s24 + $0x88] sm:$0xff] %v197_v17  }
  0x25   : > { %202 = vst [vmem:[%s1754_s24 + $0x90] sm:$0xff] %v201_v18  }
  0x26   : > { %206 = vst [vmem:[%s1754_s24 + $0x98] sm:$0xff] %v205_v19  }
  0x27   : > { %210 = vst [vmem:[%s1754_s24 + $0xa0] sm:$0xff] %v209_v20  }
  0x28   : > { %214 = vst [vmem:[%s1754_s24 + $0xa8] sm:$0xff] %v213_v21  }
  0x29   : > { %218 = vst [vmem:[%s1754_s24 + $0xb0] sm:$0xff] %v217_v22  }
  0x2a   : > { %222 = vst [vmem:[%s1754_s24 + $0xb8] sm:$0xff] %v221_v23  }
  0x2b PF: > { %p1468_p7 = scmp.ge.s32.totalorder %s1691_s11, 1  ;;  %p343_p8 = scmp.lt.s32.totalorder %s1691_s11, 3 }
  0x2d   : > { %p344_p9 = pnand %p1468_p7, %p343_p8 }
  0x2f   : > { %347 = sbr.rel (%p344_p9) target bundleno = 312 (0x138), region = 65 }
  0x34   : > { %s350_s25 = sand.u32 1, %s1683_s9   ;;  %v1912_v17 = vld [vmem:[%s3062_s1] ss:$0 sm:$0xff]  ;;  %s1485_s4 = sshll.u32 (%p1739_p5), %s1462_s12, 3 }
  0x35   : > { %s1609_s26 = smul.u32 192, %s350_s25  ;;  %s1364_s7 = scalar_lea.vmem (%p1739_p5), %s3063_s2, %s1485_s4 }
  0x36   : > { %s1610_s30 = smul.u32 24, %s350_s25 }
  0x37   : > { %s1806_s27 = scalar_lea.vmem [#allocation2], %s1609_s26 }
  0x38   : > { %v1809_v24 = vld [vmem:[%s1806_s27] sm:$0xff]   ;;  %v1812_v25 = vld [vmem:[%s1806_s27 + $0x8] sm:$0xff]   ;;  %v1815_v26 = vld [vmem:[%s1806_s27 + $0x10] sm:$0xff]   ;;  %s369_s3 = scalar_lea.vmem [#allocation3], %s1610_s30 }
  0x39   : > { %v1818_v27 = vld [vmem:[%s1806_s27 + $0x18] sm:$0xff]   ;;  %v1821_v28 = vld [vmem:[%s1806_s27 + $0x20] sm:$0xff]   ;;  %v1491_v29 = vunpack.c.l.bf16 %v1809_v24  ;;  %v1492_v30 = vunpack.c.h.bf16 %v1809_v24  ;;  %v1826_v31 = vld [vmem:[%s1806_s27 + $0x28] sm:$0xff]   ;;  %v1495_v33 = vunpack.c.l.bf16 %v1812_v25  ;;  %v1496_v34 = vunpack.c.h.bf16 %v1812_v25 }
  0x3a   : > { %v1829_v32 = vld [vmem:[%s1806_s27 + $0x30] sm:$0xff]   ;;  %v1499_v35 = vunpack.c.l.bf16 %v1815_v26  ;;  %v1500_v36 = vunpack.c.h.bf16 %v1815_v26  ;;  %v1836_v37 = vld [vmem:[%s1806_s27 + $0x38] sm:$0xff]   ;;  %v1839_v38 = vld [vmem:[%s1806_s27 + $0x40] sm:$0xff]   ;;  %v1503_v39 = vunpack.c.l.bf16 %v1818_v27  ;;  %v1504_v40 = vunpack.c.h.bf16 %v1818_v27 }
  0x3b   : > { %v1507_v41 = vunpack.c.l.bf16 %v1821_v28  ;;  %v1508_v42 = vunpack.c.h.bf16 %v1821_v28  ;;  %v1846_v43 = vld [vmem:[%s1806_s27 + $0x48] sm:$0xff]   ;;  %v1849_v44 = vld [vmem:[%s1806_s27 + $0x50] sm:$0xff]   ;;  %v1511_v45 = vunpack.c.l.bf16 %v1826_v31  ;;  %v1512_v46 = vunpack.c.h.bf16 %v1826_v31  ;;  %v1856_v49 = vld [vmem:[%s1806_s27 + $0x58] sm:$0xff]  }
  0x3c   : > { %v1515_v47 = vunpack.c.l.bf16 %v1829_v32  ;;  %v1516_v48 = vunpack.c.h.bf16 %v1829_v32  ;;  %v1859_v50 = vld [vmem:[%s1806_s27 + $0x60] sm:$0xff]   ;;  %v1519_v51 = vunpack.c.l.bf16 %v1836_v37  ;;  %v1520_v52 = vunpack.c.h.bf16 %v1836_v37  ;;  %v1866_v55 = vld [vmem:[%s1806_s27 + $0x68] sm:$0xff]   ;;  %v1869_v56 = vld [vmem:[%s1806_s27 + $0x70] sm:$0xff]  }
  0x3d   : > { %v1523_v53 = vunpack.c.l.bf16 %v1839_v38  ;;  %v1524_v54 = vunpack.c.h.bf16 %v1839_v38  ;;  %v1527_v57 = vunpack.c.l.bf16 %v1846_v43  ;;  %v1528_v58 = vunpack.c.h.bf16 %v1846_v43  ;;  %v1876_v61 = vld [vmem:[%s1806_s27 + $0x78] sm:$0xff]   ;;  %v1879_v62 = vld [vmem:[%s1806_s27 + $0x80] sm:$0xff]   ;;  %v1886_v3 = vld [vmem:[%s1806_s27 + $0x88] sm:$0xff]  }
  0x3e   : > { %v1531_v59 = vunpack.c.l.bf16 %v1849_v44  ;;  %v1532_v60 = vunpack.c.h.bf16 %v1849_v44  ;;  %v1535_v63 = vunpack.c.l.bf16 %v1856_v49  ;;  %v1536_v0 = vunpack.c.h.bf16 %v1856_v49  ;;  %v1889_v4 = vld [vmem:[%s1806_s27 + $0x90] sm:$0xff]   ;;  %v1896_v9 = vld [vmem:[%s1806_s27 + $0x98] sm:$0xff]   ;;  %v1899_v10 = vld [vmem:[%s1806_s27 + $0xa0] sm:$0xff]  }
  0x3f   : > { %v1539_v1 = vunpack.c.l.bf16 %v1859_v50  ;;  %v1540_v2 = vunpack.c.h.bf16 %v1859_v50  ;;  %v1543_v5 = vunpack.c.l.bf16 %v1866_v55  ;;  %v1544_v6 = vunpack.c.h.bf16 %v1866_v55  ;;  %v1605_v15 = vld [vmem:[%s1806_s27 + $0xa8] sm:$0xff]   ;;  %v1907_v16 = vld [vmem:[%s1806_s27 + $0xb0] sm:$0xff]   ;;  %v1607_v22 = vld [vmem:[%s1806_s27 + $0xb8] sm:$0xff]  }
  0x40   : > { %v1547_v7 = vunpack.c.l.bf16 %v1869_v56  ;;  %v1548_v8 = vunpack.c.h.bf16 %v1869_v56  ;;  %v1551_v11 = vunpack.c.l.bf16 %v1876_v61  ;;  %v1552_v12 = vunpack.c.h.bf16 %v1876_v61 }
  0x41   : > { %v1555_v13 = vunpack.c.l.bf16 %v1879_v62  ;;  %v1556_v14 = vunpack.c.h.bf16 %v1879_v62  ;;  %v1559_v18 = vunpack.c.l.bf16 %v1886_v3  ;;  %v1560_v19 = vunpack.c.h.bf16 %v1886_v3 }
  0x42   : > { %v1563_v20 = vunpack.c.l.bf16 %v1889_v4  ;;  %v1564_v21 = vunpack.c.h.bf16 %v1889_v4  ;;  %v1567_v23 = vunpack.c.l.bf16 %v1896_v9  ;;  %v1568_v31 = vunpack.c.h.bf16 %v1896_v9 }
  0x43   : > { %v1571_v32 = vunpack.c.l.bf16 %v1899_v10  ;;  %v1572_v37 = vunpack.c.h.bf16 %v1899_v10  ;;  %v1575_v38 = vunpack.c.l.bf16 %v1605_v15  ;;  %v1576_v43 = vunpack.c.h.bf16 %v1605_v15 }
  0x44   : > { %v1579_v44 = vunpack.c.l.bf16 %v1907_v16  ;;  %v1580_v49 = vunpack.c.h.bf16 %v1907_v16  ;;  %v1583_v50 = vunpack.c.l.bf16 %v1607_v22  ;;  %v1584_v55 = vunpack.c.h.bf16 %v1607_v22 }
  0x45   : > { %v1928_v56 = vmul.f32 %v1912_v17, %v1491_v29  ;;  %v1933_v61 = vmul.f32 %v1912_v17, %v1492_v30  ;;  %v1938_v62 = vmul.f32 %v1912_v17, %v1495_v33  ;;  %v1943_v3 = vmul.f32 %v1912_v17, %v1496_v34 }
  0x46   : > { %v1948_v29 = vmul.f32 %v1912_v17, %v1499_v35  ;;  %v1953_v24 = vmul.f32 %v1912_v17, %v1500_v36  ;;  %v1958_v30 = vmul.f32 %v1912_v17, %v1503_v39  ;;  %v1963_v25 = vmul.f32 %v1912_v17, %v1504_v40 }
  0x47   : > { %v1968_v33 = vmul.f32 %v1912_v17, %v1507_v41  ;;  %v1973_v26 = vmul.f32 %v1912_v17, %v1508_v42  ;;  %v1976_v34 = vmul.f32 %v1912_v17, %v1511_v45  ;;  %v1979_v35 = vmul.f32 %v1912_v17, %v1512_v46 }
  0x48   : > { %3117 = vst [vmem:[#allocation4_spill] sm:$0xff] %v1963_v25  ;;  %v1982_v27 = vmul.f32 %v1912_v17, %v1515_v47  ;;  %v1985_v36 = vmul.f32 %v1912_v17, %v1516_v48  ;;  %v1988_v39 = vmul.f32 %v1912_v17, %v1519_v51  ;;  %v1991_v28 = vmul.f32 %v1912_v17, %v1520_v52 }
  0x49   : > { %3118 = vst [vmem:[#allocation5_spill] sm:$0xff] %v1968_v33  ;;  %v1994_v40 = vmul.f32 %v1912_v17, %v1523_v53  ;;  %v1997_v41 = vmul.f32 %v1912_v17, %v1524_v54  ;;  %v2000_v42 = vmul.f32 %v1912_v17, %v1527_v57  ;;  %v2003_v45 = vmul.f32 %v1912_v17, %v1528_v58 }
  0x4a   : > { %3119 = vst [vmem:[#allocation6_spill] sm:$0xff] %v1973_v26  ;;  %v2006_v46 = vmul.f32 %v1912_v17, %v1531_v59  ;;  %v2009_v47 = vmul.f32 %v1912_v17, %v1532_v60  ;;  %v2012_v48 = vmul.f32 %v1912_v17, %v1535_v63  ;;  %v2015_v51 = vmul.f32 %v1912_v17, %v1536_v0 }
  0x4b   : > { %3120 = vst [vmem:[#allocation7_spill] sm:$0xff] %v1976_v34  ;;  %v2018_v52 = vmul.f32 %v1912_v17, %v1539_v1  ;;  %v2021_v53 = vmul.f32 %v1912_v17, %v1540_v2  ;;  %v2024_v54 = vmul.f32 %v1912_v17, %v1543_v5  ;;  %v2027_v57 = vmul.f32 %v1912_v17, %v1544_v6 }
  0x4c   : > { %3121 = vst [vmem:[#allocation8_spill] sm:$0xff] %v1979_v35  ;;  %v2030_v58 = vmul.f32 %v1912_v17, %v1547_v7  ;;  %v2033_v59 = vmul.f32 %v1912_v17, %v1548_v8  ;;  %v2036_v60 = vmul.f32 %v1912_v17, %v1551_v11  ;;  %v2039_v63 = vmul.f32 %v1912_v17, %v1552_v12 }
  0x4d   : > { %3122 = vst [vmem:[#allocation9_spill] sm:$0xff] %v1982_v27  ;;  %v2042_v0 = vmul.f32 %v1912_v17, %v1555_v13  ;;  %v2045_v1 = vmul.f32 %v1912_v17, %v1556_v14  ;;  %v2048_v2 = vmul.f32 %v1912_v17, %v1559_v18  ;;  %v2051_v4 = vmul.f32 %v1912_v17, %v1560_v19 }
  0x4e   : > { %3123 = vst [vmem:[#allocation10_spill] sm:$0xff] %v1985_v36  ;;  %v2054_v5 = vmul.f32 %v1912_v17, %v1563_v20  ;;  %v2057_v6 = vmul.f32 %v1912_v17, %v1564_v21  ;;  %v2060_v7 = vmul.f32 %v1912_v17, %v1567_v23  ;;  %v2063_v8 = vmul.f32 %v1912_v17, %v1568_v31 }
  0x4f   : > { %3124 = vst [vmem:[#allocation11_spill] sm:$0xff] %v1988_v39  ;;  %v2066_v9 = vmul.f32 %v1912_v17, %v1571_v32  ;;  %v2069_v10 = vmul.f32 %v1912_v17, %v1572_v37  ;;  %v2072_v11 = vmul.f32 %v1912_v17, %v1575_v38  ;;  %v2075_v12 = vmul.f32 %v1912_v17, %v1576_v43 }
  0x50   : > { %3125 = vst [vmem:[#allocation12_spill] sm:$0xff] %v1991_v28  ;;  %v2078_v13 = vmul.f32 %v1912_v17, %v1579_v44  ;;  %v2081_v14 = vmul.f32 %v1912_v17, %v1580_v49  ;;  %v2084_v15 = vmul.f32 %v1912_v17, %v1583_v50  ;;  %v2087_v16 = vmul.f32 %v1912_v17, %v1584_v55 }
  0x51   : > { %3126 = vst [vmem:[#allocation13_spill] sm:$0xff] %v1994_v40  ;;  %v519_v18 = vmul.f32 %v1928_v56, %v1928_v56  ;;  %v520_v19 = vmul.f32 %v1933_v61, %v1933_v61  ;;  %v521_v20 = vmul.f32 %v1938_v62, %v1938_v62  ;;  %v522_v21 = vmul.f32 %v1943_v3, %v1943_v3 }
  0x52   : > { %3127 = vst [vmem:[#allocation14_spill] sm:$0xff] %v1997_v41  ;;  %v523_v22 = vmul.f32 %v1948_v29, %v1948_v29  ;;  %v524_v23 = vmul.f32 %v1953_v24, %v1953_v24  ;;  %v525_v17 = vmul.f32 %v1958_v30, %v1958_v30  ;;  %v526_v31 = vmul.f32 %v1963_v25, %v1963_v25 }
  0x53   : > { %3128 = vst [vmem:[#allocation15_spill] sm:$0xff] %v2000_v42  ;;  %v527_v32 = vmul.f32 %v1968_v33, %v1968_v33  ;;  %v528_v37 = vmul.f32 %v1973_v26, %v1973_v26  ;;  %v529_v38 = vmul.f32 %v1976_v34, %v1976_v34  ;;  %v530_v43 = vmul.f32 %v1979_v35, %v1979_v35 }
  0x54   : > { %3129 = vst [vmem:[#allocation16_spill] sm:$0xff] %v2003_v45  ;;  %v531_v44 = vmul.f32 %v1982_v27, %v1982_v27  ;;  %v532_v49 = vmul.f32 %v1985_v36, %v1985_v36  ;;  %v2119_v50 = vmul.f32 %v1988_v39, %v1988_v39  ;;  %v2123_v55 = vmul.f32 %v1991_v28, %v1991_v28 }
  0x55   : > { %3130 = vst [vmem:[#allocation17_spill] sm:$0xff] %v2006_v46  ;;  %v535_v34 = vmul.f32 %v1994_v40, %v1994_v40  ;;  %v536_v35 = vmul.f32 %v1997_v41, %v1997_v41  ;;  %v537_v27 = vmul.f32 %v2000_v42, %v2000_v42  ;;  %v538_v36 = vmul.f32 %v2003_v45, %v2003_v45 }
  0x56   : > { %3131 = vst [vmem:[#allocation18_spill] sm:$0xff] %v2009_v47  ;;  %v539_v39 = vmul.f32 %v2006_v46, %v2006_v46  ;;  %v540_v26 = vmul.f32 %v2009_v47, %v2009_v47  ;;  %v541_v28 = vmul.f32 %v2012_v48, %v2012_v48  ;;  %v542_v40 = vmul.f32 %v2015_v51, %v2015_v51 }
  0x57   : > { %3132 = vst [vmem:[#allocation19_spill] sm:$0xff] %v2012_v48  ;;  %v543_v41 = vmul.f32 %v2018_v52, %v2018_v52  ;;  %v544_v42 = vmul.f32 %v2021_v53, %v2021_v53  ;;  %v545_v45 = vmul.f32 %v2024_v54, %v2024_v54  ;;  %v546_v46 = vmul.f32 %v2027_v57, %v2027_v57 }
  0x58   : > { %3133 = vst [vmem:[#allocation20_spill] sm:$0xff] %v2015_v51  ;;  %v547_v47 = vmul.f32 %v2030_v58, %v2030_v58  ;;  %v548_v48 = vmul.f32 %v2033_v59, %v2033_v59  ;;  %v549_v51 = vmul.f32 %v2036_v60, %v2036_v60  ;;  %v567_v33 = vadd.f32 %v535_v34, %v519_v18 }
  0x59   : > { %3134 = vst [vmem:[#allocation21_spill] sm:$0xff] %v2018_v52  ;;  %v550_v52 = vmul.f32 %v2039_v63, %v2039_v63  ;;  %v571_v34 = vadd.f32 %v537_v27, %v521_v20  ;;  %v558_v18 = vmul.f32 %v2063_v8, %v2063_v8  ;;  %v579_v25 = vadd.f32 %v541_v28, %v525_v17 }
  0x5a   : > { %3135 = vst [vmem:[#allocation22_spill] sm:$0xff] %v2021_v53  ;;  %v551_v53 = vmul.f32 %v2042_v0, %v2042_v0  ;;  %v562_v27 = vmul.f32 %v2075_v12, %v2075_v12  ;;  %v566_v28 = vmul.f32 %v2087_v16, %v2087_v16  ;;  %v585_v17 = vadd.f32 %v544_v42, %v528_v37 }
  0x5b   : > { %3136 = vst [vmem:[#allocation23_spill] sm:$0xff] %v2024_v54  ;;  %v552_v54 = vmul.f32 %v2045_v1, %v2045_v1  ;;  %v597_v42 = vadd.f32 %v550_v52, %v2123_v55 }
  0x5c   : > { %3137 = vst [vmem:[#allocation24_spill] sm:$0xff] %v2027_v57  ;;  %v553_v57 = vmul.f32 %v2048_v2, %v2048_v2 }
  0x5d   : > { %3138 = vst [vmem:[#allocation25_spill] sm:$0xff] %v2030_v58  ;;  %v554_v58 = vmul.f32 %v2051_v4, %v2051_v4 }
  0x5e   : > { %3139 = vst [vmem:[#allocation26_spill] sm:$0xff] %v2033_v59  ;;  %v569_v59 = vadd.f32 %v536_v35, %v520_v19  ;;  %v573_v35 = vadd.f32 %v538_v36, %v522_v21  ;;  %v2177_v19 = vadd.f32 %v567_v33, %v551_v53  ;;  %v564_v36 = vmul.f32 %v2081_v14, %v2081_v14 }
  0x5f   : > { %3140 = vst [vmem:[#allocation27_spill] sm:$0xff] %v2036_v60  ;;  %v555_v60 = vmul.f32 %v2054_v5, %v2054_v5  ;;  %v2189_v33 = vadd.f32 %v571_v34, %v553_v57  ;;  %v589_v34 = vadd.f32 %v546_v46, %v530_v43 }
  0x60   : > { %3141 = vst [vmem:[#allocation28_spill] sm:$0xff] %v2039_v63  ;;  %v556_v63 = vmul.f32 %v2057_v6, %v2057_v6  ;;  %v2183_v20 = vadd.f32 %v569_v59, %v552_v54  ;;  %v2198_v53 = vadd.f32 %v573_v35, %v554_v58  ;;  %v587_v58 = vadd.f32 %v545_v45, %v529_v38 }
  0x61   : > { %3142 = vst [vmem:[#allocation29_spill] sm:$0xff] %v2042_v0  ;;  %v557_v0 = vmul.f32 %v2060_v7, %v2060_v7  ;;  %v2210_v21 = vmin.f32 %v2189_v33, 1.0 }
  0x62   : > { %3143 = vst [vmem:[#allocation30_spill] sm:$0xff] %v2045_v1  ;;  %v577_v1 = vadd.f32 %v540_v26, %v524_v23  ;;  %v2192_v26 = vmin.f32 %v2177_v19, 1.0  ;;  %v583_v23 = vadd.f32 %v543_v41, %v527_v32  ;;  %v595_v41 = vadd.f32 %v549_v51, %v2119_v50 }
  0x63   : > { %3144 = vst [vmem:[#allocation31_spill] sm:$0xff] %v2048_v2  ;;  %v559_v2 = vmul.f32 %v2066_v9, %v2066_v9  ;;  %v2207_v57 = vadd.f32 %v579_v25, %v557_v0  ;;  %v593_v25 = vadd.f32 %v548_v48, %v532_v49  ;;  %v2242_v51 = vadd.f32 %v589_v34, %v562_v27 }
  0x64   : > { %3145 = vst [vmem:[#allocation32_spill] sm:$0xff] %v2051_v4  ;;  %v560_v4 = vmul.f32 %v2069_v10, %v2069_v10  ;;  %v2205_v59 = vadd.f32 %v577_v1, %v556_v63  ;;  %1637 = vrsqrt.f32 %v2192_v26  ;;  %v2251_v32 = vadd.f32 %v597_v42, %v566_v28 }
  0x65   : > { %3146 = vst [vmem:[#allocation33_spill] sm:$0xff] %v2054_v5  ;;  %v575_v5 = vadd.f32 %v539_v39, %v523_v22  ;;  %v565_v39 = vmul.f32 %v2084_v15, %v2084_v15  ;;  %v2228_v0 = vmin.f32 %v2207_v57, 1.0  ;;  %v2235_v46 = vadd.f32 %v583_v23, %v559_v2 }
  0x66   : > { %3147 = vst [vmem:[#allocation34_spill] sm:$0xff] %v2057_v6  ;;  %v561_v6 = vmul.f32 %v2072_v11, %v2072_v11  ;;  %v2222_v63 = vmin.f32 %v2205_v59, 1.0  ;;  %v2246_v1 = vadd.f32 %v593_v25, %v564_v36  ;;  %v2266_v43 = vmin.f32 %v2242_v51, 1.0 }
  0x67   : > { %3148 = vst [vmem:[#allocation35_spill] sm:$0xff] %v2063_v8  ;;  %v581_v8 = vadd.f32 %v542_v40, %v526_v31  ;;  %v2201_v40 = vmin.f32 %v2183_v20, 1.0  ;;  %v2203_v54 = vadd.f32 %v575_v5, %v555_v60  ;;  %v2215_v31 = vmin.f32 %v2198_v53, 1.0 }
  0x68   : > { %3149 = vst [vmem:[#allocation36_spill] sm:$0xff] %v2066_v9  ;;  %v563_v9 = vmul.f32 %v2078_v13, %v2078_v13  ;;  %v591_v60 = vadd.f32 %v547_v47, %v531_v44  ;;  %v2237_v47 = vadd.f32 %v585_v17, %v560_v4  ;;  %v2239_v48 = vadd.f32 %v587_v58, %v561_v6 }
  0x69   : > { %3150 = vst [vmem:[#allocation37_spill] sm:$0xff] %v2081_v14  ;;  %v2212_v22 = vadd.f32 %v581_v8, %v558_v18  ;;  %v2218_v35 = vmin.f32 %v2203_v54, 1.0  ;;  %1639 = vrsqrt.f32 %v2201_v40  ;;  %v2249_v8 = vadd.f32 %v595_v41, %v565_v39 }
  0x6a   : > { %3151 = vst [vmem:[#allocation38_spill] sm:$0xff] %v2084_v15  ;;  %1641 = vrsqrt.f32 %v2210_v21  ;;  %v2244_v52 = vadd.f32 %v591_v60, %v563_v9  ;;  %v1638_v5 = vpop.eup %1637  ;;  %v2254_v2 = vmin.f32 %v2235_v46, 1.0  ;;  %v2258_v6 = vmin.f32 %v2237_v47, 1.0 }
  0x6b   : > { %3152 = vst [vmem:[#allocation39_spill] sm:$0xff] %v2087_v16  ;;  %v2232_v45 = vmin.f32 %v2212_v22, 1.0  ;;  %1643 = vrsqrt.f32 %v2215_v31  ;;  %v2261_v9 = vmin.f32 %v2239_v48, 1.0  ;;  %v616_v37 = vmul.f32 %v1638_v5, %v2192_v26 }
  0x6c   : > { %3153 = vst [vmem:[#allocation40_spill] sm:$0xff] %v2235_v46  ;;  %1645 = vrsqrt.f32 %v2218_v35  ;;  %v2269_v44 = vmin.f32 %v2244_v52, 1.0  ;;  %v2272_v49 = vmin.f32 %v2246_v1, 1.0  ;;  %v2276_v18 = vmin.f32 %v2249_v8, 1.0 }
  0x6d   : > { %3154 = vst [vmem:[#allocation41_spill] sm:$0xff] %v2237_v47  ;;  %1647 = vrsqrt.f32 %v2222_v63  ;;  %v2279_v27 = vmin.f32 %v2251_v32, 1.0  ;;  %v617_v36 = vmul.f32 %v1638_v5, %v616_v37  ;;  %vm622_vm0 = vcmp.eq.f32.partialorder %v2192_v26, inf }
  0x6e   : > { %3155 = vst [vmem:[#allocation42_spill] sm:$0xff] %v2239_v48  ;;  %1649 = vrsqrt.f32 %v2228_v0  ;;  %vm634_vm1 = vcmp.eq.f32.partialorder %v2201_v40, inf  ;;  %vm646_vm2 = vcmp.eq.f32.partialorder %v2210_v21, inf  ;;  %vm658_vm3 = vcmp.eq.f32.partialorder %v2215_v31, inf }
  0x6f   : > { %3156 = vst [vmem:[#allocation43_spill] sm:$0xff] %v2242_v51  ;;  %v1640_v4 = vpop.eup %1639  ;;  %1651 = vrsqrt.f32 %v2232_v45  ;;  %v618_v25 = vmul.f32 0.5, %v617_v36  ;;  %vm670_vm4 = vcmp.eq.f32.partialorder %v2218_v35, inf  ;;  %vm624_vm5 = vcmp.eq.f32.partialorder %v2192_v26, 0.0 }
  0x70   : > { %3157 = vst [vmem:[#allocation44_spill] sm:$0xff] %v2244_v52  ;;  %v1642_v38 = vpop.eup %1641  ;;  %v628_v50 = vmul.f32 %v1640_v4, %v2201_v40  ;;  %1653 = vrsqrt.f32 %v2254_v2  ;;  %vm636_vm6 = vcmp.eq.f32.partialorder %v2201_v40, 0.0  ;;  %vm648_vm7 = vcmp.eq.f32.partialorder %v2210_v21, 0.0 }
  0x71   : > { %3158 = vst [vmem:[#allocation45_spill] sm:$0xff] %v2246_v1  ;;  %v1644_v55 = vpop.eup %1643  ;;  %v640_v39 = vmul.f32 %v1642_v38, %v2210_v21  ;;  %1655 = vrsqrt.f32 %v2258_v6  ;;  %vm660_vm8 = vcmp.eq.f32.partialorder %v2215_v31, 0.0  ;;  %vm682_vm9 = vcmp.eq.f32.partialorder %v2222_v63, inf }
  0x72   : > { %3159 = vst [vmem:[#allocation46_spill] sm:$0xff] %v2249_v8  ;;  %v1646_v28 = vpop.eup %1645  ;;  %v629_v17 = vmul.f32 %v1640_v4, %v628_v50  ;;  %v652_v34 = vmul.f32 %v1644_v55, %v2215_v31  ;;  %v619_v50 = vsub.f32 1.5, %v618_v25  ;;  %vm672_vm10 = vcmp.eq.f32.partialorder %v2218_v35, 0.0 }
  0x73   : > { %3160 = vst [vmem:[#allocation47_spill] sm:$0xff] %v2251_v32  ;;  %v1648_v60 = vpop.eup %1647  ;;  %v641_v41 = vmul.f32 %v1642_v38, %v640_v39  ;;  %v664_v16 = vmul.f32 %v1646_v28, %v2218_v35  ;;  %vm684_vm11 = vcmp.eq.f32.partialorder %v2222_v63, 0.0  ;;  %vm694_vm12 = vcmp.eq.f32.partialorder %v2228_v0, inf }
  0x74   : > { %v1650_v15 = vpop.eup %1649  ;;  %v630_v14 = vmul.f32 0.5, %v629_v17  ;;  %v653_v37 = vmul.f32 %v1644_v55, %v652_v34  ;;  %v676_v8 = vmul.f32 %v1648_v60, %v2222_v63  ;;  %vm708_vm15 = vcmp.eq.f32.partialorder %v2232_v45, 0.0 }
  0x75   : > { %v1652_v23 = vpop.eup %1651  ;;  %v642_v32 = vmul.f32 0.5, %v641_v41  ;;  %v665_v58 = vmul.f32 %v1646_v28, %v664_v16  ;;  %v688_v52 = vmul.f32 %v1650_v15, %v2228_v0  ;;  %vm730_vm14 = vcmp.eq.f32.partialorder %v2258_v6, inf }
  0x76   : > { %v631_v1 = vsub.f32 1.5, %v630_v14  ;;  %v654_v36 = vmul.f32 0.5, %v653_v37  ;;  %v677_v39 = vmul.f32 %v1648_v60, %v676_v8  ;;  %v700_v42 = vmul.f32 %v1652_v23, %v2232_v45 }
  0x77   : > { %v643_v17 = vsub.f32 1.5, %v642_v32  ;;  %v666_v34 = vmul.f32 0.5, %v665_v58  ;;  %v689_v48 = vmul.f32 %v1650_v15, %v688_v52  ;;  %v661_v14 = vand.u32 2147483648, %v2215_v31  ;;  %v2299_v32 = vpop.eup %1653 }
  0x78   : > { %v655_v25 = vsub.f32 1.5, %v654_v36  ;;  %v678_v16 = vmul.f32 0.5, %v677_v39  ;;  %v701_v8 = vmul.f32 %v1652_v23, %v700_v42  ;;  %v673_v37 = vand.u32 2147483648, %v2218_v35 }
  0x79   : > { %v667_v41 = vsub.f32 1.5, %v666_v34  ;;  %v690_v51 = vmul.f32 0.5, %v689_v48  ;;  %v620_v52 = vmul.f32 %v1638_v5, %v619_v50  ;;  %v632_v58 = vmul.f32 %v1640_v4, %v631_v1  ;;  %v1656_v4 = vpop.eup %1655 }
  0x7a   : > { %v679_v36 = vsub.f32 1.5, %v678_v16  ;;  %v702_v46 = vmul.f32 0.5, %v701_v8  ;;  %v644_v47 = vmul.f32 %v1642_v38, %v643_v17  ;;  %v656_v42 = vmul.f32 %v1644_v55, %v655_v25 }
  0x7b   : > { %v691_v39 = vsub.f32 1.5, %v690_v51  ;;  %v668_v48 = vmul.f32 %v1646_v28, %v667_v41  ;;  %v685_v1 = vand.u32 2147483648, %v2222_v63  ;;  %v697_v38 = vand.u32 2147483648, %v2228_v0 }
  0x7c   : > { %v680_v5 = vmul.f32 %v1648_v60, %v679_v36  ;;  %v709_v55 = vand.u32 2147483648, %v2232_v45  ;;  %v621_v50 = vmul.f32 %v620_v52, %v2192_v26  ;;  %v633_v51 = vmul.f32 %v632_v58, %v2201_v40 }
  0x7d   : > { %v692_v28 = vmul.f32 %v1650_v15, %v691_v39  ;;  %v703_v60 = vsub.f32 1.5, %v702_v46  ;;  %v645_v17 = vmul.f32 %v644_v47, %v2210_v21  ;;  %v657_v34 = vmul.f32 %v656_v42, %v2215_v31 }
  0x7e   : > { %v712_v25 = vmul.f32 %v2299_v32, %v2254_v2  ;;  %v721_v16 = vand.u32 2147483648, %v2254_v2  ;;  %v669_v8 = vmul.f32 %v668_v48, %v2218_v35  ;;  %v681_v41 = vmul.f32 %v680_v5, %v2222_v63 }
  0x7f   : > { %v704_v52 = vmul.f32 %v1652_v23, %v703_v60  ;;  %v724_v15 = vmul.f32 %v1656_v4, %v2258_v6  ;;  %v733_v47 = vand.u32 2147483648, %v2258_v6  ;;  %1657 = vrsqrt.f32 %v2261_v9 }
  0x80   : > { %v713_v46 = vmul.f32 %v2299_v32, %v712_v25  ;;  %v623_v58 = vsel %vm622_vm0, %v2192_v26, %v621_v50  ;;  %v635_v23 = vsel %vm634_vm1, %v2201_v40, %v633_v51  ;;  %v693_v36 = vmul.f32 %v692_v28, %v2228_v0 }
  0x81   : > { %vm720_vm13 = vcmp.eq.f32.partialorder %v2254_v2, 0.0  ;;  %v725_v42 = vmul.f32 %v1656_v4, %v724_v15  ;;  %v647_v39 = vsel %vm646_vm2, %v2210_v21, %v645_v17  ;;  %v659_v48 = vsel %vm658_vm3, %v2215_v31, %v657_v34 }
  0x82   : > { %v714_v5 = vmul.f32 0.5, %v713_v46  ;;  %vm732_vm0 = vcmp.eq.f32.partialorder %v2258_v6, 0.0  ;;  %1659 = vrsqrt.f32 %v2266_v43  ;;  %v671_v50 = vsel %vm670_vm4, %v2218_v35, %v669_v8 }
  0x83   : > { %v683_v51 = vsel %vm682_vm9, %v2222_v63, %v681_v41  ;;  %v705_v28 = vmul.f32 %v704_v52, %v2232_v45  ;;  %v726_v60 = vmul.f32 0.5, %v725_v42  ;;  %v3161_v17 = vand.u32 2147483648, %v2192_v26 }
  0x84   : > { %v3162_v25 = vand.u32 2147483648, %v2201_v40  ;;  %v715_v8 = vsub.f32 1.5, %v714_v5  ;;  %1661 = vrsqrt.f32 %v2269_v44  ;;  %v3163_v41 = vand.u32 2147483648, %v2210_v21 }
  0x85   : > { %v2357_v34 = vsel %vm624_vm5, %v3161_v17, %v623_v58  ;;  %v2376_v26 = vsel %vm660_vm8, %v661_v14, %v659_v48  ;;  %v695_v40 = vsel %vm694_vm12, %v2228_v0, %v693_v36  ;;  %v727_v46 = vsub.f32 1.5, %v726_v60  ;;  %v1658_v58 = vpop.eup %1657 }
  0x86   : > { %v2363_v15 = vsel %vm636_vm6, %v3162_v25, %v635_v23  ;;  %v2370_v52 = vsel %vm648_vm7, %v3163_v41, %v647_v39  ;;  %v2385_v23 = vsel %vm672_vm10, %v673_v37, %v671_v50  ;;  %v2389_v21 = vsel %vm684_vm11, %v685_v1, %v683_v51 }
  0x87   : > { %v716_v31 = vmul.f32 %v2299_v32, %v715_v8  ;;  %1663 = vrsqrt.f32 %v2272_v49  ;;  %vm3164_vm1 = vcmp.eq.f32.partialorder %v2232_v45, inf  ;;  %v728_v36 = vmul.f32 %v1656_v4, %v727_v46 }
  0x88   : > { %v707_v14 = vsel %vm3164_vm1, %v2232_v45, %v705_v28  ;;  %v736_v42 = vmul.f32 %v1658_v58, %v2261_v9  ;;  %1665 = vrsqrt.f32 %v2276_v18  ;;  %v1660_v35 = vpop.eup %1659  ;;  %vm3165_vm2 = vcmp.eq.f32.partialorder %v2228_v0, 0.0 }
  0x89   : > { %v2400_v37 = vsel %vm3165_vm2, %v697_v38, %v695_v40  ;;  %v717_v63 = vmul.f32 %v716_v31, %v2254_v2  ;;  %vm742_vm3 = vcmp.eq.f32.partialorder %v2261_v9, inf  ;;  %v745_v32 = vand.u32 2147483648, %v2261_v9 }
  0x8a   : > { %v729_v1 = vmul.f32 %v728_v36, %v2258_v6  ;;  %v737_v39 = vmul.f32 %v1658_v58, %v736_v42  ;;  %vm744_vm4 = vcmp.eq.f32.partialorder %v2261_v9, 0.0  ;;  %v748_v4 = vmul.f32 %v1660_v35, %v2266_v43  ;;  %v1662_v48 = vpop.eup %1661 }
  0x8b   : > { %1667 = vrsqrt.f32 %v2279_v27  ;;  %v2413_v0 = vsel %vm708_vm15, %v709_v55, %v707_v14  ;;  %vm3166_vm5 = vcmp.eq.f32.partialorder %v2254_v2, inf  ;;  %vm754_vm6 = vcmp.eq.f32.partialorder %v2266_v43, inf }
  0x8c   : > { %v719_v38 = vsel %vm3166_vm5, %v2254_v2, %v717_v63  ;;  %v757_v5 = vand.u32 2147483648, %v2266_v43  ;;  %v769_v50 = vand.u32 2147483648, %v2269_v44  ;;  %v731_v51 = vsel %vm730_vm14, %v2258_v6, %v729_v1 }
  0x8d   : > { %v738_v28 = vmul.f32 0.5, %v737_v39  ;;  %v749_v60 = vmul.f32 %v1660_v35, %v748_v4  ;;  %vm756_vm7 = vcmp.eq.f32.partialorder %v2266_v43, 0.0  ;;  %v781_v45 = vand.u32 2147483648, %v2272_v49  ;;  %v1664_v55 = vpop.eup %1663 }
  0x8e   : > { %v2430_v17 = vsel %vm720_vm13, %v721_v16, %v719_v38  ;;  %v760_v25 = vmul.f32 %v1662_v48, %v2269_v44  ;;  %v793_v8 = vand.u32 2147483648, %v2276_v18  ;;  %v805_v41 = vand.u32 2147483648, %v2279_v27  ;;  %v1666_v40 = vpop.eup %1665 }
  0x8f   : > { %v2437_v46 = vsel %vm732_vm0, %v733_v47, %v731_v51  ;;  %v739_v31 = vsub.f32 1.5, %v738_v28  ;;  %v750_v14 = vmul.f32 0.5, %v749_v60  ;;  %vm766_vm8 = vcmp.eq.f32.partialorder %v2269_v44, inf }
  0x90   : > { %v772_v36 = vmul.f32 %v1664_v55, %v2272_v49  ;;  %v761_v2 = vmul.f32 %v1662_v48, %v760_v25  ;;  %vm768_vm9 = vcmp.eq.f32.partialorder %v2269_v44, 0.0  ;;  %vm778_vm10 = vcmp.eq.f32.partialorder %v2272_v49, inf }
  0x91   : > { %v784_v16 = vmul.f32 %v1666_v40, %v2276_v18  ;;  %v2446_v42 = vmul.f32 %v2357_v34, %v1928_v56  ;;  %v2450_v6 = vmul.f32 %v2363_v15, %v1933_v61  ;;  %v1668_v47 = vpop.eup %1667  ;;  %v740_v63 = vmul.f32 %v1658_v58, %v739_v31 }
  0x92   : > { %v751_v1 = vsub.f32 1.5, %v750_v14  ;;  %v773_v39 = vmul.f32 %v1664_v55, %v772_v36  ;;  %vm780_vm11 = vcmp.eq.f32.partialorder %v2272_v49, 0.0  ;;  %vm790_vm12 = vcmp.eq.f32.partialorder %v2276_v18, inf }
  0x93   : > { %v2456_v4 = vmul.f32 %v2370_v52, %v1938_v62  ;;  %v762_v38 = vmul.f32 0.5, %v761_v2  ;;  %v785_v51 = vmul.f32 %v1666_v40, %v784_v16  ;;  %vm792_vm13 = vcmp.eq.f32.partialorder %v2276_v18, 0.0 }
  0x94   : > { %v796_v56 = vmul.f32 %v1668_v47, %v2279_v27  ;;  %v2462_v61 = vmul.f32 %v2376_v26, %v1943_v3  ;;  %v741_v58 = vmul.f32 %v740_v63, %v2261_v9  ;;  %v752_v28 = vmul.f32 %v1660_v35, %v751_v1 }
  0x95   : > { %v774_v60 = vmul.f32 0.5, %v773_v39  ;;  %vm802_vm14 = vcmp.eq.f32.partialorder %v2279_v27, inf  ;;  %v2468_v62 = vmul.f32 %v2385_v23, %v1948_v29  ;;  %v763_v25 = vsub.f32 1.5, %v762_v38 }
  0x96   : > { %v786_v31 = vmul.f32 0.5, %v785_v51  ;;  %v797_v14 = vmul.f32 %v1668_v47, %v796_v56  ;;  %vm804_vm15 = vcmp.eq.f32.partialorder %v2279_v27, 0.0  ;;  %v2473_v36 = vmul.f32 %v2389_v21, %v1953_v24  ;;  %v3167_v51 = vld [vmem:[#allocation4_spill] sm:$0xff] }
  0x97   : > { %v743_v3 = vsel %vm742_vm3, %v2261_v9, %v741_v58  ;;  %v753_v35 = vmul.f32 %v752_v28, %v2266_v43  ;;  %v775_v2 = vsub.f32 1.5, %v774_v60  ;;  %v2481_v29 = vmul.f32 %v2400_v37, %v1958_v30  ;;  %v3168_v58 = vld [vmem:[#allocation5_spill] sm:$0xff] }
  0x98   : > { %v746_v16 = vsel %vm744_vm4, %v745_v32, %v743_v3  ;;  %v764_v63 = vmul.f32 %v1662_v48, %v763_v25  ;;  %v787_v1 = vsub.f32 1.5, %v786_v31  ;;  %v798_v39 = vmul.f32 0.5, %v797_v14  ;;  %v3169_v25 = vld [vmem:[#allocation6_spill] sm:$0xff]  ;;  %v3171_v31 = vld [vmem:[#allocation7_spill] sm:$0xff]  ;;  %v3173_v3 = vld [vmem:[#allocation13_spill] sm:$0xff] }
  0x99   : > { %v755_v24 = vsel %vm754_vm6, %v2266_v43, %v753_v35  ;;  %v776_v38 = vmul.f32 %v1664_v55, %v775_v2  ;;  %v2490_v56 = vmul.f32 %v2413_v0, %v3167_v51  ;;  %v2494_v28 = vmul.f32 %v2430_v17, %v3168_v58  ;;  %v3175_v2 = vld [vmem:[#allocation8_spill] sm:$0xff]  ;;  %v3179_v51 = vld [vmem:[#allocation15_spill] sm:$0xff] }
  0x9a   : > { %v758_v30 = vsel %vm756_vm7, %v757_v5, %v755_v24  ;;  %v765_v9 = vmul.f32 %v764_v63, %v2269_v44  ;;  %v788_v32 = vmul.f32 %v1666_v40, %v787_v1  ;;  %v799_v48 = vsub.f32 1.5, %v798_v39  ;;  %v3177_v24 = vld [vmem:[#allocation14_spill] sm:$0xff] }
  0x9b   : > { %v777_v60 = vmul.f32 %v776_v38, %v2272_v49  ;;  %v2502_v55 = vmul.f32 %v2437_v46, %v3169_v25  ;;  %v2505_v14 = vmul.f32 %v746_v16, %v3171_v31  ;;  %v2509_v35 = vmul.f32 %v2357_v34, %v3173_v3  ;;  %v3187_v31 = vld [vmem:[#allocation18_spill] sm:$0xff] }
  0x9c   : > { %v767_v43 = vsel %vm766_vm8, %v2269_v44, %v765_v9  ;;  %v789_v5 = vmul.f32 %v788_v32, %v2276_v18  ;;  %v800_v40 = vmul.f32 %v1668_v47, %v799_v48  ;;  %v2516_v63 = vmul.f32 %v758_v30, %v3175_v2  ;;  %v3181_v9 = vld [vmem:[#allocation16_spill] sm:$0xff] }
  0x9d   : > { %3170 = vst [vmem:[#allocation4_spill] sm:$0xff] %v2502_v55  ;;  %v770_v1 = vsel %vm768_vm9, %v769_v50, %v767_v43  ;;  %v779_v39 = vsel %vm778_vm10, %v2272_v49, %v777_v60  ;;  %v2527_v38 = vmul.f32 %v2363_v15, %v3177_v24  ;;  %v2531_v58 = vmul.f32 %v2370_v52, %v3179_v51  ;;  %v3183_v60 = vld [vmem:[#allocation9_spill] sm:$0xff]  ;;  %v3193_v2 = vld [vmem:[#allocation20_spill] sm:$0xff]  ;;  %v3195_v51 = vld [vmem:[#allocation11_spill] sm:$0xff] }
  0x9e   : > { %3172 = vst [vmem:[#allocation5_spill] sm:$0xff] %v2505_v14  ;;  %v2537_v47 = vsel %vm780_vm11, %v781_v45, %v779_v39  ;;  %v791_v44 = vsel %vm790_vm12, %v2276_v18, %v789_v5  ;;  %v801_v50 = vmul.f32 %v800_v40, %v2279_v27  ;;  %v2545_v32 = vmul.f32 %v2376_v26, %v3181_v9  ;;  %v3185_v45 = vld [vmem:[#allocation17_spill] sm:$0xff]  ;;  %v3189_v5 = vld [vmem:[#allocation10_spill] sm:$0xff] }
  0x9f   : > { %3174 = vst [vmem:[#allocation6_spill] sm:$0xff] %v2509_v35  ;;  %v2551_v48 = vsel %vm792_vm13, %v793_v8, %v791_v44  ;;  %v2554_v49 = vmul.f32 %v770_v1, %v3183_v60  ;;  %v2558_v25 = vmul.f32 %v2385_v23, %v3185_v45  ;;  %v2562_v3 = vmul.f32 %v2389_v21, %v3187_v31  ;;  %v3191_v8 = vld [vmem:[#allocation19_spill] sm:$0xff]  ;;  %v3199_v60 = vld [vmem:[#allocation22_spill] sm:$0xff]  ;;  %v3201_v31 = vld [vmem:[#allocation12_spill] sm:$0xff] }
  0xa0   : > { %3176 = vst [vmem:[#allocation7_spill] sm:$0xff] %v2516_v63  ;;  %v803_v43 = vsel %vm802_vm14, %v2279_v27, %v801_v50  ;;  %v2569_v18 = vmul.f32 %v2537_v47, %v3189_v5  ;;  %v2573_v40 = vmul.f32 %v2400_v37, %v3191_v8  ;;  %v2577_v39 = vmul.f32 %v2413_v0, %v3193_v2  ;;  %v3197_v50 = vld [vmem:[#allocation21_spill] sm:$0xff]  ;;  %v3203_v8 = vld [vmem:[#allocation23_spill] sm:$0xff] }
  0xa1   : > { %3178 = vst [vmem:[#allocation13_spill] sm:$0xff] %v2527_v38  ;;  %v2583_v24 = vsel %vm804_vm15, %v805_v41, %v803_v43  ;;  %v2587_v44 = vmul.f32 %v2551_v48, %v3195_v51  ;;  %v2591_v9 = vmul.f32 %v2430_v17, %v3197_v50  ;;  %v2595_v45 = vmul.f32 %v2437_v46, %v3199_v60  ;;  %v3205_v41 = vld [vmem:[#allocation24_spill] sm:$0xff]  ;;  %v3207_v2 = vld [vmem:[#allocation25_spill] sm:$0xff] }
  0xa2   : > { %3180 = vst [vmem:[#allocation8_spill] sm:$0xff] %v2531_v58  ;;  %v2599_v5 = vmul.f32 %v2583_v24, %v3201_v31  ;;  %v2602_v27 = vmul.f32 %v746_v16, %v3203_v8  ;;  %v2605_v43 = vmul.f32 %v758_v30, %v3205_v41  ;;  %v2608_v51 = vmul.f32 %v770_v1, %v3207_v2  ;;  %v3215_v8 = vld [vmem:[#allocation29_spill] sm:$0xff]  ;;  %v3217_v41 = vld [vmem:[#allocation30_spill] sm:$0xff] }
  0xa3   : > { %3182 = vst [vmem:[#allocation14_spill] sm:$0xff] %v2545_v32  ;;  %v2628_v2 = vmul.f32 %v2363_v15, %v3217_v41  ;;  %v2648_v15 = vmul.f32 %v2400_v37, %v2060_v7  ;;  %v2669_v7 = vmul.f32 %v770_v1, %v2078_v13  ;;  %v855_v37 = vmax.f32 %v2177_v19, %v2183_v20  ;;  %v3240_v13 = vld [vmem:[#allocation45_spill] sm:$0xff]  ;;  %v3241_v1 = vld [vmem:[#allocation44_spill] sm:$0xff]  ;;  %v3242_v41 = vld [vmem:[#allocation47_spill] sm:$0xff] }
  0xa4   : > { %3184 = vst [vmem:[#allocation15_spill] sm:$0xff] %v2554_v49 }
  0xa5   : > { %3186 = vst [vmem:[#allocation16_spill] sm:$0xff] %v2558_v25 }
  0xa6   : > { %3188 = vst [vmem:[#allocation9_spill] sm:$0xff] %v2562_v3 }
  0xa7   : > { %3190 = vst [vmem:[#allocation17_spill] sm:$0xff] %v2569_v18 }
  0xa8   : > { %3192 = vst [vmem:[#allocation18_spill] sm:$0xff] %v2573_v40 }
  0xa9   : > { %3194 = vst [vmem:[#allocation10_spill] sm:$0xff] %v2577_v39  ;;  %v3209_v39 = vld [vmem:[#allocation26_spill] sm:$0xff] }
  0xaa   : > { %3196 = vst [vmem:[#allocation19_spill] sm:$0xff] %v2587_v44  ;;  %v2612_v50 = vmul.f32 %v2537_v47, %v3209_v39 }
  0xab   : > { %3198 = vst [vmem:[#allocation20_spill] sm:$0xff] %v2591_v9  ;;  %v3211_v9 = vld [vmem:[#allocation27_spill] sm:$0xff] }
  0xac   : > { %3200 = vst [vmem:[#allocation11_spill] sm:$0xff] %v2595_v45  ;;  %v2616_v60 = vmul.f32 %v2551_v48, %v3211_v9  ;;  %v3213_v45 = vld [vmem:[#allocation28_spill] sm:$0xff] }
  0xad   : > { %3202 = vst [vmem:[#allocation21_spill] sm:$0xff] %v2599_v5  ;;  %v2620_v31 = vmul.f32 %v2583_v24, %v3213_v45 }
  0xae   : > { %3204 = vst [vmem:[#allocation22_spill] sm:$0xff] %v2602_v27  ;;  %v2624_v27 = vmul.f32 %v2357_v34, %v3215_v8  ;;  %v3228_v8 = vld [vmem:[#allocation35_spill] sm:$0xff] }
  0xaf   : > { %3206 = vst [vmem:[#allocation12_spill] sm:$0xff] %v2605_v43 }
  0xb0   : > { %3208 = vst [vmem:[#allocation23_spill] sm:$0xff] %v2608_v51  ;;  %v3219_v51 = vld [vmem:[#allocation31_spill] sm:$0xff] }
  0xb1   : > { %3210 = vst [vmem:[#allocation24_spill] sm:$0xff] %v2612_v50  ;;  %v2632_v39 = vmul.f32 %v2370_v52, %v3219_v51  ;;  %v3221_v50 = vld [vmem:[#allocation32_spill] sm:$0xff]  ;;  %v2652_v52 = vmul.f32 %v2413_v0, %v3228_v8  ;;  %v862_v0 = vmax.f32 %v2189_v33, %v2198_v53  ;;  %v3243_v8 = vld [vmem:[#allocation46_spill] sm:$0xff] }
  0xb2   : > { %3212 = vst [vmem:[#allocation25_spill] sm:$0xff] %v2616_v60  ;;  %v2636_v9 = vmul.f32 %v2376_v26, %v3221_v50  ;;  %v3223_v60 = vld [vmem:[#allocation33_spill] sm:$0xff]  ;;  %v3230_v51 = vld [vmem:[#allocation36_spill] sm:$0xff]  ;;  %v2663_v50 = vmul.f32 %v746_v16, %v2072_v11 }
  0xb3   : > { %3214 = vst [vmem:[#allocation26_spill] sm:$0xff] %v2620_v31  ;;  %v2640_v45 = vmul.f32 %v2385_v23, %v3223_v60  ;;  %v3225_v31 = vld [vmem:[#allocation34_spill] sm:$0xff]  ;;  %v2656_v26 = vmul.f32 %v2430_v17, %v3230_v51  ;;  %v2660_v23 = vmul.f32 %v2437_v46, %v2069_v10  ;;  %v869_v17 = vmax.f32 %v2203_v54, %v2205_v59  ;;  %v3236_v11 = vld [vmem:[#allocation41_spill] sm:$0xff]  ;;  %v3237_v46 = vld [vmem:[#allocation40_spill] sm:$0xff] }
  0xb4   : > { %3216 = vst [vmem:[#allocation27_spill] sm:$0xff] %v2624_v27  ;;  %v2644_v34 = vmul.f32 %v2389_v21, %v3225_v31  ;;  %v2666_v21 = vmul.f32 %v758_v30, %v2075_v12  ;;  %v876_v10 = vmax.f32 %v2207_v57, %v2212_v22  ;;  %v883_v16 = vmax.f32 %v3237_v46, %v3236_v11  ;;  %v3238_v12 = vld [vmem:[#allocation43_spill] sm:$0xff]  ;;  %v3239_v30 = vld [vmem:[#allocation42_spill] sm:$0xff] }
  0xb5   : > { %3218 = vst [vmem:[#allocation28_spill] sm:$0xff] %v2628_v2  ;;  %v890_v60 = vmax.f32 %v3239_v30, %v3238_v12  ;;  %v897_v31 = vmax.f32 %v3241_v1, %v3240_v13  ;;  %v904_v51 = vmax.f32 %v3243_v8, %v3242_v41 }
  0xb6   : > { %3220 = vst [vmem:[#allocation29_spill] sm:$0xff] %v2632_v39 }
  0xb7   : > { %3222 = vst [vmem:[#allocation30_spill] sm:$0xff] %v2636_v9 }
  0xb8   : > { %3224 = vst [vmem:[#allocation31_spill] sm:$0xff] %v2640_v45 }
  0xb9   : > { %3226 = vst [vmem:[#allocation32_spill] sm:$0xff] %v2644_v34  ;;  %v905_v34 = vrot.slane %v904_v51, 4 }
  0xba   : > { %3227 = vst [vmem:[#allocation33_spill] sm:$0xff] %v2648_v15  ;;  %v898_v15 = vrot.slane %v897_v31, 4 }
  0xbb   : > { %3229 = vst [vmem:[#allocation34_spill] sm:$0xff] %v2652_v52  ;;  %v891_v52 = vrot.slane %v890_v60, 4  ;;  %v906_v3 = vmax.f32 %v904_v51, %v905_v34 }
  0xbc   : > { %3231 = vst [vmem:[#allocation35_spill] sm:$0xff] %v2656_v26  ;;  %v884_v26 = vrot.slane %v883_v16, 4  ;;  %v899_v40 = vmax.f32 %v897_v31, %v898_v15 }
  0xbd   : > { %3232 = vst [vmem:[#allocation36_spill] sm:$0xff] %v2660_v23  ;;  %v877_v23 = vrot.slane %v876_v10, 4  ;;  %v892_v43 = vmax.f32 %v890_v60, %v891_v52  ;;  %v907_v18 = vrot.slane %v906_v3, 2 }
  0xbe   : > { %3233 = vst [vmem:[#allocation48_spill] sm:$0xff] %v2663_v50  ;;  %v870_v50 = vrot.slane %v869_v17, 4  ;;  %v885_v27 = vmax.f32 %v883_v16, %v884_v26  ;;  %v900_v44 = vrot.slane %v899_v40, 2 }
  0xbf   : > { %3234 = vst [vmem:[#allocation49_spill] sm:$0xff] %v2666_v21  ;;  %v863_v21 = vrot.slane %v862_v0, 4  ;;  %v878_v2 = vmax.f32 %v876_v10, %v877_v23  ;;  %v893_v5 = vrot.slane %v892_v43, 2  ;;  %v908_v23 = vmax.f32 %v906_v3, %v907_v18 }
  0xc0   : > { %3235 = vst [vmem:[#allocation50_spill] sm:$0xff] %v2669_v7  ;;  %v856_v7 = vrot.slane %v855_v37, 4  ;;  %v871_v39 = vmax.f32 %v869_v17, %v870_v50  ;;  %v886_v35 = vrot.slane %v885_v27, 2  ;;  %v901_v50 = vmax.f32 %v899_v40, %v900_v44 }
  0xc1   : > { %v864_v9 = vmax.f32 %v862_v0, %v863_v21  ;;  %v879_v38 = vrot.slane %v878_v2, 2  ;;  %v894_v21 = vmax.f32 %v892_v43, %v893_v5  ;;  %v909_v10 = vrot.slane %v908_v23, 1 }
  0xc2   : > { %v857_v45 = vmax.f32 %v855_v37, %v856_v7  ;;  %v872_v58 = vrot.slane %v871_v39, 2  ;;  %v887_v7 = vmax.f32 %v885_v27, %v886_v35  ;;  %v902_v17 = vrot.slane %v901_v50, 1 }
  0xc3   : > { %v865_v32 = vrot.slane %v864_v9, 2  ;;  %v880_v55 = vmax.f32 %v878_v2, %v879_v38  ;;  %v895_v0 = vrot.slane %v894_v21, 1  ;;  %v910_v38 = vmax.f32 %v908_v23, %v909_v10 }
  0xc4   : > { %v858_v25 = vrot.slane %v857_v45, 2  ;;  %v873_v14 = vmax.f32 %v871_v39, %v872_v58  ;;  %v888_v37 = vrot.slane %v887_v7, 1  ;;  %v903_v58 = vmax.f32 %v901_v50, %v902_v17 }
  0xc5   : > { %v866_v63 = vmax.f32 %v864_v9, %v865_v32  ;;  %v881_v34 = vrot.slane %v880_v55, 1  ;;  %v896_v32 = vmax.f32 %v894_v21, %v895_v0  ;;  %v911_v35 = vlaneseq }
  0xc6   : > { %v859_v49 = vmax.f32 %v857_v45, %v858_v25  ;;  %v874_v15 = vrot.slane %v873_v14, 1  ;;  %v889_v25 = vmax.f32 %v887_v7, %v888_v37  ;;  %vm926_vm12 = vcmp.eq.f32.partialorder %v3241_v1, %v903_v58 }
  0xc7   : > { %v867_v52 = vrot.slane %v866_v63, 1  ;;  %v882_v51 = vmax.f32 %v880_v55, %v881_v34  ;;  %v2694_v55 = vshrl.u32 %v911_v35, 7  ;;  %vm924_vm10 = vcmp.eq.f32.partialorder %v3239_v30, %v896_v32  ;;  %v3245_v35 = vld [vmem:[#allocation38_spill] sm:$0xff] }
  0xc8   : > { %v860_v26 = vrot.slane %v859_v49, 1  ;;  %v875_v31 = vmax.f32 %v873_v14, %v874_v15  ;;  %vm922_vm8 = vcmp.eq.f32.partialorder %v3237_v46, %v889_v25  ;;  %vm923_vm9 = vcmp.eq.f32.partialorder %v3236_v11, %v889_v25 }
  0xc9   : > { %v868_v60 = vmax.f32 %v866_v63, %v867_v52  ;;  %vm920_vm6 = vcmp.eq.f32.partialorder %v2207_v57, %v882_v51  ;;  %vm921_vm7 = vcmp.eq.f32.partialorder %v2212_v22, %v882_v51  ;;  %vm925_vm11 = vcmp.eq.f32.partialorder %v3238_v12, %v896_v32 }
  0xca   : > { %v861_v16 = vmax.f32 %v859_v49, %v860_v26  ;;  %vm918_vm4 = vcmp.eq.f32.partialorder %v2203_v54, %v875_v31  ;;  %vm919_vm5 = vcmp.eq.f32.partialorder %v2205_v59, %v875_v31  ;;  %vm927_vm13 = vcmp.eq.f32.partialorder %v3240_v13, %v903_v58  ;;  %v3244_v58 = vld [vmem:[#allocation37_spill] sm:$0xff] }
  0xcb   : > { %vm916_vm2 = vcmp.eq.f32.partialorder %v2189_v33, %v868_v60  ;;  %vm917_vm3 = vcmp.eq.f32.partialorder %v2198_v53, %v868_v60  ;;  %v2704_v14 = vadd.s32 8, %v2694_v55  ;;  %vm928_vm14 = vcmp.eq.f32.partialorder %v3243_v8, %v910_v38 }
  0xcc   : > { %vm914_vm0 = vcmp.eq.f32.partialorder %v2177_v19, %v861_v16  ;;  %vm915_vm1 = vcmp.eq.f32.partialorder %v2183_v20, %v861_v16  ;;  %vm929_vm15 = vcmp.eq.f32.partialorder %v3242_v41, %v910_v38  ;;  %v932_v63 = vsel %vm916_vm2, %v2694_v55, 16 }
  0xcd   : > { %v930_v57 = vsel %vm914_vm0, %v2694_v55, 16  ;;  %v934_v49 = vsel %vm918_vm4, %v2694_v55, 16  ;;  %v936_v3 = vsel %vm920_vm6, %v2694_v55, 16  ;;  %v938_v18 = vsel %vm922_vm8, %v2694_v55, 16 }
  0xce   : > { %v931_v40 = vsel %vm915_vm1, %v2704_v14, 16  ;;  %v933_v19 = vsel %vm917_vm3, %v2704_v14, 16  ;;  %v935_v33 = vsel %vm919_vm5, %v2704_v14, 16  ;;  %v937_v54 = vsel %vm921_vm7, %v2704_v14, 16 }
  0xcf   : > { %v939_v44 = vsel %vm923_vm9, %v2704_v14, 16  ;;  %v940_v20 = vsel %vm924_vm10, %v2694_v55, 16  ;;  %v941_v53 = vsel %vm925_vm11, %v2704_v14, 16  ;;  %v942_v59 = vsel %vm926_vm12, %v2694_v55, 16 }
  0xd0   : > { %v943_v22 = vsel %vm927_vm13, %v2704_v14, 16  ;;  %v2749_v5 = vsel %vm928_vm14, %v2694_v55, 16  ;;  %v945_v27 = vsel %vm929_vm15, %v2704_v14, 16  ;;  %vm946_vm0 = vcmp.lt.s32.totalorder %v930_v57, %v931_v40 }
  0xd1   : > { %v947_v43 = vsel %vm946_vm0, %v930_v57, %v931_v40  ;;  %vm957_vm1 = vcmp.lt.s32.totalorder %v932_v63, %v933_v19  ;;  %vm968_vm2 = vcmp.lt.s32.totalorder %v934_v49, %v935_v33  ;;  %vm979_vm3 = vcmp.lt.s32.totalorder %v936_v3, %v937_v54 }
  0xd2   : > { %v948_v2 = vrot.slane %v947_v43, 4  ;;  %v958_v39 = vsel %vm957_vm1, %v932_v63, %v933_v19  ;;  %v969_v9 = vsel %vm968_vm2, %v934_v49, %v935_v33  ;;  %v980_v45 = vsel %vm979_vm3, %v936_v3, %v937_v54  ;;  %v3246_v63 = vld [vmem:[#allocation39_spill] sm:$0xff] }
  0xd3   : > { %v959_v11 = vrot.slane %v958_v39, 4  ;;  %v970_v46 = vrot.slane %v969_v9, 4  ;;  %v981_v12 = vrot.slane %v980_v45, 4  ;;  %vm990_vm4 = vcmp.lt.s32.totalorder %v938_v18, %v939_v44 }
  0xd4   : > { %vm949_vm5 = vcmp.lt.s32.totalorder %v947_v43, %v948_v2  ;;  %v991_v30 = vsel %vm990_vm4, %v938_v18, %v939_v44  ;;  %vm1001_vm6 = vcmp.lt.s32.totalorder %v940_v20, %v941_v53  ;;  %vm1012_vm7 = vcmp.lt.s32.totalorder %v942_v59, %v943_v22 }
  0xd5   : > { %v950_v13 = vsel %vm949_vm5, %v947_v43, %v948_v2  ;;  %vm960_vm8 = vcmp.lt.s32.totalorder %v958_v39, %v959_v11  ;;  %vm971_vm9 = vcmp.lt.s32.totalorder %v969_v9, %v970_v46  ;;  %vm982_vm10 = vcmp.lt.s32.totalorder %v980_v45, %v981_v12 }
  0xd6   : > { %v951_v1 = vrot.slane %v950_v13, 2  ;;  %v961_v41 = vsel %vm960_vm8, %v958_v39, %v959_v11  ;;  %v972_v8 = vsel %vm971_vm9, %v969_v9, %v970_v46  ;;  %v983_v7 = vsel %vm982_vm10, %v980_v45, %v981_v12 }
  0xd7   : > { %v962_v21 = vrot.slane %v961_v41, 2  ;;  %v973_v50 = vrot.slane %v972_v8, 2  ;;  %v984_v23 = vrot.slane %v983_v7, 2  ;;  %v992_v26 = vrot.slane %v991_v30, 4 }
  0xd8   : > { %vm952_vm11 = vcmp.lt.s32.totalorder %v950_v13, %v951_v1  ;;  %v1002_v52 = vsel %vm1001_vm6, %v940_v20, %v941_v53  ;;  %v1013_v15 = vsel %vm1012_vm7, %v942_v59, %v943_v22  ;;  %vm1023_vm12 = vcmp.lt.s32.totalorder %v2749_v5, %v945_v27 }
  0xd9   : > { %v953_v34 = vsel %vm952_vm11, %v950_v13, %v951_v1  ;;  %vm963_vm13 = vcmp.lt.s32.totalorder %v961_v41, %v962_v21  ;;  %vm974_vm14 = vcmp.lt.s32.totalorder %v972_v8, %v973_v50  ;;  %vm985_vm15 = vcmp.lt.s32.totalorder %v983_v7, %v984_v23 }
  0xda   : > { %v954_v37 = vrot.slane %v953_v34, 1  ;;  %v964_v0 = vsel %vm963_vm13, %v961_v41, %v962_v21  ;;  %v975_v17 = vsel %vm974_vm14, %v972_v8, %v973_v50  ;;  %v986_v10 = vsel %vm985_vm15, %v983_v7, %v984_v23 }
  0xdb   : > { %v965_v16 = vrot.slane %v964_v0, 1  ;;  %v976_v60 = vrot.slane %v975_v17, 1  ;;  %v987_v31 = vrot.slane %v986_v10, 1  ;;  %vm993_vm0 = vcmp.lt.s32.totalorder %v991_v30, %v992_v26 }
  0xdc   : > { %vm955_vm1 = vcmp.lt.s32.totalorder %v953_v34, %v954_v37  ;;  %v994_v51 = vsel %vm993_vm0, %v991_v30, %v992_v26  ;;  %v1003_v25 = vrot.slane %v1002_v52, 4  ;;  %v1014_v32 = vrot.slane %v1013_v15, 4 }
  0xdd   : > { %v2757_v38 = vmul.f32 %v2537_v47, %v3244_v58  ;;  %v2761_v57 = vmul.f32 %v2551_v48, %v3245_v35  ;;  %v2765_v49 = vmul.f32 %v2583_v24, %v3246_v63  ;;  %vm966_vm2 = vcmp.lt.s32.totalorder %v964_v0, %v965_v16  ;;  %v3248_v63 = vld [vmem:[#allocation4_spill] sm:$0xff] }
  0xde   : > { %v956_v3 = vsel %vm955_vm1, %v953_v34, %v954_v37  ;;  %vm977_vm3 = vcmp.lt.s32.totalorder %v975_v17, %v976_v60  ;;  %vm988_vm4 = vcmp.lt.s32.totalorder %v986_v10, %v987_v31  ;;  %v995_v18 = vrot.slane %v994_v51, 2 }
  0xdf   : > { %v967_v40 = vsel %vm966_vm2, %v964_v0, %v965_v16  ;;  %vm1004_vm5 = vcmp.lt.s32.totalorder %v1002_v52, %v1003_v25  ;;  %vm1015_vm6 = vcmp.lt.s32.totalorder %v1013_v15, %v1014_v32  ;;  %v1024_v47 = vsel %vm1023_vm12, %v2749_v5, %v945_v27 }
  0xe0   : > { %vm996_vm7 = vcmp.lt.s32.totalorder %v994_v51, %v995_v18  ;;  %v1005_v19 = vsel %vm1004_vm5, %v1002_v52, %v1003_v25  ;;  %v1016_v48 = vsel %vm1015_vm6, %v1013_v15, %v1014_v32  ;;  %v1025_v33 = vrot.slane %v1024_v47, 4 }
  0xe1   : > { %v978_v54 = vsel %vm977_vm3, %v975_v17, %v976_v60  ;;  %v997_v44 = vsel %vm996_vm7, %v994_v51, %v995_v18  ;;  %v1006_v24 = vrot.slane %v1005_v19, 2  ;;  %v1017_v20 = vrot.slane %v1016_v48, 2  ;;  %v3249_v18 = vld [vmem:[#allocation5_spill] sm:$0xff] }
  0xe2   : > { %v989_v53 = vsel %vm988_vm4, %v986_v10, %v987_v31  ;;  %v998_v59 = vrot.slane %v997_v44, 1  ;;  %vm1026_vm8 = vcmp.lt.s32.totalorder %v1024_v47, %v1025_v33  ;;  %vm1034_vm9 = vcmp.eq.s32.totalorder %v2694_v55, %v956_v3 }
  0xe3   : > { %vm1007_vm10 = vcmp.lt.s32.totalorder %v1005_v19, %v1006_v24  ;;  %vm1018_vm11 = vcmp.lt.s32.totalorder %v1016_v48, %v1017_v20  ;;  %v1027_v22 = vsel %vm1026_vm8, %v1024_v47, %v1025_v33  ;;  %vm1035_vm13 = vcmp.eq.s32.totalorder %v2704_v14, %v956_v3  ;;  %v3251_v47 = vld [vmem:[#allocation15_spill] sm:$0xff] }
  0xe4   : > { %vm999_vm14 = vcmp.lt.s32.totalorder %v997_v44, %v998_v59  ;;  %v1008_v5 = vsel %vm1007_vm10, %v1005_v19, %v1006_v24  ;;  %v1019_v27 = vsel %vm1018_vm11, %v1016_v48, %v1017_v20  ;;  %v1028_v43 = vrot.slane %v1027_v22, 2  ;;  %v3252_v19 = vld [vmem:[#allocation17_spill] sm:$0xff]  ;;  %v3258_v20 = vld [vmem:[#allocation14_spill] sm:$0xff] }
  0xe5   : > { %v1009_v2 = vrot.slane %v1008_v5, 1  ;;  %v1020_v39 = vrot.slane %v1019_v27, 1  ;;  %vm1036_vm12 = vcmp.eq.s32.totalorder %v2694_v55, %v967_v40  ;;  %vm1037_vm15 = vcmp.eq.s32.totalorder %v2704_v14, %v967_v40  ;;  %v3250_v40 = vld [vmem:[#allocation7_spill] sm:$0xff]  ;;  %v3254_v48 = vld [vmem:[#allocation21_spill] sm:$0xff] }
  0xe6   : > { %v1000_v9 = vsel %vm999_vm14, %v997_v44, %v998_v59  ;;  %vm1029_vm0 = vcmp.lt.s32.totalorder %v1027_v22, %v1028_v43  ;;  %vm1038_vm1 = vcmp.eq.s32.totalorder %v2694_v55, %v978_v54  ;;  %vm1040_vm5 = vcmp.eq.s32.totalorder %v2694_v55, %v989_v53  ;;  %v3257_v44 = vld [vmem:[#allocation8_spill] sm:$0xff] }
  0xe7   : > { %vm1010_vm3 = vcmp.lt.s32.totalorder %v1008_v5, %v1009_v2  ;;  %vm1021_vm4 = vcmp.lt.s32.totalorder %v1019_v27, %v1020_v39  ;;  %v1030_v45 = vsel %vm1029_vm0, %v1027_v22, %v1028_v43  ;;  %vm1041_vm6 = vcmp.eq.s32.totalorder %v2704_v14, %v989_v53  ;;  %v3259_v59 = vld [vmem:[#allocation16_spill] sm:$0xff]  ;;  %v3261_v43 = vld [vmem:[#allocation18_spill] sm:$0xff] }
  0xe8   : > { %v1011_v11 = vsel %vm1010_vm3, %v1008_v5, %v1009_v2  ;;  %v1022_v46 = vsel %vm1021_vm4, %v1019_v27, %v1020_v39  ;;  %v1031_v12 = vrot.slane %v1030_v45, 1  ;;  %vm1042_vm7 = vcmp.eq.s32.totalorder %v2694_v55, %v1000_v9  ;;  %v3260_v5 = vld [vmem:[#allocation9_spill] sm:$0xff]  ;;  %v3262_v39 = vld [vmem:[#allocation10_spill] sm:$0xff] }
  0xe9   : > { %vm1043_vm8 = vcmp.eq.s32.totalorder %v2704_v14, %v1000_v9  ;;  %vm1044_vm10 = vcmp.eq.s32.totalorder %v2694_v55, %v1011_v11  ;;  %vm1045_vm14 = vcmp.eq.s32.totalorder %v2704_v14, %v1011_v11  ;;  %vm1046_vm2 = vcmp.eq.s32.totalorder %v2694_v55, %v1022_v46 }
  0xea   : > { %vm1032_vm11 = vcmp.lt.s32.totalorder %v1030_v45, %v1031_v12  ;;  %vm1047_vm0 = vcmp.eq.s32.totalorder %v2704_v14, %v1022_v46  ;;  %v1693_v13 = vmov 0.0   ;;  %v3264_v46 = vld [vmem:[#allocation11_spill] sm:$0xff] }
  0xeb   : > { %v1033_v30 = vsel %vm1032_vm11, %v1030_v45, %v1031_v12  ;;  %v1469_v1 = vsel %vm1034_vm9, 1.0, %v1693_v13  ;;  %v1470_v41 = vsel %vm1035_vm13, 1.0, %v1693_v13  ;;  %v1471_v8 = vsel %vm1036_vm12, 1.0, %v1693_v13  ;;  %v3263_v45 = vld [vmem:[#allocation20_spill] sm:$0xff] }
  0xec   : > { %vm1048_vm3 = vcmp.eq.s32.totalorder %v2694_v55, %v1033_v30  ;;  %vm1049_vm4 = vcmp.eq.s32.totalorder %v2704_v14, %v1033_v30  ;;  %v1472_v7 = vsel %vm1037_vm15, 1.0, %v1693_v13  ;;  %v1473_v21 = vsel %vm1038_vm1, 1.0, %v1693_v13  ;;  %v3265_v30 = vld [vmem:[#allocation22_spill] sm:$0xff] }
  0xed   : > { %vm3247_vm11 = vcmp.eq.s32.totalorder %v2704_v14, %v978_v54  ;;  %v1475_v23 = vsel %vm1040_vm5, 1.0, %v1693_v13  ;;  %v1476_v26 = vsel %vm1041_vm6, 1.0, %v1693_v13  ;;  %v1477_v52 = vsel %vm1042_vm7, 1.0, %v1693_v13 }
  0xee   : > { %v1474_v50 = vsel %vm3247_vm11, 1.0, %v1693_v13  ;;  %v1478_v15 = vsel %vm1043_vm8, 1.0, %v1693_v13  ;;  %v1479_v34 = vsel %vm1044_vm10, 1.0, %v1693_v13  ;;  %v1480_v37 = vsel %vm1045_vm14, 1.0, %v1693_v13 }
  0xef   : > { %v1481_v0 = vsel %vm1046_vm2, 1.0, %v1693_v13  ;;  %v2814_v17 = vsel %vm1047_vm0, 1.0, %v1693_v13  ;;  %v2816_v10 = vsel %vm1048_vm3, 1.0, %v1693_v13  ;;  %v2818_v16 = vsel %vm1049_vm4, 1.0, %v1693_v13 }
  0xf0   : > { %v1082_v60 = vmul.f32 %v1469_v1, %v2446_v42  ;;  %v1083_v31 = vmul.f32 %v1470_v41, %v2450_v6  ;;  %v1084_v51 = vmul.f32 %v1471_v8, %v2456_v4  ;;  %v1085_v25 = vmul.f32 %v1472_v7, %v2462_v61 }
  0xf1   : > { %v1086_v32 = vmul.f32 %v1473_v21, %v2468_v62  ;;  %v1087_v55 = vmul.f32 %v1474_v50, %v2473_v36  ;;  %v1088_v14 = vmul.f32 %v1475_v23, %v2481_v29  ;;  %v1089_v58 = vmul.f32 %v1476_v26, %v2490_v56  ;;  %v3253_v62 = vld [vmem:[#allocation19_spill] sm:$0xff]  ;;  %v3255_v56 = vld [vmem:[#allocation6_spill] sm:$0xff] }
  0xf2   : > { %v1090_v35 = vmul.f32 %v1477_v52, %v2494_v28  ;;  %v1091_v3 = vmul.f32 %v1478_v15, %v3248_v63  ;;  %v1092_v42 = vmul.f32 %v1479_v34, %v3249_v18  ;;  %v1093_v6 = vmul.f32 %v1480_v37, %v3250_v40  ;;  %v3256_v28 = vld [vmem:[#allocation13_spill] sm:$0xff]  ;;  %v3266_v63 = vld [vmem:[#allocation12_spill] sm:$0xff]  ;;  %v3267_v40 = vld [vmem:[#allocation23_spill] sm:$0xff] }
  0xf3   : > { %v1094_v4 = vmul.f32 %v1481_v0, %v3251_v47  ;;  %v1095_v61 = vmul.f32 %v2814_v17, %v3252_v19  ;;  %v1096_v36 = vmul.f32 %v2816_v10, %v3253_v62  ;;  %v1097_v29 = vmul.f32 %v2818_v16, %v3254_v48  ;;  %v3268_v19 = vld [vmem:[#allocation24_spill] sm:$0xff]  ;;  %v3269_v48 = vld [vmem:[#allocation25_spill] sm:$0xff] }
  0xf4   : > { %v2840_v33 = vmul.f32 %v1469_v1, %v3255_v56  ;;  %v2843_v54 = vmul.f32 %v1470_v41, %v3256_v28  ;;  %v2846_v24 = vmul.f32 %v1471_v8, %v3257_v44  ;;  %v2849_v53 = vmul.f32 %v1472_v7, %v3258_v20  ;;  %v3270_v28 = vld [vmem:[#allocation26_spill] sm:$0xff]  ;;  %v3272_v20 = vld [vmem:[#allocation27_spill] sm:$0xff] }
  0xf5   : > { %v2852_v22 = vmul.f32 %v1473_v21, %v3259_v59  ;;  %v2855_v27 = vmul.f32 %v1474_v50, %v3260_v5  ;;  %v2858_v2 = vmul.f32 %v1475_v23, %v3261_v43  ;;  %v2861_v9 = vmul.f32 %v1476_v26, %v3262_v39  ;;  %v3273_v5 = vld [vmem:[#allocation28_spill] sm:$0xff]  ;;  %v3274_v39 = vld [vmem:[#allocation29_spill] sm:$0xff] }
  0xf6   : > { %v2864_v11 = vmul.f32 %v1477_v52, %v3263_v45  ;;  %v2867_v12 = vmul.f32 %v1478_v15, %v3264_v46  ;;  %v2870_v13 = vmul.f32 %v1479_v34, %v3265_v30  ;;  %v2873_v18 = vmul.f32 %v1480_v37, %v3266_v63  ;;  %v3275_v46 = vld [vmem:[#allocation30_spill] sm:$0xff]  ;;  %v3276_v63 = vld [vmem:[#allocation31_spill] sm:$0xff] }
  0xf7   : > { %v2876_v47 = vmul.f32 %v1481_v0, %v3267_v40  ;;  %v2880_v62 = vmul.f32 %v2814_v17, %v3268_v19  ;;  %v2884_v56 = vmul.f32 %v2816_v10, %v3269_v48  ;;  %v2888_v44 = vmul.f32 %v2818_v16, %v3270_v28  ;;  %v3277_v19 = vld [vmem:[#allocation32_spill] sm:$0xff]  ;;  %v3278_v28 = vld [vmem:[#allocation33_spill] sm:$0xff] }
  0xf8   : > { %v2891_v59 = vmul.f32 %v1469_v1, %v3272_v20  ;;  %v2894_v43 = vmul.f32 %v1470_v41, %v3273_v5  ;;  %v2897_v45 = vmul.f32 %v1471_v8, %v3274_v39  ;;  %v2900_v30 = vmul.f32 %v1472_v7, %v3275_v46  ;;  %v3280_v1 = vld [vmem:[#allocation34_spill] sm:$0xff]  ;;  %v3282_v41 = vld [vmem:[#allocation35_spill] sm:$0xff]  ;;  %v3284_v8 = vld [vmem:[#allocation36_spill] sm:$0xff] }
  0xf9   : > { %3271 = vst [vmem:[#allocation41_spill] sm:$0xff] %v2888_v44  ;;  %v2903_v40 = vmul.f32 %v1473_v21, %v3276_v63  ;;  %v2906_v48 = vmul.f32 %v1474_v50, %v3277_v19  ;;  %v2909_v44 = vmul.f32 %v1475_v23, %v3278_v28  ;;  %v2912_v20 = vmul.f32 %v1476_v26, %v3280_v1  ;;  %v3286_v7 = vld [vmem:[#allocation48_spill] sm:$0xff]  ;;  %v3288_v21 = vld [vmem:[#allocation49_spill] sm:$0xff]  ;;  %v3290_v50 = vld [vmem:[#allocation50_spill] sm:$0xff] }
  0xfa   : > { %v2915_v5 = vmul.f32 %v1477_v52, %v3282_v41  ;;  %v2918_v39 = vmul.f32 %v1478_v15, %v3284_v8  ;;  %v2921_v46 = vmul.f32 %v1479_v34, %v3286_v7  ;;  %v2924_v63 = vmul.f32 %v1480_v37, %v3288_v21 }
  0xfb   : > { %3279 = vst [vmem:[#allocation40_spill] sm:$0xff] %v2909_v44  ;;  %v2927_v19 = vmul.f32 %v1481_v0, %v3290_v50  ;;  %v1130_v23 = vadd.f32 %v1083_v31, %v1082_v60  ;;  %v1137_v28 = vadd.f32 %v1085_v25, %v1084_v51  ;;  %v1144_v44 = vadd.f32 %v1087_v55, %v1086_v32 }
  0xfc   : > { %3281 = vst [vmem:[#allocation43_spill] sm:$0xff] %v2912_v20  ;;  %v1151_v26 = vadd.f32 %v1089_v58, %v1088_v14  ;;  %v1158_v1 = vadd.f32 %v1091_v3, %v1090_v35  ;;  %v1165_v20 = vadd.f32 %v1093_v6, %v1092_v42  ;;  %v1172_v52 = vadd.f32 %v1095_v61, %v1094_v4 }
  0xfd   : > { %3283 = vst [vmem:[#allocation42_spill] sm:$0xff] %v2915_v5  ;;  %v1179_v41 = vadd.f32 %v1097_v29, %v1096_v36  ;;  %v1131_v5 = vrot.slane %v1130_v23, 4  ;;  %v1138_v15 = vrot.slane %v1137_v28, 4  ;;  %v1145_v8 = vrot.slane %v1144_v44, 4 }
  0xfe   : > { %3285 = vst [vmem:[#allocation45_spill] sm:$0xff] %v2918_v39  ;;  %v1152_v39 = vrot.slane %v1151_v26, 4  ;;  %v1159_v34 = vrot.slane %v1158_v1, 4  ;;  %v1166_v7 = vrot.slane %v1165_v20, 4  ;;  %vm1322_vm9 = vcmask 1041409  }
  0xff   : > { %3287 = vst [vmem:[#allocation44_spill] sm:$0xff] %v2921_v46  ;;  %v1173_v46 = vrot.slane %v1172_v52, 4  ;;  %v1180_v37 = vrot.slane %v1179_v41, 4  ;;  %v1132_v21 = vadd.f32 %v1131_v5, %v1130_v23  ;;  %v1146_v0 = vadd.f32 %v1145_v8, %v1144_v44 }
 0x100   : > { %3289 = vst [vmem:[#allocation47_spill] sm:$0xff] %v2924_v63  ;;  %v1139_v63 = vadd.f32 %v1138_v15, %v1137_v28  ;;  %v1153_v50 = vadd.f32 %v1152_v39, %v1151_v26  ;;  %v1160_v60 = vadd.f32 %v1159_v34, %v1158_v1  ;;  %v1167_v31 = vadd.f32 %v1166_v7, %v1165_v20 }
 0x101   : > { %v1174_v51 = vadd.f32 %v1173_v46, %v1172_v52  ;;  %v1181_v25 = vadd.f32 %v1180_v37, %v1179_v41  ;;  %v1133_v32 = vrot.slane %v1132_v21, 2  ;;  %v1147_v14 = vrot.slane %v1146_v0, 2 }
 0x102   : > { %v1140_v55 = vrot.slane %v1139_v63, 2  ;;  %v1154_v58 = vrot.slane %v1153_v50, 2  ;;  %v1161_v35 = vrot.slane %v1160_v60, 2  ;;  %v1168_v3 = vrot.slane %v1167_v31, 2 }
 0x103   : > { %v1175_v42 = vrot.slane %v1174_v51, 2  ;;  %v1182_v6 = vrot.slane %v1181_v25, 2  ;;  %v1134_v4 = vadd.f32 %v1133_v32, %v1132_v21  ;;  %v1148_v36 = vadd.f32 %v1147_v14, %v1146_v0 }
 0x104   : > { %v1141_v61 = vadd.f32 %v1140_v55, %v1139_v63  ;;  %v1155_v29 = vadd.f32 %v1154_v58, %v1153_v50  ;;  %v1162_v5 = vadd.f32 %v1161_v35, %v1160_v60  ;;  %v2929_v23 = vadd.f32 %v1168_v3, %v1167_v31 }
 0x105   : > { %v2931_v44 = vadd.f32 %v1175_v42, %v1174_v51  ;;  %v2933_v20 = vadd.f32 %v1182_v6, %v1181_v25  ;;  %v1135_v39 = vrot.slane %v1134_v4, 1  ;;  %v1149_v28 = vrot.slane %v1148_v36, 1 }
 0x106   : > { %v1142_v46 = vrot.slane %v1141_v61, 1  ;;  %v1156_v26 = vrot.slane %v1155_v29, 1  ;;  %v2937_v1 = vmul.f32 %v2814_v17, %v2757_v38  ;;  %v2941_v63 = vmul.f32 %v2816_v10, %v2761_v57 }
 0x107   : > { %v2945_v52 = vmul.f32 %v2818_v16, %v2765_v49  ;;  %v1163_v41 = vrot.slane %v1162_v5, 1  ;;  %v2947_v15 = vadd.f32 %v1135_v39, %v1134_v4  ;;  %v1170_v8 = vrot.slane %v2929_v23, 1 }
 0x108   : > { %v1177_v34 = vrot.slane %v2931_v44, 1  ;;  %v1184_v7 = vrot.slane %v2933_v20, 1  ;;  %v2952_v37 = vadd.f32 %v1142_v46, %v1141_v61  ;;  %v2954_v38 = vadd.f32 %v1149_v28, %v1148_v36 }
 0x109   : > { %v2956_v17 = vadd.f32 %v1156_v26, %v1155_v29  ;;  %v2958_v57 = vadd.f32 %v1163_v41, %v1162_v5  ;;  %v1186_v49 = vadd.f32 %v2843_v54, %v2840_v33  ;;  %v1193_v10 = vadd.f32 %v2849_v53, %v2846_v24  ;;  %v3291_v33 = vld [vmem:[#allocation41_spill] sm:$0xff] }
 0x10a   : > { %v1200_v16 = vadd.f32 %v2855_v27, %v2852_v22  ;;  %v1207_v21 = vadd.f32 %v2861_v9, %v2858_v2  ;;  %v1214_v0 = vadd.f32 %v2867_v12, %v2864_v11  ;;  %v1221_v50 = vadd.f32 %v2873_v18, %v2870_v13 }
 0x10b   : > { %v1228_v60 = vadd.f32 %v2880_v62, %v2876_v47  ;;  %v1235_v54 = vadd.f32 %v3291_v33, %v2884_v56  ;;  %v1187_v31 = vrot.slane %v1186_v49, 4  ;;  %v1194_v24 = vrot.slane %v1193_v10, 4 }
 0x10c   : > { %v1201_v53 = vrot.slane %v1200_v16, 4  ;;  %v1208_v51 = vrot.slane %v1207_v21, 4  ;;  %v1215_v22 = vrot.slane %v1214_v0, 4  ;;  %v1222_v27 = vrot.slane %v1221_v50, 4 }
 0x10d   : > { %v1229_v25 = vrot.slane %v1228_v60, 4  ;;  %v1236_v2 = vrot.slane %v1235_v54, 4  ;;  %v1188_v9 = vadd.f32 %v1187_v31, %v1186_v49  ;;  %v1195_v32 = vadd.f32 %v1194_v24, %v1193_v10 }
 0x10e   : > { %v1202_v11 = vadd.f32 %v1201_v53, %v1200_v16  ;;  %v1209_v12 = vadd.f32 %v1208_v51, %v1207_v21  ;;  %v1216_v55 = vadd.f32 %v1215_v22, %v1214_v0  ;;  %v1223_v13 = vadd.f32 %v1222_v27, %v1221_v50  ;;  %v3293_v51 = vld [vmem:[#allocation43_spill] sm:$0xff]  ;;  %v3294_v27 = vld [vmem:[#allocation42_spill] sm:$0xff] }
 0x10f   : > { %v1230_v18 = vadd.f32 %v1229_v25, %v1228_v60  ;;  %v1237_v14 = vadd.f32 %v1236_v2, %v1235_v54  ;;  %v1189_v47 = vrot.slane %v1188_v9, 2  ;;  %v1196_v62 = vrot.slane %v1195_v32, 2  ;;  %v3295_v25 = vld [vmem:[#allocation45_spill] sm:$0xff] }
 0x110   : > { %v1203_v58 = vrot.slane %v1202_v11, 2  ;;  %v1210_v56 = vrot.slane %v1209_v12, 2  ;;  %v1217_v35 = vrot.slane %v1216_v55, 2  ;;  %v1224_v3 = vrot.slane %v1223_v13, 2 }
 0x111   : > { %v1231_v42 = vrot.slane %v1230_v18, 2  ;;  %v1238_v6 = vrot.slane %v1237_v14, 2  ;;  %v1190_v4 = vadd.f32 %v1189_v47, %v1188_v9  ;;  %v1197_v61 = vadd.f32 %v1196_v62, %v1195_v32  ;;  %v3296_v9 = vld [vmem:[#allocation44_spill] sm:$0xff]  ;;  %v3297_v32 = vld [vmem:[#allocation47_spill] sm:$0xff] }
 0x112   : > { %v1204_v36 = vadd.f32 %v1203_v58, %v1202_v11  ;;  %v1211_v29 = vadd.f32 %v1210_v56, %v1209_v12  ;;  %v1218_v5 = vadd.f32 %v1217_v35, %v1216_v55  ;;  %v2976_v39 = vadd.f32 %v1224_v3, %v1223_v13 }
 0x113   : > { %v2978_v46 = vadd.f32 %v1231_v42, %v1230_v18  ;;  %v2980_v28 = vadd.f32 %v1238_v6, %v1237_v14  ;;  %v1191_v26 = vrot.slane %v1190_v4, 1  ;;  %v1198_v41 = vrot.slane %v1197_v61, 1 }
 0x114   : > { %v1205_v49 = vrot.slane %v1204_v36, 1  ;;  %v1212_v10 = vrot.slane %v1211_v29, 1  ;;  %v2983_v16 = vadd.f32 %v1170_v8, %v2929_v23  ;;  %v2986_v21 = vadd.f32 %v1177_v34, %v2931_v44 }
 0x115   : > { %v2989_v0 = vadd.f32 %v1184_v7, %v2933_v20  ;;  %v1219_v50 = vrot.slane %v1218_v5, 1  ;;  %v2991_v60 = vadd.f32 %v1191_v26, %v1190_v4  ;;  %v1226_v33 = vrot.slane %v2976_v39, 1  ;;  %v3292_v7 = vld [vmem:[#allocation40_spill] sm:$0xff] }
 0x116   : > { %v1233_v54 = vrot.slane %v2978_v46, 1  ;;  %v1240_v31 = vrot.slane %v2980_v28, 1  ;;  %v2996_v24 = vadd.f32 %v1198_v41, %v1197_v61  ;;  %v2998_v53 = vadd.f32 %v1205_v49, %v1204_v36 }
 0x117   : > { %v3000_v23 = vadd.f32 %v1212_v10, %v1211_v29  ;;  %v3002_v44 = vadd.f32 %v1219_v50, %v1218_v5  ;;  %v1242_v20 = vadd.f32 %v2894_v43, %v2891_v59  ;;  %v1249_v8 = vadd.f32 %v2900_v30, %v2897_v45 }
 0x118   : > { %v1256_v34 = vadd.f32 %v2906_v48, %v2903_v40  ;;  %v1263_v22 = vadd.f32 %v3293_v51, %v3292_v7  ;;  %v1270_v2 = vadd.f32 %v3295_v25, %v3294_v27  ;;  %v1277_v11 = vadd.f32 %v3297_v32, %v3296_v9 }
 0x119   : > { %v1284_v12 = vadd.f32 %v2937_v1, %v2927_v19  ;;  %v1291_v59 = vadd.f32 %v2945_v52, %v2941_v63  ;;  %v1243_v43 = vrot.slane %v1242_v20, 4  ;;  %v1250_v45 = vrot.slane %v1249_v8, 4 }
 0x11a   : > { %v1257_v30 = vrot.slane %v1256_v34, 4  ;;  %v1264_v55 = vrot.slane %v1263_v22, 4  ;;  %v1271_v40 = vrot.slane %v1270_v2, 4  ;;  %v1278_v48 = vrot.slane %v1277_v11, 4 }
 0x11b   : > { %v1285_v13 = vrot.slane %v1284_v12, 4  ;;  %v1292_v18 = vrot.slane %v1291_v59, 4  ;;  %v1244_v14 = vadd.f32 %v1243_v43, %v1242_v20  ;;  %v1251_v47 = vadd.f32 %v1250_v45, %v1249_v8 }
 0x11c   : > { %v1258_v62 = vadd.f32 %v1257_v30, %v1256_v34  ;;  %v1265_v58 = vadd.f32 %v1264_v55, %v1263_v22  ;;  %v1272_v56 = vadd.f32 %v1271_v40, %v1270_v2  ;;  %v1279_v35 = vadd.f32 %v1278_v48, %v1277_v11 }
 0x11d   : > { %v1286_v3 = vadd.f32 %v1285_v13, %v1284_v12  ;;  %v1293_v42 = vadd.f32 %v1292_v18, %v1291_v59  ;;  %v1245_v19 = vrot.slane %v1244_v14, 2  ;;  %v1252_v1 = vrot.slane %v1251_v47, 2 }
 0x11e   : > { %v1259_v6 = vrot.slane %v1258_v62, 2  ;;  %v1266_v63 = vrot.slane %v1265_v58, 2  ;;  %v1273_v52 = vrot.slane %v1272_v56, 2  ;;  %v1280_v4 = vrot.slane %v1279_v35, 2 }
 0x11f   : > { %v1287_v61 = vrot.slane %v1286_v3, 2  ;;  %v1294_v36 = vrot.slane %v1293_v42, 2  ;;  %v1246_v29 = vadd.f32 %v1245_v19, %v1244_v14  ;;  %v1253_v5 = vadd.f32 %v1252_v1, %v1251_v47 }
 0x120   : > { %v1260_v26 = vadd.f32 %v1259_v6, %v1258_v62  ;;  %v1267_v41 = vadd.f32 %v1266_v63, %v1265_v58  ;;  %v1274_v49 = vadd.f32 %v1273_v52, %v1272_v56  ;;  %v1281_v10 = vadd.f32 %v1280_v4, %v1279_v35 }
 0x121   : > { %v1288_v50 = vadd.f32 %v1287_v61, %v1286_v3  ;;  %v1295_v20 = vadd.f32 %v1294_v36, %v1293_v42  ;;  %v1247_v8 = vrot.slane %v1246_v29, 1  ;;  %v1254_v34 = vrot.slane %v1253_v5, 1 }
 0x122   : > { %v1261_v7 = vrot.slane %v1260_v26, 1  ;;  %v1268_v51 = vrot.slane %v1267_v41, 1  ;;  %v1275_v22 = vrot.slane %v1274_v49, 1  ;;  %v1282_v27 = vrot.slane %v1281_v10, 1 }
 0x123   : > { %v1289_v25 = vrot.slane %v1288_v50, 1  ;;  %v1296_v2 = vrot.slane %v1295_v20, 1  ;;  %v1227_v9 = vadd.f32 %v1226_v33, %v2976_v39  ;;  %v1234_v32 = vadd.f32 %v1233_v54, %v2978_v46 }
 0x124   : > { %v1248_v11 = vadd.f32 %v1247_v8, %v1246_v29  ;;  %v1255_v12 = vadd.f32 %v1254_v34, %v1253_v5  ;;  %v1241_v59 = vadd.f32 %v1240_v31, %v2980_v28  ;;  %v1262_v43 = vadd.f32 %v1261_v7, %v1260_v26 }
 0x125   : > { %v1269_v45 = vadd.f32 %v1268_v51, %v1267_v41  ;;  %v1276_v30 = vadd.f32 %v1275_v22, %v1274_v49  ;;  %v1283_v55 = vadd.f32 %v1282_v27, %v1281_v10  ;;  %vm1324_vm13 = vcmask 1042434  }
 0x126   : > { %vm1326_vm12 = vcmask 1043459   ;;  %v1290_v40 = vadd.f32 %v1289_v25, %v1288_v50  ;;  %v1297_v48 = vadd.f32 %v1296_v2, %v1295_v20  ;;  %v1323_v39 = vsel %vm1322_vm9, %v2952_v37, %v2947_v15 }
 0x127   : > { %vm1328_vm15 = vcmask 1044484   ;;  %v1325_v46 = vsel %vm1324_vm13, %v2954_v38, %v1323_v39  ;;  %vm1330_vm1 = vcmask 1045509   ;;  %v1336_v28 = vsel %vm1322_vm9, %v2996_v24, %v2991_v60 }
 0x128   : > { %v1343_v33 = vsel %vm1322_vm9, %v1255_v12, %v1248_v11  ;;  %v1327_v54 = vsel %vm1326_vm12, %v2956_v17, %v1325_v46  ;;  %vm1332_vm2 = vcmask 1046534   ;;  %v1337_v31 = vsel %vm1324_vm13, %v2998_v53, %v1336_v28 }
 0x129   : > { %v1344_v13 = vsel %vm1324_vm13, %v1262_v43, %v1343_v33  ;;  %v1329_v18 = vsel %vm1328_vm15, %v2958_v57, %v1327_v54  ;;  %vm1334_vm5 = vcmask 1047559   ;;  %v1338_v15 = vsel %vm1326_vm12, %v3000_v23, %v1337_v31 }
 0x12a   : > { %v1345_v37 = vsel %vm1326_vm12, %v1269_v45, %v1344_v13  ;;  %v1331_v38 = vsel %vm1330_vm1, %v2983_v16, %v1329_v18  ;;  %v1339_v60 = vsel %vm1328_vm15, %v3002_v44, %v1338_v15 }
 0x12b   : > { %v1346_v24 = vsel %vm1328_vm15, %v1276_v30, %v1345_v37  ;;  %v1333_v17 = vsel %vm1332_vm2, %v2986_v21, %v1331_v38  ;;  %v1340_v14 = vsel %vm1330_vm1, %v1227_v9, %v1339_v60  ;;  %1362 = sbr.rel (!%p1739_p5) target bundleno = 312 (0x138), region = 73 }
 0x12c   : > { %v1347_v53 = vsel %vm1330_vm1, %v1283_v55, %v1346_v24  ;;  %v1335_v57 = vsel %vm1334_vm5, %v2989_v0, %v1333_v17  ;;  %v1341_v47 = vsel %vm1332_vm2, %v1234_v32, %v1340_v14 }
 0x12d   : > { %v1348_v62 = vsel %vm1332_vm2, %v1290_v40, %v1347_v53  ;;  %v1342_v58 = vsel %vm1334_vm5, %v1241_v59, %v1341_v47  ;;  %1353 = vst [vmem:[%s369_s3] sm:$0xff] %v1335_v57 }
 0x12e   : > { %v1349_v23 = vsel %vm1334_vm5, %v1297_v48, %v1348_v62  ;;  %1354 = vst [vmem:[%s369_s3 + $0x8] sm:$0xff] %v1342_v58 }
 0x12f   : > { %1355 = vst [vmem:[%s369_s3 + $0x10] sm:$0xff] %v1349_v23 }
 0x134   : > { %v1397_v16 = vld [vmem:[%s369_s3] sm:$0xff] }
 0x135   : > { %v1399_v21 = vld [vmem:[%s369_s3 + $0x8] sm:$0xff]  ;;  %1398 = vst [vmem:[%s1364_s7] sm:$0xff] %v1397_v16 }
 0x136   : > { %v1401_v0 = vld [vmem:[%s369_s3 + $0x10] sm:$0xff]  ;;  %1400 = vst [vmem:[%s1364_s7 + $0x10] sm:$0xff] %v1399_v21 }
 0x137   : > { %1402 = vst [vmem:[%s1364_s7 + $0x20] sm:$0xff] %v1401_v0 }
 0x138 PF: > { %p9_p10 = scmp.ge.s32.totalorder %s1726_s13, 4   ;;  %s3298_s9 = smov %s1687_s10 }
 0x139   : > { %s3299_s10 = smov %s1737_s16  ;;  %s3300_s11 = smov %s1726_s13 }
 0x13a   :  { %11 = sbr.rel (!%p9_p10) target bundleno = 2 (0x2), region = 142 }

</bundles_post_ra>
